<compile_context>
chip_gen: v7x
topology: tpu7x:2x2x1
jax: 0.10.0
libtpu: 0.0.40
codegen_flags: <defaults>
</compile_context>

<pallas_src>
import numpy as np
import jax
import jax.numpy as jnp
from jax import lax
from jax.experimental import pallas as pl
from jax.experimental.pallas import tpu as pltpu


# ----------------------------------------------------------------------------
# Host-side parameter preparation
# ----------------------------------------------------------------------------
def _band_weights(w_hwio, width):
    """HWIO (3,3,Cin,Cout) conv kernel -> (3, W*Cin, W*Cout) banded matrices."""
    w = np.asarray(w_hwio, np.float32)
    c_in, c_out = w.shape[2], w.shape[3]
    band = np.zeros((3, width * c_in, width * c_out), np.float32)
    for dy in range(3):
        for wo in range(width):
            for dx in range(3):
                x = wo + dx - 1                      # input column for this tap
                if 0 <= x < width:                   # pad=1 folded into the band
                    band[dy, x * c_in:(x + 1) * c_in,
                         wo * c_out:(wo + 1) * c_out] = w[dy, dx]
    return jnp.asarray(band, dtype=jnp.bfloat16)     # bf16 MXU operands


def _hpool_selector(width, c_out):
    """0/1 selection matrices implementing the horizontal half of 2x2 max-pool."""
    half = width // 2
    hs = np.zeros((2, width * c_out, half * c_out), np.float32)
    for wo in range(half):
        for c in range(c_out):
            hs[0, (2 * wo) * c_out + c, wo * c_out + c] = 1.0
            hs[1, (2 * wo + 1) * c_out + c, wo * c_out + c] = 1.0
    return jnp.asarray(hs, dtype=jnp.bfloat16)       # 0/1 -> exact in bf16


def _tile_channels(vec, width):
    """Per-channel (1, C) vector -> lane-tiled (1, W*C) vector (f32)."""
    v = np.asarray(vec, np.float32).reshape(-1)
    return jnp.asarray(np.tile(v, width)[None, :])


def compute_strides(layer_cfgs):
    """Per-sample row stride of every layer's stacked, halo-padded input."""
    n_pool = sum(1 for c in layer_cfgs if c["pool"])
    align = max(8, 2 ** n_pool)
    s0 = -(-(layer_cfgs[0]["size"] + 2) // align) * align   # 28 -> 32
    strides = [s0]
    for cfg in layer_cfgs[:-1]:
        strides.append(strides[-1] // 2 if cfg["pool"] else strides[-1])
    assert strides[0] >= layer_cfgs[0]["size"] + 2
    for cfg, s in zip(layer_cfgs, strides):
        assert s >= cfg["size"] + 1                  # shared bottom halo is OK
        assert (not cfg["pool"]) or s % 2 == 0       # keep even/odd phase per sample
    return strides


def prep_kernel_params(params, layer_cfgs, strides, num_latent):
    layers = []
    for cfg, p in zip(layer_cfgs, params["convs"]):
        size, c_out, pool = cfg["size"], cfg["c_out"], cfg["pool"]
        out_size = size // 2 if pool else size
        entry = dict(
            band=_band_weights(p["w"], size),
            b=_tile_channels(p["b"], out_size),
            scale=_tile_channels(p["scale"], out_size),
            shift=_tile_channels(p["shift"], out_size),
        )
        if pool:
            entry["hs"] = _hpool_selector(size, c_out)
        layers.append(entry)

    # Heads: permute rows from torch's C-major flatten (c*Hf*Wf + y*Wf + x) to
    # the kernel's (row y, lane = x*C + c) layout and spread the y-blocks along
    # the N dim (wide = rows_per_sample * 2L) so the head is one dense matmul
    # followed by a 0/1 "fold" matmul.
    last = layer_cfgs[-1]
    hf = last["size"] // 2 if last["pool"] else last["size"]
    cf = last["c_out"]
    r_last = strides[-1] // 2 if last["pool"] else strides[-1]
    two_l = 2 * num_latent
    wide = r_last * two_l

    w_stk = np.concatenate([np.asarray(params["w_mu"], np.float32),
                            np.asarray(params["w_lv"], np.float32)], axis=1)
    w4 = w_stk.reshape(cf, hf, hf, two_l)            # [c, y, x, n]
    wh = np.zeros((hf * cf, wide), np.float32)
    mask = np.zeros((r_last, wide), np.float32)
    for y in range(hf):
        wh[:, y * two_l:(y + 1) * two_l] = (
            w4[:, y, :, :].transpose(1, 0, 2).reshape(hf * cf, two_l))
        mask[y, y * two_l:(y + 1) * two_l] = 1.0     # junk rows (y >= hf) stay 0
    fold = np.zeros((wide, two_l), np.float32)
    for r in range(r_last):
        fold[r * two_l:(r + 1) * two_l, :] = np.eye(two_l, dtype=np.float32)
    bh = np.concatenate([np.asarray(params["b_mu"], np.float32),
                         np.asarray(params["b_lv"], np.float32)], axis=1)
    return dict(layers=layers, wh=jnp.asarray(wh), mask=jnp.asarray(mask),
                fold=jnp.asarray(fold), bh=jnp.asarray(bh))


# ----------------------------------------------------------------------------
# The fused kernel
# ----------------------------------------------------------------------------
def make_fused_kernel(layer_cfgs, strides, batch, num_latent):
    n_layers = len(layer_cfgs)
    two_l = 2 * num_latent
    last = layer_cfgs[-1]
    r_last = strides[-1] // 2 if last["pool"] else strides[-1]
    wide = r_last * two_l

    def conv3(src, band_ref, base, rows, stride):
        # whole-stack 3x3 conv as three banded matmuls (bf16 operands, f32 acc)
        acc = None
        for dy in range(3):
            if stride == 1:
                lhs = src[pl.ds(base + dy, rows), :]
            else:                                     # vertical pool fused here
                lhs = src[pl.ds(base + dy, rows, stride=stride), :]
            d = jnp.dot(lhs.astype(jnp.bfloat16), band_ref[dy],
                        preferred_element_type=jnp.float32)
            acc = d if acc is None else acc + d
        return acc

    def kernel(*refs):
        it = iter(refs)
        x_ref = next(it)
        layer_refs = []
        for cfg in layer_cfgs:
            band = next(it)
            hs = next(it) if cfg["pool"] else None
            bias, scale, shift = next(it), next(it), next(it)
            layer_refs.append((band, hs, bias, scale, shift))
        wh_ref, mask_ref, fold_ref, bh_ref, eps_ref = (next(it) for _ in range(5))
        out_ref = next(it)
        scratches = list(it)                  # inter-layer buffers (layers 1..)

        # The top-halo row is the only row a *valid* conv window reads that the
        # per-step stores never write; re-zero it every step (tiny, megacore-safe).
        for sc in scratches:
            sc[0:1, :] = jnp.zeros((1, sc.shape[1]), jnp.float32)

        src = x_ref
        act = None
        for li, cfg in enumerate(layer_cfgs):
            band, hs, bias, scale, shift = layer_refs[li]
            s_in = strides[li]
            h_in = cfg["size"]
            if cfg["pool"]:
                r_out = s_in // 2
                rows = r_out * batch
                conv_e = conv3(src, band, 0, rows, 2)    # even conv rows (2p)
                conv_o = conv3(src, band, 1, rows, 2)    # odd  conv rows (2p+1)
                vmax = jnp.maximum(conv_e, conv_o).astype(jnp.bfloat16)
                pooled = jnp.maximum(                    # horizontal half of pool
                    jnp.dot(vmax, hs[0], preferred_element_type=jnp.float32),
                    jnp.dot(vmax, hs[1], preferred_element_type=jnp.float32))
                h_valid = h_in // 2
            else:
                r_out = s_in
                rows = r_out * batch
                pooled = conv3(src, band, 0, rows, 1)
                h_valid = h_in
            # conv bias (exact to add after max-pool) + ReLU + eval BatchNorm,
            # all with lane-tiled per-channel vectors (single fused expression).
            act = jnp.maximum(pooled + bias[...], 0.0) * scale[...] + shift[...]
            if li + 1 < n_layers:
                # zero junk rows (jnp.where also stops NaN from uninitialised
                # VMEM) and write one contiguous slab; the zeroed junk rows land
                # exactly on the next layer's halo rows.
                ridx = lax.broadcasted_iota(jnp.int32, act.shape, 0)
                act = jnp.where((ridx % r_out) < h_valid, act, 0.0)
                scratches[li][pl.ds(1, rows), :] = act
                src = scratches[li]

        # ---------------- fused heads (f32 for accuracy) ----------------------
        partial = jnp.dot(act, wh_ref[...], preferred_element_type=jnp.float32)
        p3 = partial.reshape(batch, r_last, wide)         # split major dim only
        keep = (mask_ref[...] > 0.5)[None, :, :]
        ssum = jnp.sum(jnp.where(keep, p3, 0.0), axis=1)  # pick per-row y-block
        out2l = jnp.dot(ssum, fold_ref[...],
                        preferred_element_type=jnp.float32) + bh_ref[...]
        mu = out2l[:, :num_latent]
        lv = out2l[:, num_latent:two_l]
        log_sigma = jnp.maximum(lv, 0.0) + jnp.log1p(jnp.exp(-jnp.abs(lv)))
        z = mu + jnp.exp(log_sigma) * eps_ref[...]        # eps ~ U[0,1)
        out_ref[...] = jnp.concatenate([z, mu, log_sigma], axis=-1)

    return kernel


# ----------------------------------------------------------------------------
# Forward wrapper (single pallas_call, B samples per grid step)
# ----------------------------------------------------------------------------
def beta_encoder_forward(x_nchw, kparams, eps, layer_cfgs, strides, num_latent,
                         samples_per_step):
    n = x_nchw.shape[0]
    bsz = samples_per_step
    assert n % bsz == 0, "batch must be a multiple of samples_per_step"
    steps = n // bsz
    h0, c0 = layer_cfgs[0]["size"], layer_cfgs[0]["c_in"]
    s0, w0 = strides[0], h0 * c0

    # NCHW -> lane-dense (H, W*C) rows; per-sample top halo + zero pad up to the
    # per-sample row stride; stack `bsz` samples per grid step (+8 zero tail
    # rows so the dy=2 strided reads of the last sample stay in bounds).
    x_rows = jnp.transpose(x_nchw, (0, 2, 3, 1)).reshape(n, h0, w0)
    x_pad = jnp.pad(x_rows, ((0, 0), (1, s0 - h0 - 1), (0, 0)))
    x_stk = jnp.pad(x_pad.reshape(steps, bsz * s0, w0), ((0, 0), (0, 8), (0, 0)))
    eps2 = eps.reshape(steps, bsz, num_latent)

    def const_spec(a):
        nd = a.ndim
        return pl.BlockSpec(tuple(a.shape), lambda i, _nd=nd: (0,) * _nd)

    args = [x_stk]
    in_specs = [pl.BlockSpec((None, bsz * s0 + 8, w0), lambda i: (i, 0, 0))]
    for cfg, lp in zip(layer_cfgs, kparams["layers"]):
        group = [lp["band"]] + ([lp["hs"]] if cfg["pool"] else [])
        group += [lp["b"], lp["scale"], lp["shift"]]
        for a in group:
            args.append(a)
            in_specs.append(const_spec(a))
    for a in (kparams["wh"], kparams["mask"], kparams["fold"], kparams["bh"]):
        args.append(a)
        in_specs.append(const_spec(a))
    args.append(eps2)
    in_specs.append(pl.BlockSpec((None, bsz, num_latent), lambda i: (i, 0, 0)))

    out_shape = jax.ShapeDtypeStruct((n, 3 * num_latent), jnp.float32)
    out_spec = pl.BlockSpec((bsz, 3 * num_latent), lambda i: (i, 0))
    scratch = [pltpu.VMEM((bsz * strides[li] + 8,
                           layer_cfgs[li]["size"] * layer_cfgs[li]["c_in"]),
                          jnp.float32)
               for li in range(1, len(layer_cfgs))]

    out = pl.pallas_call(
        make_fused_kernel(layer_cfgs, strides, bsz, num_latent),
        out_shape=out_shape,
        grid=(steps,),
        in_specs=in_specs,
        out_specs=out_spec,
        scratch_shapes=scratch,
        compiler_params=pltpu.CompilerParams(dimension_semantics=("parallel",)),
    )(*args)
    L = num_latent
    return out[:, :L], out[:, L:2 * L], out[:, 2 * L:3 * L]


# ----------------------------------------------------------------------------
# Deterministic synthetic parameters (shapes dictated by the module __init__)
# ----------------------------------------------------------------------------
def init_params(key, num_var, num_neurons, num_latent, maxpool_indices, final_dim):
    convs = []
    c_in = num_var
    bn_eps = 1e-5
    for li, c_out in enumerate(num_neurons):
        key, kw, kb, kg, kbt, km, kv = jax.random.split(key, 7)
        w = jax.random.normal(kw, (3, 3, c_in, c_out), jnp.float32) * (2.0 / (9 * c_in)) ** 0.5
        b = jax.random.normal(kb, (1, c_out), jnp.float32) * 0.05
        gamma = 1.0 + 0.1 * jax.random.normal(kg, (1, c_out), jnp.float32)
        beta = 0.1 * jax.random.normal(kbt, (1, c_out), jnp.float32)
        r_mean = 0.1 * jax.random.normal(km, (1, c_out), jnp.float32)
        r_var = 1.0 + 0.1 * jax.random.uniform(kv, (1, c_out), jnp.float32)
        scale = gamma / jnp.sqrt(r_var + bn_eps)
        shift = beta - r_mean * scale
        convs.append(dict(w=w, b=b, scale=scale, shift=shift,
                          pool=(li in maxpool_indices)))
        c_in = c_out
    feat = final_dim * final_dim * num_neurons[-1]
    key, k1, k2, k3, k4 = jax.random.split(key, 5)
    w_mu = jax.random.normal(k1, (feat, num_latent), jnp.float32) * (1.0 / feat) ** 0.5
    b_mu = jax.random.normal(k2, (1, num_latent), jnp.float32) * 0.05
    w_lv = jax.random.normal(k3, (feat, num_latent), jnp.float32) * (1.0 / feat) ** 0.5
    b_lv = jax.random.normal(k4, (1, num_latent), jnp.float32) * 0.05
    return dict(convs=convs, w_mu=w_mu, b_mu=b_mu, w_lv=w_lv, b_lv=b_lv)


# ----------------------------------------------------------------------------
# Pure-JAX reference (same math, XLA conv, f32) for validation
# ----------------------------------------------------------------------------
def reference_forward(x_nchw, params, eps):
    h = jnp.transpose(x_nchw, (0, 2, 3, 1))
    for p in params["convs"]:
        h = lax.conv_general_dilated(h, p["w"], window_strides=(1, 1), padding="SAME",
                                     dimension_numbers=("NHWC", "HWIO", "NHWC"))
        h = h + p["b"].reshape(1, 1, 1, -1)
        if p["pool"]:
            h = lax.reduce_window(h, -jnp.inf, lax.max,
                                  (1, 2, 2, 1), (1, 2, 2, 1), "VALID")
        h = jnp.maximum(h, 0.0)
        h = h * p["scale"].reshape(1, 1, 1, -1) + p["shift"].reshape(1, 1, 1, -1)
    n = h.shape[0]
    flat = jnp.transpose(h, (0, 3, 1, 2)).reshape(n, -1)
    mu = flat @ params["w_mu"] + params["b_mu"]
    log_sigma = jax.nn.softplus(flat @ params["w_lv"] + params["b_lv"])
    z = mu + jnp.exp(log_sigma) * eps
    return z, mu, log_sigma


if __name__ == "__main__":
    # BetaEncoder(num_var=3, num_latent=8, num_neurons=[8,16,16], dropout=0.1,
    #             maxpool_indices=[0,1], batch_norm=True) on 28x28 inputs (eval).
    num_var, num_neurons, num_latent = 3, [8, 16, 16], 8
    maxpool_indices = [0, 1]             # maxpool right after conv 0 and conv 1
    dims = [28, 14, 7, 3, 1]
    final_dim = dims[len(maxpool_indices)]   # 7 -> linear in-dim 7*7*16 = 784

    layer_cfgs = []
    size, c_in = dims[0], num_var
    for li, c_out in enumerate(num_neurons):
        pool = li in maxpool_indices
        layer_cfgs.append(dict(size=size, c_in=c_in, c_out=c_out, pool=pool))
        size = size // 2 if pool else size
        c_in = c_out
    strides = compute_strides(layer_cfgs)    # per-sample row strides: 32/16/8

    # 8 samples per grid step: stacked conv M = 128 / 64 rows (fills the v5e
    # MXU, good v6e/v7x utilisation; use 16 for M~256 on v6e/v7x with larger N).
    # 16 total samples -> grid of 2 even steps so both v7x TensorCores work.
    samples_per_step = 8
    n = 16

    key = jax.random.PRNGKey(0)
    key, kx, keps, kp_key = jax.random.split(key, 4)
    x = jax.random.normal(kx, (n, num_var, 28, 28), jnp.float32)        # NCHW
    eps = jax.random.uniform(keps, (n, num_latent), jnp.float32)        # torch.rand_like
    params = init_params(kp_key, num_var, num_neurons, num_latent,
                         maxpool_indices, final_dim)
    kparams = prep_kernel_params(params, layer_cfgs, strides, num_latent)

    fwd = jax.jit(lambda xx, ee: beta_encoder_forward(
        xx, kparams, ee, layer_cfgs, strides, num_latent, samples_per_step))
    z, mu, log_sigma = fwd(x, eps)
    jax.block_until_ready((z, mu, log_sigma))

    z_r, mu_r, ls_r = reference_forward(x, params, eps)
    assert z.shape == (n, num_latent) and mu.shape == (n, num_latent)
    assert log_sigma.shape == (n, num_latent)
    # The conv chain uses bf16 MXU operands (f32 accumulation), so compare
    # against the f32 XLA reference with a tolerance sized for bf16 drift
    # (~1e-2 relative over three conv layers); logic errors would be O(1).
    for got, ref in ((z, z_r), (mu, mu_r), (log_sigma, ls_r)):
        assert bool(jnp.allclose(got, ref, rtol=5e-2, atol=1e-1)), "mismatch vs reference"

    # TODO(synk): training-mode BatchNorm (batch statistics) and active Dropout
    # are not implemented; eval-mode semantics only.
    print("KERNEL_OK")
</pallas_src>

<mosaic_0001>
module attributes {stable_mosaic.version = 11 : i64} {
  func.func @kernel(%arg0: i32, %arg1: memref<1x264x84xf32, #tpu.memory_space<vmem>>, %arg2: memref<3x84x224xbf16, #tpu.memory_space<vmem>>, %arg3: memref<2x224x112xbf16, #tpu.memory_space<vmem>>, %arg4: memref<1x112xf32, #tpu.memory_space<vmem>>, %arg5: memref<1x112xf32, #tpu.memory_space<vmem>>, %arg6: memref<1x112xf32, #tpu.memory_space<vmem>>, %arg7: memref<3x112x224xbf16, #tpu.memory_space<vmem>>, %arg8: memref<2x224x112xbf16, #tpu.memory_space<vmem>>, %arg9: memref<1x112xf32, #tpu.memory_space<vmem>>, %arg10: memref<1x112xf32, #tpu.memory_space<vmem>>, %arg11: memref<1x112xf32, #tpu.memory_space<vmem>>, %arg12: memref<3x112x112xbf16, #tpu.memory_space<vmem>>, %arg13: memref<1x112xf32, #tpu.memory_space<vmem>>, %arg14: memref<1x112xf32, #tpu.memory_space<vmem>>, %arg15: memref<1x112xf32, #tpu.memory_space<vmem>>, %arg16: memref<112x128xf32, #tpu.memory_space<vmem>>, %arg17: memref<8x128xf32, #tpu.memory_space<vmem>>, %arg18: memref<128x16xf32, #tpu.memory_space<vmem>>, %arg19: memref<1x16xf32, #tpu.memory_space<vmem>>, %arg20: memref<1x8x8xf32, #tpu.memory_space<vmem>>, %arg21: memref<8x24xf32, #tpu.memory_space<vmem>>, %arg22: memref<136x112xf32, #tpu.memory_space<vmem>>, %arg23: memref<72x112xf32, #tpu.memory_space<vmem>>) attributes {dimension_semantics = [#tpu.dimension_semantics<parallel>], iteration_bounds = array<i64: 2>, scalar_prefetch = 0 : i64, scratch_operands = 2 : i64, tpu.core_type = #tpu.core_type<tc>, window_params = [{transform_indices = @transform_0, window_bounds = array<i64: 1, 264, 84>}, {pipeline_mode = #tpu.pipeline_mode<synchronous>, transform_indices = @transform_1, window_bounds = array<i64: 3, 84, 224>}, {pipeline_mode = #tpu.pipeline_mode<synchronous>, transform_indices = @transform_2, window_bounds = array<i64: 2, 224, 112>}, {pipeline_mode = #tpu.pipeline_mode<synchronous>, transform_indices = @transform_3, window_bounds = array<i64: 1, 112>}, {pipeline_mode = #tpu.pipeline_mode<synchronous>, transform_indices = @transform_4, window_bounds = array<i64: 1, 112>}, {pipeline_mode = #tpu.pipeline_mode<synchronous>, transform_indices = @transform_5, window_bounds = array<i64: 1, 112>}, {pipeline_mode = #tpu.pipeline_mode<synchronous>, transform_indices = @transform_6, window_bounds = array<i64: 3, 112, 224>}, {pipeline_mode = #tpu.pipeline_mode<synchronous>, transform_indices = @transform_7, window_bounds = array<i64: 2, 224, 112>}, {pipeline_mode = #tpu.pipeline_mode<synchronous>, transform_indices = @transform_8, window_bounds = array<i64: 1, 112>}, {pipeline_mode = #tpu.pipeline_mode<synchronous>, transform_indices = @transform_9, window_bounds = array<i64: 1, 112>}, {pipeline_mode = #tpu.pipeline_mode<synchronous>, transform_indices = @transform_10, window_bounds = array<i64: 1, 112>}, {pipeline_mode = #tpu.pipeline_mode<synchronous>, transform_indices = @transform_11, window_bounds = array<i64: 3, 112, 112>}, {pipeline_mode = #tpu.pipeline_mode<synchronous>, transform_indices = @transform_12, window_bounds = array<i64: 1, 112>}, {pipeline_mode = #tpu.pipeline_mode<synchronous>, transform_indices = @transform_13, window_bounds = array<i64: 1, 112>}, {pipeline_mode = #tpu.pipeline_mode<synchronous>, transform_indices = @transform_14, window_bounds = array<i64: 1, 112>}, {pipeline_mode = #tpu.pipeline_mode<synchronous>, transform_indices = @transform_15, window_bounds = array<i64: 112, 128>}, {pipeline_mode = #tpu.pipeline_mode<synchronous>, transform_indices = @transform_16, window_bounds = array<i64: 8, 128>}, {pipeline_mode = #tpu.pipeline_mode<synchronous>, transform_indices = @transform_17, window_bounds = array<i64: 128, 16>}, {pipeline_mode = #tpu.pipeline_mode<synchronous>, transform_indices = @transform_18, window_bounds = array<i64: 1, 16>}, {transform_indices = @transform_19, window_bounds = array<i64: 1, 8, 8>}, {transform_indices = @transform_20, window_bounds = array<i64: 8, 24>}]} {
    %cst = arith.constant 0.000000e+00 : f32
    %0 = vector.broadcast %cst : f32 to vector<1x112xf32>
    %c0 = arith.constant 0 : index
    %c0_0 = arith.constant 0 : index
    %1 = vector.load %arg22[%c0, %c0_0] : memref<136x112xf32, #tpu.memory_space<vmem>>, vector<1x112xf32>
    tpu.vector_store %arg22[%c0, %c0_0], %0 {strides = array<i32>} : memref<136x112xf32, #tpu.memory_space<vmem>>, vector<1x112xf32>,
    %cst_1 = arith.constant 0.000000e+00 : f32
    %2 = vector.broadcast %cst_1 : f32 to vector<1x112xf32>
    %c0_2 = arith.constant 0 : index
    %c0_3 = arith.constant 0 : index
    %3 = vector.load %arg23[%c0_2, %c0_3] : memref<72x112xf32, #tpu.memory_space<vmem>>, vector<1x112xf32>
    tpu.vector_store %arg23[%c0_2, %c0_3], %2 {strides = array<i32>} : memref<72x112xf32, #tpu.memory_space<vmem>>, vector<1x112xf32>,
    %c0_4 = arith.constant 0 : index
    %c0_5 = arith.constant 0 : index
    %c0_6 = arith.constant 0 : index
    %4 = tpu.strided_load %arg1[%c0_4, %c0_5, %c0_6] {strides = array<i32: 1, 2, 1>} : memref<1x264x84xf32, #tpu.memory_space<vmem>>, vector<1x128x84xf32>
    %5 = vector.shape_cast %4 : vector<1x128x84xf32> to vector<128x84xf32>
    %6 = arith.truncf %5 : vector<128x84xf32> to vector<128x84xbf16>
    %c0_7 = arith.constant 0 : index
    %c0_8 = arith.constant 0 : index
    %c0_9 = arith.constant 0 : index
    %7 = vector.load %arg2[%c0_7, %c0_8, %c0_9] : memref<3x84x224xbf16, #tpu.memory_space<vmem>>, vector<1x84x224xbf16>
    %8 = vector.shape_cast %7 : vector<1x84x224xbf16> to vector<84x224xbf16>
    %cst_10 = arith.constant dense<0.000000e+00> : vector<128x224xf32>
    %9 = tpu.matmul %6, %8, %cst_10 {dimension_numbers = #tpu.dot_dimension_numbers<[1], [0], [0], [1], [0, 0, 1, 1], [], []>} : vector<128x84xbf16>, vector<84x224xbf16>, vector<128x224xf32> -> vector<128x224xf32>
    %c0_11 = arith.constant 0 : index
    %c1 = arith.constant 1 : index
    %c0_12 = arith.constant 0 : index
    %10 = tpu.strided_load %arg1[%c0_11, %c1, %c0_12] {strides = array<i32: 1, 2, 1>} : memref<1x264x84xf32, #tpu.memory_space<vmem>>, vector<1x128x84xf32>
    %11 = vector.shape_cast %10 : vector<1x128x84xf32> to vector<128x84xf32>
    %12 = arith.truncf %11 : vector<128x84xf32> to vector<128x84xbf16>
    %c1_13 = arith.constant 1 : index
    %c0_14 = arith.constant 0 : index
    %c0_15 = arith.constant 0 : index
    %13 = vector.load %arg2[%c1_13, %c0_14, %c0_15] : memref<3x84x224xbf16, #tpu.memory_space<vmem>>, vector<1x84x224xbf16>
    %14 = vector.shape_cast %13 : vector<1x84x224xbf16> to vector<84x224xbf16>
    %cst_16 = arith.constant dense<0.000000e+00> : vector<128x224xf32>
    %15 = tpu.matmul %12, %14, %cst_16 {dimension_numbers = #tpu.dot_dimension_numbers<[1], [0], [0], [1], [0, 0, 1, 1], [], []>} : vector<128x84xbf16>, vector<84x224xbf16>, vector<128x224xf32> -> vector<128x224xf32>
    %16 = arith.addf %9, %15 : vector<128x224xf32>
    %c0_17 = arith.constant 0 : index
    %c2 = arith.constant 2 : index
    %c0_18 = arith.constant 0 : index
    %17 = tpu.strided_load %arg1[%c0_17, %c2, %c0_18] {strides = array<i32: 1, 2, 1>} : memref<1x264x84xf32, #tpu.memory_space<vmem>>, vector<1x128x84xf32>
    %18 = vector.shape_cast %17 : vector<1x128x84xf32> to vector<128x84xf32>
    %19 = arith.truncf %18 : vector<128x84xf32> to vector<128x84xbf16>
    %c2_19 = arith.constant 2 : index
    %c0_20 = arith.constant 0 : index
    %c0_21 = arith.constant 0 : index
    %20 = vector.load %arg2[%c2_19, %c0_20, %c0_21] : memref<3x84x224xbf16, #tpu.memory_space<vmem>>, vector<1x84x224xbf16>
    %21 = vector.shape_cast %20 : vector<1x84x224xbf16> to vector<84x224xbf16>
    %cst_22 = arith.constant dense<0.000000e+00> : vector<128x224xf32>
    %22 = tpu.matmul %19, %21, %cst_22 {dimension_numbers = #tpu.dot_dimension_numbers<[1], [0], [0], [1], [0, 0, 1, 1], [], []>} : vector<128x84xbf16>, vector<84x224xbf16>, vector<128x224xf32> -> vector<128x224xf32>
    %23 = arith.addf %16, %22 : vector<128x224xf32>
    %c0_23 = arith.constant 0 : index
    %c1_24 = arith.constant 1 : index
    %c0_25 = arith.constant 0 : index
    %24 = tpu.strided_load %arg1[%c0_23, %c1_24, %c0_25] {strides = array<i32: 1, 2, 1>} : memref<1x264x84xf32, #tpu.memory_space<vmem>>, vector<1x128x84xf32>
    %25 = vector.shape_cast %24 : vector<1x128x84xf32> to vector<128x84xf32>
    %26 = arith.truncf %25 : vector<128x84xf32> to vector<128x84xbf16>
    %c0_26 = arith.constant 0 : index
    %c0_27 = arith.constant 0 : index
    %c0_28 = arith.constant 0 : index
    %27 = vector.load %arg2[%c0_26, %c0_27, %c0_28] : memref<3x84x224xbf16, #tpu.memory_space<vmem>>, vector<1x84x224xbf16>
    %28 = vector.shape_cast %27 : vector<1x84x224xbf16> to vector<84x224xbf16>
    %cst_29 = arith.constant dense<0.000000e+00> : vector<128x224xf32>
    %29 = tpu.matmul %26, %28, %cst_29 {dimension_numbers = #tpu.dot_dimension_numbers<[1], [0], [0], [1], [0, 0, 1, 1], [], []>} : vector<128x84xbf16>, vector<84x224xbf16>, vector<128x224xf32> -> vector<128x224xf32>
    %c0_30 = arith.constant 0 : index
    %c2_31 = arith.constant 2 : index
    %c0_32 = arith.constant 0 : index
    %30 = tpu.strided_load %arg1[%c0_30, %c2_31, %c0_32] {strides = array<i32: 1, 2, 1>} : memref<1x264x84xf32, #tpu.memory_space<vmem>>, vector<1x128x84xf32>
    %31 = vector.shape_cast %30 : vector<1x128x84xf32> to vector<128x84xf32>
    %32 = arith.truncf %31 : vector<128x84xf32> to vector<128x84xbf16>
    %c1_33 = arith.constant 1 : index
    %c0_34 = arith.constant 0 : index
    %c0_35 = arith.constant 0 : index
    %33 = vector.load %arg2[%c1_33, %c0_34, %c0_35] : memref<3x84x224xbf16, #tpu.memory_space<vmem>>, vector<1x84x224xbf16>
    %34 = vector.shape_cast %33 : vector<1x84x224xbf16> to vector<84x224xbf16>
    %cst_36 = arith.constant dense<0.000000e+00> : vector<128x224xf32>
    %35 = tpu.matmul %32, %34, %cst_36 {dimension_numbers = #tpu.dot_dimension_numbers<[1], [0], [0], [1], [0, 0, 1, 1], [], []>} : vector<128x84xbf16>, vector<84x224xbf16>, vector<128x224xf32> -> vector<128x224xf32>
    %36 = arith.addf %29, %35 : vector<128x224xf32>
    %c0_37 = arith.constant 0 : index
    %c3 = arith.constant 3 : index
    %c0_38 = arith.constant 0 : index
    %37 = tpu.strided_load %arg1[%c0_37, %c3, %c0_38] {strides = array<i32: 1, 2, 1>} : memref<1x264x84xf32, #tpu.memory_space<vmem>>, vector<1x128x84xf32>
    %38 = vector.shape_cast %37 : vector<1x128x84xf32> to vector<128x84xf32>
    %39 = arith.truncf %38 : vector<128x84xf32> to vector<128x84xbf16>
    %c2_39 = arith.constant 2 : index
    %c0_40 = arith.constant 0 : index
    %c0_41 = arith.constant 0 : index
    %40 = vector.load %arg2[%c2_39, %c0_40, %c0_41] : memref<3x84x224xbf16, #tpu.memory_space<vmem>>, vector<1x84x224xbf16>
    %41 = vector.shape_cast %40 : vector<1x84x224xbf16> to vector<84x224xbf16>
    %cst_42 = arith.constant dense<0.000000e+00> : vector<128x224xf32>
    %42 = tpu.matmul %39, %41, %cst_42 {dimension_numbers = #tpu.dot_dimension_numbers<[1], [0], [0], [1], [0, 0, 1, 1], [], []>} : vector<128x84xbf16>, vector<84x224xbf16>, vector<128x224xf32> -> vector<128x224xf32>
    %43 = arith.addf %36, %42 : vector<128x224xf32>
    %44 = arith.maximumf %23, %43 : vector<128x224xf32>
    %45 = arith.truncf %44 : vector<128x224xf32> to vector<128x224xbf16>
    %c0_43 = arith.constant 0 : index
    %c0_44 = arith.constant 0 : index
    %c0_45 = arith.constant 0 : index
    %46 = vector.load %arg3[%c0_43, %c0_44, %c0_45] : memref<2x224x112xbf16, #tpu.memory_space<vmem>>, vector<1x224x112xbf16>
    %47 = vector.shape_cast %46 : vector<1x224x112xbf16> to vector<224x112xbf16>
    %cst_46 = arith.constant dense<0.000000e+00> : vector<128x112xf32>
    %48 = tpu.matmul %45, %47, %cst_46 {dimension_numbers = #tpu.dot_dimension_numbers<[1], [0], [0], [1], [0, 0, 1, 1], [], []>} : vector<128x224xbf16>, vector<224x112xbf16>, vector<128x112xf32> -> vector<128x112xf32>
    %c1_47 = arith.constant 1 : index
    %c0_48 = arith.constant 0 : index
    %c0_49 = arith.constant 0 : index
    %49 = vector.load %arg3[%c1_47, %c0_48, %c0_49] : memref<2x224x112xbf16, #tpu.memory_space<vmem>>, vector<1x224x112xbf16>
    %50 = vector.shape_cast %49 : vector<1x224x112xbf16> to vector<224x112xbf16>
    %cst_50 = arith.constant dense<0.000000e+00> : vector<128x112xf32>
    %51 = tpu.matmul %45, %50, %cst_50 {dimension_numbers = #tpu.dot_dimension_numbers<[1], [0], [0], [1], [0, 0, 1, 1], [], []>} : vector<128x224xbf16>, vector<224x112xbf16>, vector<128x112xf32> -> vector<128x112xf32>
    %52 = arith.maximumf %48, %51 : vector<128x112xf32>
    %c0_51 = arith.constant 0 : index
    %c0_52 = arith.constant 0 : index
    %53 = vector.load %arg4[%c0_51, %c0_52] : memref<1x112xf32, #tpu.memory_space<vmem>>, vector<1x112xf32>
    %54 = vector.broadcast %53 : vector<1x112xf32> to vector<128x112xf32>
    %55 = arith.addf %52, %54 : vector<128x112xf32>
    %cst_53 = arith.constant 0.000000e+00 : f32
    %56 = vector.broadcast %cst_53 : f32 to vector<128x112xf32>
    %57 = arith.maximumf %55, %56 : vector<128x112xf32>
    %c0_54 = arith.constant 0 : index
    %c0_55 = arith.constant 0 : index
    %58 = vector.load %arg5[%c0_54, %c0_55] : memref<1x112xf32, #tpu.memory_space<vmem>>, vector<1x112xf32>
    %59 = vector.broadcast %58 : vector<1x112xf32> to vector<128x112xf32>
    %60 = arith.mulf %57, %59 : vector<128x112xf32>
    %c0_56 = arith.constant 0 : index
    %c0_57 = arith.constant 0 : index
    %61 = vector.load %arg6[%c0_56, %c0_57] : memref<1x112xf32, #tpu.memory_space<vmem>>, vector<1x112xf32>
    %62 = vector.broadcast %61 : vector<1x112xf32> to vector<128x112xf32>
    %63 = arith.addf %60, %62 : vector<128x112xf32>
    %64 = tpu.iota {dimensions = array<i32: 0>} : vector<128x112xi32>
    %c16_i32 = arith.constant 16 : i32
    %c0_i32 = arith.constant 0 : i32
    %65 = arith.cmpi eq, %c16_i32, %c0_i32 : i32
    %c1_i32 = arith.constant 1 : i32
    %66 = arith.select %65, %c1_i32, %c16_i32 : i32
    %67 = vector.broadcast %66 : i32 to vector<128x112xi32>
    %68 = arith.remsi %64, %67 : vector<128x112xi32>
    %c0_i32_58 = arith.constant 0 : i32
    %69 = vector.broadcast %c0_i32_58 : i32 to vector<128x112xi32>
    %70 = arith.cmpi ne, %68, %69 : vector<128x112xi32>
    %c0_i32_59 = arith.constant 0 : i32
    %71 = vector.broadcast %c0_i32_59 : i32 to vector<128x112xi32>
    %72 = arith.cmpi slt, %68, %71 : vector<128x112xi32>
    %c0_i32_60 = arith.constant 0 : i32
    %73 = arith.cmpi slt, %66, %c0_i32_60 : i32
    %74 = vector.broadcast %73 : i1 to vector<128x112xi1>
    %75 = vector.broadcast %74 : vector<128x112xi1> to vector<128x112xi1>
    %76 = arith.xori %72, %75 : vector<128x112xi1>
    %77 = arith.andi %76, %70 : vector<128x112xi1>
    %78 = vector.broadcast %66 : i32 to vector<128x112xi32>
    %79 = arith.addi %68, %78 : vector<128x112xi32>
    %80 = arith.select %77, %79, %68 : vector<128x112xi1>, vector<128x112xi32>
    %c14_i32 = arith.constant 14 : i32
    %81 = vector.broadcast %c14_i32 : i32 to vector<128x112xi32>
    %82 = arith.cmpi slt, %80, %81 : vector<128x112xi32>
    %cst_61 = arith.constant 0.000000e+00 : f32
    %83 = vector.broadcast %cst_61 : f32 to vector<128x112xf32>
    %84 = arith.select %82, %63, %83 : vector<128x112xi1>, vector<128x112xf32>
    %c1_62 = arith.constant 1 : index
    %c0_63 = arith.constant 0 : index
    %85 = vector.load %arg22[%c1_62, %c0_63] : memref<136x112xf32, #tpu.memory_space<vmem>>, vector<128x112xf32>
    tpu.vector_store %arg22[%c1_62, %c0_63], %84 {strides = array<i32>} : memref<136x112xf32, #tpu.memory_space<vmem>>, vector<128x112xf32>,
    %c0_64 = arith.constant 0 : index
    %c0_65 = arith.constant 0 : index
    %86 = tpu.strided_load %arg22[%c0_64, %c0_65] {strides = array<i32: 2, 1>} : memref<136x112xf32, #tpu.memory_space<vmem>>, vector<64x112xf32>
    %87 = arith.truncf %86 : vector<64x112xf32> to vector<64x112xbf16>
    %c0_66 = arith.constant 0 : index
    %c0_67 = arith.constant 0 : index
    %c0_68 = arith.constant 0 : index
    %88 = vector.load %arg7[%c0_66, %c0_67, %c0_68] : memref<3x112x224xbf16, #tpu.memory_space<vmem>>, vector<1x112x224xbf16>
    %89 = vector.shape_cast %88 : vector<1x112x224xbf16> to vector<112x224xbf16>
    %cst_69 = arith.constant dense<0.000000e+00> : vector<64x224xf32>
    %90 = tpu.matmul %87, %89, %cst_69 {dimension_numbers = #tpu.dot_dimension_numbers<[1], [0], [0], [1], [0, 0, 1, 1], [], []>} : vector<64x112xbf16>, vector<112x224xbf16>, vector<64x224xf32> -> vector<64x224xf32>
    %c1_70 = arith.constant 1 : index
    %c0_71 = arith.constant 0 : index
    %91 = tpu.strided_load %arg22[%c1_70, %c0_71] {strides = array<i32: 2, 1>} : memref<136x112xf32, #tpu.memory_space<vmem>>, vector<64x112xf32>
    %92 = arith.truncf %91 : vector<64x112xf32> to vector<64x112xbf16>
    %c1_72 = arith.constant 1 : index
    %c0_73 = arith.constant 0 : index
    %c0_74 = arith.constant 0 : index
    %93 = vector.load %arg7[%c1_72, %c0_73, %c0_74] : memref<3x112x224xbf16, #tpu.memory_space<vmem>>, vector<1x112x224xbf16>
    %94 = vector.shape_cast %93 : vector<1x112x224xbf16> to vector<112x224xbf16>
    %cst_75 = arith.constant dense<0.000000e+00> : vector<64x224xf32>
    %95 = tpu.matmul %92, %94, %cst_75 {dimension_numbers = #tpu.dot_dimension_numbers<[1], [0], [0], [1], [0, 0, 1, 1], [], []>} : vector<64x112xbf16>, vector<112x224xbf16>, vector<64x224xf32> -> vector<64x224xf32>
    %96 = arith.addf %90, %95 : vector<64x224xf32>
    %c2_76 = arith.constant 2 : index
    %c0_77 = arith.constant 0 : index
    %97 = tpu.strided_load %arg22[%c2_76, %c0_77] {strides = array<i32: 2, 1>} : memref<136x112xf32, #tpu.memory_space<vmem>>, vector<64x112xf32>
    %98 = arith.truncf %97 : vector<64x112xf32> to vector<64x112xbf16>
    %c2_78 = arith.constant 2 : index
    %c0_79 = arith.constant 0 : index
    %c0_80 = arith.constant 0 : index
    %99 = vector.load %arg7[%c2_78, %c0_79, %c0_80] : memref<3x112x224xbf16, #tpu.memory_space<vmem>>, vector<1x112x224xbf16>
    %100 = vector.shape_cast %99 : vector<1x112x224xbf16> to vector<112x224xbf16>
    %cst_81 = arith.constant dense<0.000000e+00> : vector<64x224xf32>
    %101 = tpu.matmul %98, %100, %cst_81 {dimension_numbers = #tpu.dot_dimension_numbers<[1], [0], [0], [1], [0, 0, 1, 1], [], []>} : vector<64x112xbf16>, vector<112x224xbf16>, vector<64x224xf32> -> vector<64x224xf32>
    %102 = arith.addf %96, %101 : vector<64x224xf32>
    %c1_82 = arith.constant 1 : index
    %c0_83 = arith.constant 0 : index
    %103 = tpu.strided_load %arg22[%c1_82, %c0_83] {strides = array<i32: 2, 1>} : memref<136x112xf32, #tpu.memory_space<vmem>>, vector<64x112xf32>
    %104 = arith.truncf %103 : vector<64x112xf32> to vector<64x112xbf16>
    %c0_84 = arith.constant 0 : index
    %c0_85 = arith.constant 0 : index
    %c0_86 = arith.constant 0 : index
    %105 = vector.load %arg7[%c0_84, %c0_85, %c0_86] : memref<3x112x224xbf16, #tpu.memory_space<vmem>>, vector<1x112x224xbf16>
    %106 = vector.shape_cast %105 : vector<1x112x224xbf16> to vector<112x224xbf16>
    %cst_87 = arith.constant dense<0.000000e+00> : vector<64x224xf32>
    %107 = tpu.matmul %104, %106, %cst_87 {dimension_numbers = #tpu.dot_dimension_numbers<[1], [0], [0], [1], [0, 0, 1, 1], [], []>} : vector<64x112xbf16>, vector<112x224xbf16>, vector<64x224xf32> -> vector<64x224xf32>
    %c2_88 = arith.constant 2 : index
    %c0_89 = arith.constant 0 : index
    %108 = tpu.strided_load %arg22[%c2_88, %c0_89] {strides = array<i32: 2, 1>} : memref<136x112xf32, #tpu.memory_space<vmem>>, vector<64x112xf32>
    %109 = arith.truncf %108 : vector<64x112xf32> to vector<64x112xbf16>
    %c1_90 = arith.constant 1 : index
    %c0_91 = arith.constant 0 : index
    %c0_92 = arith.constant 0 : index
    %110 = vector.load %arg7[%c1_90, %c0_91, %c0_92] : memref<3x112x224xbf16, #tpu.memory_space<vmem>>, vector<1x112x224xbf16>
    %111 = vector.shape_cast %110 : vector<1x112x224xbf16> to vector<112x224xbf16>
    %cst_93 = arith.constant dense<0.000000e+00> : vector<64x224xf32>
    %112 = tpu.matmul %109, %111, %cst_93 {dimension_numbers = #tpu.dot_dimension_numbers<[1], [0], [0], [1], [0, 0, 1, 1], [], []>} : vector<64x112xbf16>, vector<112x224xbf16>, vector<64x224xf32> -> vector<64x224xf32>
    %113 = arith.addf %107, %112 : vector<64x224xf32>
    %c3_94 = arith.constant 3 : index
    %c0_95 = arith.constant 0 : index
    %114 = tpu.strided_load %arg22[%c3_94, %c0_95] {strides = array<i32: 2, 1>} : memref<136x112xf32, #tpu.memory_space<vmem>>, vector<64x112xf32>
    %115 = arith.truncf %114 : vector<64x112xf32> to vector<64x112xbf16>
    %c2_96 = arith.constant 2 : index
    %c0_97 = arith.constant 0 : index
    %c0_98 = arith.constant 0 : index
    %116 = vector.load %arg7[%c2_96, %c0_97, %c0_98] : memref<3x112x224xbf16, #tpu.memory_space<vmem>>, vector<1x112x224xbf16>
    %117 = vector.shape_cast %116 : vector<1x112x224xbf16> to vector<112x224xbf16>
    %cst_99 = arith.constant dense<0.000000e+00> : vector<64x224xf32>
    %118 = tpu.matmul %115, %117, %cst_99 {dimension_numbers = #tpu.dot_dimension_numbers<[1], [0], [0], [1], [0, 0, 1, 1], [], []>} : vector<64x112xbf16>, vector<112x224xbf16>, vector<64x224xf32> -> vector<64x224xf32>
    %119 = arith.addf %113, %118 : vector<64x224xf32>
    %120 = arith.maximumf %102, %119 : vector<64x224xf32>
    %121 = arith.truncf %120 : vector<64x224xf32> to vector<64x224xbf16>
    %c0_100 = arith.constant 0 : index
    %c0_101 = arith.constant 0 : index
    %c0_102 = arith.constant 0 : index
    %122 = vector.load %arg8[%c0_100, %c0_101, %c0_102] : memref<2x224x112xbf16, #tpu.memory_space<vmem>>, vector<1x224x112xbf16>
    %123 = vector.shape_cast %122 : vector<1x224x112xbf16> to vector<224x112xbf16>
    %cst_103 = arith.constant dense<0.000000e+00> : vector<64x112xf32>
    %124 = tpu.matmul %121, %123, %cst_103 {dimension_numbers = #tpu.dot_dimension_numbers<[1], [0], [0], [1], [0, 0, 1, 1], [], []>} : vector<64x224xbf16>, vector<224x112xbf16>, vector<64x112xf32> -> vector<64x112xf32>
    %c1_104 = arith.constant 1 : index
    %c0_105 = arith.constant 0 : index
    %c0_106 = arith.constant 0 : index
    %125 = vector.load %arg8[%c1_104, %c0_105, %c0_106] : memref<2x224x112xbf16, #tpu.memory_space<vmem>>, vector<1x224x112xbf16>
    %126 = vector.shape_cast %125 : vector<1x224x112xbf16> to vector<224x112xbf16>
    %cst_107 = arith.constant dense<0.000000e+00> : vector<64x112xf32>
    %127 = tpu.matmul %121, %126, %cst_107 {dimension_numbers = #tpu.dot_dimension_numbers<[1], [0], [0], [1], [0, 0, 1, 1], [], []>} : vector<64x224xbf16>, vector<224x112xbf16>, vector<64x112xf32> -> vector<64x112xf32>
    %128 = arith.maximumf %124, %127 : vector<64x112xf32>
    %c0_108 = arith.constant 0 : index
    %c0_109 = arith.constant 0 : index
    %129 = vector.load %arg9[%c0_108, %c0_109] : memref<1x112xf32, #tpu.memory_space<vmem>>, vector<1x112xf32>
    %130 = vector.broadcast %129 : vector<1x112xf32> to vector<64x112xf32>
    %131 = arith.addf %128, %130 : vector<64x112xf32>
    %cst_110 = arith.constant 0.000000e+00 : f32
    %132 = vector.broadcast %cst_110 : f32 to vector<64x112xf32>
    %133 = arith.maximumf %131, %132 : vector<64x112xf32>
    %c0_111 = arith.constant 0 : index
    %c0_112 = arith.constant 0 : index
    %134 = vector.load %arg10[%c0_111, %c0_112] : memref<1x112xf32, #tpu.memory_space<vmem>>, vector<1x112xf32>
    %135 = vector.broadcast %134 : vector<1x112xf32> to vector<64x112xf32>
    %136 = arith.mulf %133, %135 : vector<64x112xf32>
    %c0_113 = arith.constant 0 : index
    %c0_114 = arith.constant 0 : index
    %137 = vector.load %arg11[%c0_113, %c0_114] : memref<1x112xf32, #tpu.memory_space<vmem>>, vector<1x112xf32>
    %138 = vector.broadcast %137 : vector<1x112xf32> to vector<64x112xf32>
    %139 = arith.addf %136, %138 : vector<64x112xf32>
    %140 = tpu.iota {dimensions = array<i32: 0>} : vector<64x112xi32>
    %c8_i32 = arith.constant 8 : i32
    %c0_i32_115 = arith.constant 0 : i32
    %141 = arith.cmpi eq, %c8_i32, %c0_i32_115 : i32
    %c1_i32_116 = arith.constant 1 : i32
    %142 = arith.select %141, %c1_i32_116, %c8_i32 : i32
    %143 = vector.broadcast %142 : i32 to vector<64x112xi32>
    %144 = arith.remsi %140, %143 : vector<64x112xi32>
    %c0_i32_117 = arith.constant 0 : i32
    %145 = vector.broadcast %c0_i32_117 : i32 to vector<64x112xi32>
    %146 = arith.cmpi ne, %144, %145 : vector<64x112xi32>
    %c0_i32_118 = arith.constant 0 : i32
    %147 = vector.broadcast %c0_i32_118 : i32 to vector<64x112xi32>
    %148 = arith.cmpi slt, %144, %147 : vector<64x112xi32>
    %c0_i32_119 = arith.constant 0 : i32
    %149 = arith.cmpi slt, %142, %c0_i32_119 : i32
    %150 = vector.broadcast %149 : i1 to vector<64x112xi1>
    %151 = vector.broadcast %150 : vector<64x112xi1> to vector<64x112xi1>
    %152 = arith.xori %148, %151 : vector<64x112xi1>
    %153 = arith.andi %152, %146 : vector<64x112xi1>
    %154 = vector.broadcast %142 : i32 to vector<64x112xi32>
    %155 = arith.addi %144, %154 : vector<64x112xi32>
    %156 = arith.select %153, %155, %144 : vector<64x112xi1>, vector<64x112xi32>
    %c7_i32 = arith.constant 7 : i32
    %157 = vector.broadcast %c7_i32 : i32 to vector<64x112xi32>
    %158 = arith.cmpi slt, %156, %157 : vector<64x112xi32>
    %cst_120 = arith.constant 0.000000e+00 : f32
    %159 = vector.broadcast %cst_120 : f32 to vector<64x112xf32>
    %160 = arith.select %158, %139, %159 : vector<64x112xi1>, vector<64x112xf32>
    %c1_121 = arith.constant 1 : index
    %c0_122 = arith.constant 0 : index
    %161 = vector.load %arg23[%c1_121, %c0_122] : memref<72x112xf32, #tpu.memory_space<vmem>>, vector<64x112xf32>
    tpu.vector_store %arg23[%c1_121, %c0_122], %160 {strides = array<i32>} : memref<72x112xf32, #tpu.memory_space<vmem>>, vector<64x112xf32>,
    %c0_123 = arith.constant 0 : index
    %c0_124 = arith.constant 0 : index
    %162 = vector.load %arg23[%c0_123, %c0_124] : memref<72x112xf32, #tpu.memory_space<vmem>>, vector<64x112xf32>
    %163 = arith.truncf %162 : vector<64x112xf32> to vector<64x112xbf16>
    %c0_125 = arith.constant 0 : index
    %c0_126 = arith.constant 0 : index
    %c0_127 = arith.constant 0 : index
    %164 = vector.load %arg12[%c0_125, %c0_126, %c0_127] : memref<3x112x112xbf16, #tpu.memory_space<vmem>>, vector<1x112x112xbf16>
    %165 = vector.shape_cast %164 : vector<1x112x112xbf16> to vector<112x112xbf16>
    %cst_128 = arith.constant dense<0.000000e+00> : vector<64x112xf32>
    %166 = tpu.matmul %163, %165, %cst_128 {dimension_numbers = #tpu.dot_dimension_numbers<[1], [0], [0], [1], [0, 0, 1, 1], [], []>} : vector<64x112xbf16>, vector<112x112xbf16>, vector<64x112xf32> -> vector<64x112xf32>
    %c1_129 = arith.constant 1 : index
    %c0_130 = arith.constant 0 : index
    %167 = vector.load %arg23[%c1_129, %c0_130] : memref<72x112xf32, #tpu.memory_space<vmem>>, vector<64x112xf32>
    %168 = arith.truncf %167 : vector<64x112xf32> to vector<64x112xbf16>
    %c1_131 = arith.constant 1 : index
    %c0_132 = arith.constant 0 : index
    %c0_133 = arith.constant 0 : index
    %169 = vector.load %arg12[%c1_131, %c0_132, %c0_133] : memref<3x112x112xbf16, #tpu.memory_space<vmem>>, vector<1x112x112xbf16>
    %170 = vector.shape_cast %169 : vector<1x112x112xbf16> to vector<112x112xbf16>
    %cst_134 = arith.constant dense<0.000000e+00> : vector<64x112xf32>
    %171 = tpu.matmul %168, %170, %cst_134 {dimension_numbers = #tpu.dot_dimension_numbers<[1], [0], [0], [1], [0, 0, 1, 1], [], []>} : vector<64x112xbf16>, vector<112x112xbf16>, vector<64x112xf32> -> vector<64x112xf32>
    %172 = arith.addf %166, %171 : vector<64x112xf32>
    %c2_135 = arith.constant 2 : index
    %c0_136 = arith.constant 0 : index
    %173 = vector.load %arg23[%c2_135, %c0_136] : memref<72x112xf32, #tpu.memory_space<vmem>>, vector<64x112xf32>
    %174 = arith.truncf %173 : vector<64x112xf32> to vector<64x112xbf16>
    %c2_137 = arith.constant 2 : index
    %c0_138 = arith.constant 0 : index
    %c0_139 = arith.constant 0 : index
    %175 = vector.load %arg12[%c2_137, %c0_138, %c0_139] : memref<3x112x112xbf16, #tpu.memory_space<vmem>>, vector<1x112x112xbf16>
    %176 = vector.shape_cast %175 : vector<1x112x112xbf16> to vector<112x112xbf16>
    %cst_140 = arith.constant dense<0.000000e+00> : vector<64x112xf32>
    %177 = tpu.matmul %174, %176, %cst_140 {dimension_numbers = #tpu.dot_dimension_numbers<[1], [0], [0], [1], [0, 0, 1, 1], [], []>} : vector<64x112xbf16>, vector<112x112xbf16>, vector<64x112xf32> -> vector<64x112xf32>
    %178 = arith.addf %172, %177 : vector<64x112xf32>
    %c0_141 = arith.constant 0 : index
    %c0_142 = arith.constant 0 : index
    %179 = vector.load %arg13[%c0_141, %c0_142] : memref<1x112xf32, #tpu.memory_space<vmem>>, vector<1x112xf32>
    %180 = vector.broadcast %179 : vector<1x112xf32> to vector<64x112xf32>
    %181 = arith.addf %178, %180 : vector<64x112xf32>
    %cst_143 = arith.constant 0.000000e+00 : f32
    %182 = vector.broadcast %cst_143 : f32 to vector<64x112xf32>
    %183 = arith.maximumf %181, %182 : vector<64x112xf32>
    %c0_144 = arith.constant 0 : index
    %c0_145 = arith.constant 0 : index
    %184 = vector.load %arg14[%c0_144, %c0_145] : memref<1x112xf32, #tpu.memory_space<vmem>>, vector<1x112xf32>
    %185 = vector.broadcast %184 : vector<1x112xf32> to vector<64x112xf32>
    %186 = arith.mulf %183, %185 : vector<64x112xf32>
    %c0_146 = arith.constant 0 : index
    %c0_147 = arith.constant 0 : index
    %187 = vector.load %arg15[%c0_146, %c0_147] : memref<1x112xf32, #tpu.memory_space<vmem>>, vector<1x112xf32>
    %188 = vector.broadcast %187 : vector<1x112xf32> to vector<64x112xf32>
    %189 = arith.addf %186, %188 : vector<64x112xf32>
    %c0_148 = arith.constant 0 : index
    %c0_149 = arith.constant 0 : index
    %190 = vector.load %arg16[%c0_148, %c0_149] : memref<112x128xf32, #tpu.memory_space<vmem>>, vector<112x128xf32>
    %cst_150 = arith.constant dense<0.000000e+00> : vector<64x128xf32>
    %191 = tpu.matmul %189, %190, %cst_150 {dimension_numbers = #tpu.dot_dimension_numbers<[1], [0], [0], [1], [0, 0, 1, 1], [], []>} : vector<64x112xf32>, vector<112x128xf32>, vector<64x128xf32> -> vector<64x128xf32>
    %192 = vector.shape_cast %191 : vector<64x128xf32> to vector<8x8x128xf32>
    %c0_151 = arith.constant 0 : index
    %c0_152 = arith.constant 0 : index
    %193 = vector.load %arg17[%c0_151, %c0_152] : memref<8x128xf32, #tpu.memory_space<vmem>>, vector<8x128xf32>
    %cst_153 = arith.constant 5.000000e-01 : f32
    %194 = vector.broadcast %cst_153 : f32 to vector<8x128xf32>
    %195 = arith.cmpf ogt, %193, %194 : vector<8x128xf32>
    %196 = vector.shape_cast %195 : vector<8x128xi1> to vector<1x8x128xi1>
    %cst_154 = arith.constant 0.000000e+00 : f32
    %197 = vector.shape_cast %196 : vector<1x8x128xi1> to vector<1x8x128xi1>
    %198 = vector.broadcast %197 : vector<1x8x128xi1> to vector<8x8x128xi1>
    %199 = vector.broadcast %cst_154 : f32 to vector<8x8x128xf32>
    %200 = arith.select %198, %192, %199 : vector<8x8x128xi1>, vector<8x8x128xf32>
    %cst_155 = arith.constant dense<0.000000e+00> : vector<8x128xf32>
    %201 = vector.multi_reduction <add>, %200, %cst_155 [1] : vector<8x8x128xf32> to vector<8x128xf32>
    %c0_156 = arith.constant 0 : index
    %c0_157 = arith.constant 0 : index
    %202 = vector.load %arg18[%c0_156, %c0_157] : memref<128x16xf32, #tpu.memory_space<vmem>>, vector<128x16xf32>
    %cst_158 = arith.constant dense<0.000000e+00> : vector<8x16xf32>
    %203 = tpu.matmul %201, %202, %cst_158 {dimension_numbers = #tpu.dot_dimension_numbers<[1], [0], [0], [1], [0, 0, 1, 1], [], []>} : vector<8x128xf32>, vector<128x16xf32>, vector<8x16xf32> -> vector<8x16xf32>
    %c0_159 = arith.constant 0 : index
    %c0_160 = arith.constant 0 : index
    %204 = vector.load %arg19[%c0_159, %c0_160] : memref<1x16xf32, #tpu.memory_space<vmem>>, vector<1x16xf32>
    %205 = vector.broadcast %204 : vector<1x16xf32> to vector<8x16xf32>
    %206 = arith.addf %203, %205 : vector<8x16xf32>
    %207 = vector.extract_strided_slice %206 {offsets = [0, 0], sizes = [8, 8], strides = [1, 1]} : vector<8x16xf32> to vector<8x8xf32>
    %208 = vector.extract_strided_slice %206 {offsets = [0, 8], sizes = [8, 8], strides = [1, 1]} : vector<8x16xf32> to vector<8x8xf32>
    %cst_161 = arith.constant 0.000000e+00 : f32
    %209 = vector.broadcast %cst_161 : f32 to vector<8x8xf32>
    %210 = arith.maximumf %208, %209 : vector<8x8xf32>
    %211 = math.absf %208 : vector<8x8xf32>
    %cst_162 = arith.constant 0.000000e+00 : f32
    %212 = vector.broadcast %cst_162 : f32 to vector<8x8xf32>
    %213 = arith.subf %212, %211 : vector<8x8xf32>
    %214 = math.exp %213 : vector<8x8xf32>
    %215 = math.log1p %214 : vector<8x8xf32>
    %216 = arith.addf %210, %215 : vector<8x8xf32>
    %217 = math.exp %216 : vector<8x8xf32>
    %c0_163 = arith.constant 0 : index
    %c0_164 = arith.constant 0 : index
    %c0_165 = arith.constant 0 : index
    %218 = vector.load %arg20[%c0_163, %c0_164, %c0_165] : memref<1x8x8xf32, #tpu.memory_space<vmem>>, vector<1x8x8xf32>
    %219 = vector.shape_cast %218 : vector<1x8x8xf32> to vector<8x8xf32>
    %220 = arith.mulf %217, %219 : vector<8x8xf32>
    %221 = arith.addf %207, %220 : vector<8x8xf32>
    %222 = tpu.concatenate %221, %207, %216 in 1 : vector<8x8xf32>, vector<8x8xf32>, vector<8x8xf32> -> vector<8x24xf32>
    %c0_166 = arith.constant 0 : index
    %c0_167 = arith.constant 0 : index
    %223 = vector.load %arg21[%c0_166, %c0_167] : memref<8x24xf32, #tpu.memory_space<vmem>>, vector<8x24xf32>
    tpu.vector_store %arg21[%c0_166, %c0_167], %222 {strides = array<i32>} : memref<8x24xf32, #tpu.memory_space<vmem>>, vector<8x24xf32>,
    return
  }
  func.func @transform_0(%arg0: i32) -> (i32, i32, i32) {
    %c0_i32 = arith.constant 0 : i32
    %c0_i32_0 = arith.constant 0 : i32
    %c0_i32_1 = arith.constant 0 : i32
    return %arg0, %c0_i32, %c0_i32_0 : i32, i32, i32
  }
  func.func @transform_1(%arg0: i32) -> (i32, i32, i32) {
    %c0_i32 = arith.constant 0 : i32
    %c0_i32_0 = arith.constant 0 : i32
    %c0_i32_1 = arith.constant 0 : i32
    %c0_i32_2 = arith.constant 0 : i32
    return %c0_i32, %c0_i32_0, %c0_i32_1 : i32, i32, i32
  }
  func.func @transform_2(%arg0: i32) -> (i32, i32, i32) {
    %c0_i32 = arith.constant 0 : i32
    %c0_i32_0 = arith.constant 0 : i32
    %c0_i32_1 = arith.constant 0 : i32
    %c0_i32_2 = arith.constant 0 : i32
    return %c0_i32, %c0_i32_0, %c0_i32_1 : i32, i32, i32
  }
  func.func @transform_3(%arg0: i32) -> (i32, i32) {
    %c0_i32 = arith.constant 0 : i32
    %c0_i32_0 = arith.constant 0 : i32
    %c0_i32_1 = arith.constant 0 : i32
    return %c0_i32, %c0_i32_0 : i32, i32
  }
  func.func @transform_4(%arg0: i32) -> (i32, i32) {
    %c0_i32 = arith.constant 0 : i32
    %c0_i32_0 = arith.constant 0 : i32
    %c0_i32_1 = arith.constant 0 : i32
    return %c0_i32, %c0_i32_0 : i32, i32
  }
  func.func @transform_5(%arg0: i32) -> (i32, i32) {
    %c0_i32 = arith.constant 0 : i32
    %c0_i32_0 = arith.constant 0 : i32
    %c0_i32_1 = arith.constant 0 : i32
    return %c0_i32, %c0_i32_0 : i32, i32
  }
  func.func @transform_6(%arg0: i32) -> (i32, i32, i32) {
    %c0_i32 = arith.constant 0 : i32
    %c0_i32_0 = arith.constant 0 : i32
    %c0_i32_1 = arith.constant 0 : i32
    %c0_i32_2 = arith.constant 0 : i32
    return %c0_i32, %c0_i32_0, %c0_i32_1 : i32, i32, i32
  }
  func.func @transform_7(%arg0: i32) -> (i32, i32, i32) {
    %c0_i32 = arith.constant 0 : i32
    %c0_i32_0 = arith.constant 0 : i32
    %c0_i32_1 = arith.constant 0 : i32
    %c0_i32_2 = arith.constant 0 : i32
    return %c0_i32, %c0_i32_0, %c0_i32_1 : i32, i32, i32
  }
  func.func @transform_8(%arg0: i32) -> (i32, i32) {
    %c0_i32 = arith.constant 0 : i32
    %c0_i32_0 = arith.constant 0 : i32
    %c0_i32_1 = arith.constant 0 : i32
    return %c0_i32, %c0_i32_0 : i32, i32
  }
  func.func @transform_9(%arg0: i32) -> (i32, i32) {
    %c0_i32 = arith.constant 0 : i32
    %c0_i32_0 = arith.constant 0 : i32
    %c0_i32_1 = arith.constant 0 : i32
    return %c0_i32, %c0_i32_0 : i32, i32
  }
  func.func @transform_10(%arg0: i32) -> (i32, i32) {
    %c0_i32 = arith.constant 0 : i32
    %c0_i32_0 = arith.constant 0 : i32
    %c0_i32_1 = arith.constant 0 : i32
    return %c0_i32, %c0_i32_0 : i32, i32
  }
  func.func @transform_11(%arg0: i32) -> (i32, i32, i32) {
    %c0_i32 = arith.constant 0 : i32
    %c0_i32_0 = arith.constant 0 : i32
    %c0_i32_1 = arith.constant 0 : i32
    %c0_i32_2 = arith.constant 0 : i32
    return %c0_i32, %c0_i32_0, %c0_i32_1 : i32, i32, i32
  }
  func.func @transform_12(%arg0: i32) -> (i32, i32) {
    %c0_i32 = arith.constant 0 : i32
    %c0_i32_0 = arith.constant 0 : i32
    %c0_i32_1 = arith.constant 0 : i32
    return %c0_i32, %c0_i32_0 : i32, i32
  }
  func.func @transform_13(%arg0: i32) -> (i32, i32) {
    %c0_i32 = arith.constant 0 : i32
    %c0_i32_0 = arith.constant 0 : i32
    %c0_i32_1 = arith.constant 0 : i32
    return %c0_i32, %c0_i32_0 : i32, i32
  }
  func.func @transform_14(%arg0: i32) -> (i32, i32) {
    %c0_i32 = arith.constant 0 : i32
    %c0_i32_0 = arith.constant 0 : i32
    %c0_i32_1 = arith.constant 0 : i32
    return %c0_i32, %c0_i32_0 : i32, i32
  }
  func.func @transform_15(%arg0: i32) -> (i32, i32) {
    %c0_i32 = arith.constant 0 : i32
    %c0_i32_0 = arith.constant 0 : i32
    %c0_i32_1 = arith.constant 0 : i32
    return %c0_i32, %c0_i32_0 : i32, i32
  }
  func.func @transform_16(%arg0: i32) -> (i32, i32) {
    %c0_i32 = arith.constant 0 : i32
    %c0_i32_0 = arith.constant 0 : i32
    %c0_i32_1 = arith.constant 0 : i32
    return %c0_i32, %c0_i32_0 : i32, i32
  }
  func.func @transform_17(%arg0: i32) -> (i32, i32) {
    %c0_i32 = arith.constant 0 : i32
    %c0_i32_0 = arith.constant 0 : i32
    %c0_i32_1 = arith.constant 0 : i32
    return %c0_i32, %c0_i32_0 : i32, i32
  }
  func.func @transform_18(%arg0: i32) -> (i32, i32) {
    %c0_i32 = arith.constant 0 : i32
    %c0_i32_0 = arith.constant 0 : i32
    %c0_i32_1 = arith.constant 0 : i32
    return %c0_i32, %c0_i32_0 : i32, i32
  }
  func.func @transform_19(%arg0: i32) -> (i32, i32, i32) {
    %c0_i32 = arith.constant 0 : i32
    %c0_i32_0 = arith.constant 0 : i32
    %c0_i32_1 = arith.constant 0 : i32
    return %arg0, %c0_i32, %c0_i32_0 : i32, i32, i32
  }
  func.func @transform_20(%arg0: i32) -> (i32, i32) {
    %c0_i32 = arith.constant 0 : i32
    %c0_i32_0 = arith.constant 0 : i32
    return %arg0, %c0_i32 : i32, i32
  }
}

</mosaic_0001>

<bundles_post_ra>
// kernel: _lambda_.1
= control target key start
LH: loop header
LB: loop body
LE: loop exit
PB: predicated region body
PF: predicated region fallthrough
CT: control target
= control target key end

     0   :  { %s7770_s0 = inlined_call_operand.vmem [shape: f32[2,264,84], index: 0, kind: input, shape index: {}]   ;;  %s7771_s1 = inlined_call_operand.vmem [shape: bf16[3,84,224], index: 1, kind: input, shape index: {}]   ;;  %s7772_s2 = inlined_call_operand.vmem [shape: bf16[2,224,112], index: 2, kind: input, shape index: {}]   ;;  %s7773_s3 = inlined_call_operand.vmem [shape: f32[1,112], index: 3, kind: input, shape index: {}]   ;;  %s7774_s4 = inlined_call_operand.vmem [shape: f32[1,112], index: 4, kind: input, shape index: {}]   ;;  %s7775_s5 = inlined_call_operand.vmem [shape: f32[1,112], index: 5, kind: input, shape index: {}]   ;;  %s7776_s6 = inlined_call_operand.vmem [shape: bf16[3,112,224], index: 6, kind: input, shape index: {}]   ;;  %s7777_s7 = inlined_call_operand.vmem [shape: bf16[2,224,112], index: 7, kind: input, shape index: {}]   ;;  %s7778_s8 = inlined_call_operand.vmem [shape: f32[1,112], index: 8, kind: input, shape index: {}]   ;;  %s7779_s9 = inlined_call_operand.vmem [shape: f32[1,112], index: 9, kind: input, shape index: {}]   ;;  %s7780_s10 = inlined_call_operand.vmem [shape: f32[1,112], index: 10, kind: input, shape index: {}]   ;;  %s7781_s11 = inlined_call_operand.vmem [shape: bf16[3,112,112], index: 11, kind: input, shape index: {}]   ;;  %s7782_s12 = inlined_call_operand.vmem [shape: f32[1,112], index: 12, kind: input, shape index: {}]   ;;  %s7783_s13 = inlined_call_operand.vmem [shape: f32[1,112], index: 13, kind: input, shape index: {}]   ;;  %s7784_s14 = inlined_call_operand.vmem [shape: f32[1,112], index: 14, kind: input, shape index: {}]   ;;  %s7785_s15 = inlined_call_operand.vmem [shape: f32[112,128], index: 15, kind: input, shape index: {}]   ;;  %s7786_s16 = inlined_call_operand.vmem [shape: f32[8,128], index: 16, kind: input, shape index: {}]   ;;  %s7787_s17 = inlined_call_operand.vmem [shape: f32[128,16], index: 17, kind: input, shape index: {}]   ;;  %s7788_s18 = inlined_call_operand.vmem [shape: f32[1,16], index: 18, kind: input, shape index: {}]   ;;  %s7789_s19 = inlined_call_operand.vmem [shape: f32[2,8,8], index: 19, kind: input, shape index: {}]   ;;  %s7790_s20 = inlined_call_operand.vmem [shape: f32[16,24], index: 20, kind: output, shape index: {}]  }
   0x1   :  { %7793 = sst [smem:[#allocation4_spill]] %s7770_s0 }
   0x2   :  { %7794 = sst [smem:[#allocation5_spill]] %s7771_s1  ;;  %s6374_s1 = smov 0  }
   0x3   :  { %7795 = sst [smem:[#allocation6_spill]] %s7772_s2 }
   0x4   :  { %7796 = sst [smem:[#allocation7_spill]] %s7773_s3 }
   0x5   :  { %7797 = sst [smem:[#allocation8_spill]] %s7774_s4 }
   0x6 LB: > { %s5064_s22 = sadd.s32 4294967295, %s6261_s1   ;;  %p5068_p0 = scmp.ge.s32.totalorder %s6261_s1, 1  ;;  %s6261_s1 = sphi %s6374_s1, %s30_s1  }
   0x7   : > { %p571_p1 = scmp.lt.s32.totalorder %s6261_s1, 3 }
   0x9   : > { %p572_p2 = pnand %p5068_p0, %p571_p1 }
   0xa   : > { %s7798_s2 = sld [smem:[#allocation5_spill]] (!%p572_p2)  ;;  %v6263_v2 = vmov (!%p572_p2), 0   ;;  %p632_p3 = scmp.lt.s32.totalorder (!%p572_p2), %s5064_s22, 1  ;;  %vm831_vm0 = vcmask (!%p572_p2), 1041408   ;;  %vm806_vm1 = vcmask (!%p572_p2), 687104   ;;  %vm2026_vm2 = vcmask (!%p572_p2), 785408  }
   0xb   : > { %575 = sbr.rel (%p572_p2) target bundleno = 2111 (0x83f), region = 100  ;;  %870 = vmatprep.mubr.bf16.mxu0 (!%p572_p2), %v6263_v2  ;;  %1388 = vmatprep.mubr.bf16.mxu1 (!%p572_p2), %v6263_v2  ;;  %s7799_s23 = sld [smem:[#allocation4_spill]] (!%p572_p2)  ;;  %vm646_vm3 = vcmask (!%p572_p2), 909312   ;;  %vm2700_vm4 = vcmask (!%p572_p2), 916480  }
   0xc   : > { %s7800_s3 = sld [smem:[#allocation6_spill]] (!%p572_p2)  ;;  %s7801_s26 = sld [smem:[#allocation7_spill]] (!%p572_p2) }
   0xd   : > { %s7802_s4 = sld [smem:[#allocation8_spill]] (!%p572_p2) }
  0x10   : > { %v6385_v0 = vld [vmem:[%s7798_s2 + $0x5c] ss:$8 sps:$4 sm:$0xff] (!%p572_p2)   ;;  %v6398_v3 = vld [vmem:[%s7798_s2 + $0x58] ss:$8 sps:$4 sm:$0xff] (!%p572_p2)   ;;  %v6409_v5 = vld [vmem:[%s7798_s2 + $0x6c] ss:$8 sps:$4 sm:$0xff] (!%p572_p2)  }
  0x11   : > { %v6390_v1 = vld [vmem:[%s7798_s2 + $0xb4] ss:$8 sps:$4 sm:$0xff] (!%p572_p2)   ;;  %838 = vmatprep.subr.bf16.mxu0 (!%p572_p2), %v6385_v0  ;;  %v6403_v4 = vld [vmem:[%s7798_s2 + $0xb0] ss:$8 sps:$4 sm:$0xff] (!%p572_p2)   ;;  %v6416_v6 = vld [vmem:[%s7798_s2 + $0xc4] ss:$8 sps:$4 sm:$0xff] (!%p572_p2)  }
  0x12   : > { %5823 = vmatprep.subr.bf16.mxu1 %v6390_v1  ;;  %839 = vmatpush1.bf16.msra.mxu0 %v6398_v3  ;;  %v6421_v7 = vld [vmem:[%s7798_s2 + $0x68] ss:$8 sps:$4 sm:$0xff]   ;;  %v6435_v9 = vld [vmem:[%s7798_s2 + $0x7c] ss:$8 sps:$4 sm:$0xff]   ;;  %v6445_v11 = vld [vmem:[%s7798_s2 + $0x78] ss:$8 sps:$4 sm:$0xff]  }
  0x13   : > { %5829 = vmatpush1.bf16.msra.mxu1 %v6403_v4  ;;  %840 = vmatprep.subr.bf16.mxu0 %v6409_v5  ;;  %v6429_v8 = vld [vmem:[%s7798_s2 + $0xc0] ss:$8 sps:$4 sm:$0xff]   ;;  %v6440_v10 = vld [vmem:[%s7798_s2 + $0xd4] ss:$8 sps:$4 sm:$0xff]   ;;  %v6450_v12 = vld [vmem:[%s7798_s2 + $0xd0] ss:$8 sps:$4 sm:$0xff]  }
  0x14   : > { %5824 = vmatprep.subr.bf16.mxu1 %v6416_v6  ;;  %v6457_v13 = vld [vmem:[%s7798_s2 + $0x8c] ss:$8 sps:$4 sm:$0xff]   ;;  %s7824_s22 = smov (!%p632_p3, %s5064_s22), 1  ;;  %v6475_v15 = vld [vmem:[%s7798_s2 + $0x88] ss:$8 sps:$4 sm:$0xff]  }
  0x15   : > { %v6468_v14 = vld [vmem:[%s7798_s2 + $0xe4] ss:$8 sps:$4 sm:$0xff]   ;;  %v6480_v16 = vld [vmem:[%s7798_s2 + $0xe0] ss:$8 sps:$4 sm:$0xff]   ;;  %s6043_s29 = smul.u32 264, %s7824_s22  ;;  %s5070_s25 = sshll.u32 %s7824_s22, 3 }
  0x16   : > { %841 = vmatpush1.bf16.msra.mxu0 %v6421_v7  ;;  %v6488_v17 = vld [vmem:[%s7798_s2 + $0x9c] ss:$8 sps:$4 sm:$0xff]   ;;  %v5113_v19 = vld [vmem:[%s7798_s2 + $0xa8] sm:$0x33]  ;;  %v6506_v21 = vld [vmem:[%s7798_s2 + $0x98] ss:$8 sps:$4 sm:$0xff]   ;;  %s640_s28 = scalar_lea.vmem %s7789_s19, %s5070_s25  ;;  %s644_s27 = scalar_lea.vmem %s7790_s20, %s5070_s25 }
  0x17   : > { %5830 = vmatpush1.bf16.msra.mxu1 %v6429_v8  ;;  %842 = vmatprep.subr.bf16.mxu0 %v6435_v9  ;;  %v6493_v18 = vld [vmem:[%s7798_s2 + $0xf4] ss:$8 sps:$4 sm:$0xff]   ;;  %v5182_v20 = vld [vmem:[%s7798_s2 + $0x100] sm:$0x33]  ;;  %v6511_v22 = vld [vmem:[%s7798_s2 + $0xf0] ss:$8 sps:$4 sm:$0xff]   ;;  %v6513_v23 = vcombine.high %v5113_v19, %v5113_v19  ;;  %s6518_s24 = scalar_lea.vmem %s7799_s23, %s6043_s29  ;;  %v5124_v25 = vcombine.low %v5113_v19, %v5113_v19 }
  0x18   : > { %5825 = vmatprep.subr.bf16.mxu1 %v6440_v10  ;;  %v6522_v24 = vcombine.high %v5182_v20, %v5182_v20  ;;  %v5193_v26 = vcombine.low %v5182_v20, %v5182_v20  ;;  %v5087_v27 = vld [vmem:[%s6518_s24 + $0x1] ss:$2 sm:$0xff]  ;;  %v5088_v28 = vld [vmem:[%s6518_s24 + $0x11] ss:$2 sm:$0xff]  ;;  %v5170_v29 = vld [vmem:[%s6518_s24 + $0xe2] ss:$2 sm:$0xff] }
  0x19   : > { %v5171_v30 = vld [vmem:[%s6518_s24 + $0xf2] ss:$2 sm:$0xff]  ;;  %v6535_v31 = vsel %vm831_vm0, %v5124_v25, 0  ;;  %v6094_v33 = vld [vmem:[%s7798_s2 + $0x4] ss:$8 sps:$4 sm:$0xff]   ;;  %v6543_v34 = vpack.c.bf16 %v5088_v28, %v5087_v27  ;;  %s6268_s23 = smov 120  }
  0x1a   : > { %843 = vmatpush1.bf16.msra.mxu0 %v6445_v11  ;;  %v6538_v32 = vsel %vm831_vm0, %v5193_v26, 0  ;;  %v6545_v35 = vpack.c.bf16 %v5171_v30, %v5170_v29  ;;  %v6092_v36 = vld [vmem:[%s7798_s2] ss:$8 sps:$4 sm:$0xff]   ;;  %v6097_v38 = vld [vmem:[%s7798_s2 + $0x14] ss:$8 sps:$4 sm:$0xff]  }
  0x1b   : > { %5831 = vmatpush1.bf16.msra.mxu1 %v6450_v12  ;;  %844 = vmatprep.subr.bf16.mxu0 %v6457_v13  ;;  %v5089_v37 = vld [vmem:[%s6518_s24 + $0x21] ss:$2 sm:$0xff]  ;;  %v5090_v39 = vld [vmem:[%s6518_s24 + $0x31] ss:$2 sm:$0xff]  ;;  %v5156_v56 = vld [vmem:[%s6518_s24 + $0x2] ss:$2 sm:$0xff] }
  0x1c   : > { %5826 = vmatprep.subr.bf16.mxu1 %v6468_v14  ;;  %v6095_v40 = vld [vmem:[%s7798_s2 + $0x10] ss:$8 sps:$4 sm:$0xff]   ;;  %v6572_v42 = vpack.c.bf16 %v5090_v39, %v5089_v37  ;;  %v6100_v43 = vld [vmem:[%s7798_s2 + $0x24] ss:$8 sps:$4 sm:$0xff]   ;;  %v6098_v45 = vld [vmem:[%s7798_s2 + $0x20] ss:$8 sps:$4 sm:$0xff]  }
  0x1d   : > { %v698_v41 = vld [vmem:[%s7798_s2 + $0x50] sm:$0x33]  ;;  %v5091_v47 = vld [vmem:[%s6518_s24 + $0x41] ss:$2 sm:$0xff] }
  0x1e   : > { %845 = vmatpush1.bf16.msra.mxu0 %v6475_v15  ;;  %v5145_v44 = vcombine.low %v698_v41, %v698_v41  ;;  %v6103_v46 = vld [vmem:[%s7798_s2 + $0x34] ss:$8 sps:$4 sm:$0xff]   ;;  %v6101_v49 = vld [vmem:[%s7798_s2 + $0x30] ss:$8 sps:$4 sm:$0xff]   ;;  %v6106_v50 = vld [vmem:[%s7798_s2 + $0x44] ss:$8 sps:$4 sm:$0xff]   ;;  %v5146_v58 = vcombine.high %v698_v41, %v698_v41 }
  0x1f   : > { %5832 = vmatpush1.bf16.msra.mxu1 %v6480_v16  ;;  %846 = vmatprep.subr.bf16.mxu0 %v6488_v17  ;;  %v5092_v48 = vld [vmem:[%s6518_s24 + $0x51] ss:$2 sm:$0xff]  ;;  %v6104_v53 = vld [vmem:[%s7798_s2 + $0x40] ss:$8 sps:$4 sm:$0xff]  }
  0x20   : > { %5827 = vmatprep.subr.bf16.mxu1 %v6493_v18  ;;  %v6599_v51 = vsel %vm831_vm0, %v5145_v44, 0  ;;  %v6601_v52 = vpack.c.bf16 %v5092_v48, %v5091_v47  ;;  %v5093_v54 = vld [vmem:[%s6518_s24 + $0x61] ss:$2 sm:$0xff]  ;;  %v5094_v55 = vld [vmem:[%s6518_s24 + $0x71] ss:$2 sm:$0xff] }
  0x21   : > { %v5157_v57 = vld [vmem:[%s6518_s24 + $0x12] ss:$2 sm:$0xff]  ;;  %v6618_v59 = vpack.c.bf16 %v5094_v55, %v5093_v54  ;;  %v5095_v61 = vld [vmem:[%s6518_s24 + $0x81] ss:$2 sm:$0xff]  ;;  %v5096_v62 = vld [vmem:[%s6518_s24 + $0x91] ss:$2 sm:$0xff] }
  0x22   : > { %847 = vmatpush1.bf16.msra.mxu0 %v6506_v21  ;;  %v6620_v60 = vpack.c.bf16 %v5157_v57, %v5156_v56  ;;  %v5158_v63 = vld [vmem:[%s6518_s24 + $0x22] ss:$2 sm:$0xff]  ;;  %v5099_v19 = vld [vmem:[%s6518_s24 + $0xc1] ss:$2 sm:$0xff]  ;;  %v5100_v20 = vld [vmem:[%s6518_s24 + $0xd1] ss:$2 sm:$0xff] }
  0x23   : > { %5833 = vmatpush1.bf16.msra.mxu1 %v6511_v22  ;;  %5126 = vmatprep.subr.msk.bf16.mxu0 %vm831_vm0, %v6513_v23  ;;  %v6665_v25 = vpack.c.bf16 %v5100_v20, %v5099_v19  ;;  %v5101_v27 = vld [vmem:[%s6518_s24 + $0xe1] ss:$2 sm:$0xff]  ;;  %v5102_v28 = vld [vmem:[%s6518_s24 + $0xf1] ss:$2 sm:$0xff]  ;;  %v5164_v29 = vld [vmem:[%s6518_s24 + $0x82] ss:$2 sm:$0xff] }
  0x24   : > { %5828 = vmatprep.subr.msk.bf16.mxu1 %vm831_vm0, %v6522_v24  ;;  %v5165_v30 = vld [vmem:[%s6518_s24 + $0x92] ss:$2 sm:$0xff]  ;;  %v5166_v37 = vld [vmem:[%s6518_s24 + $0xa2] ss:$2 sm:$0xff]  ;;  %v5223_v57 = vld [vmem:[%s6518_s24 + $0x13] ss:$2 sm:$0xff] }
  0x25   : > { %v5073_v41 = vld [vmem:[%s6518_s24 + $0x20] ss:$2 sm:$0xff]  ;;  %v5080_v55 = vld [vmem:[%s6518_s24 + $0x90] ss:$2 sm:$0xff]  ;;  %v5230_v19 = vld [vmem:[%s6518_s24 + $0x83] ss:$2 sm:$0xff] }
  0x26   : > { %849 = vmatpush1.bf16.msra.mxu0 %v6535_v31  ;;  %v5168_v44 = vld [vmem:[%s6518_s24 + $0xc2] ss:$2 sm:$0xff]  ;;  %v5231_v20 = vld [vmem:[%s6518_s24 + $0x93] ss:$2 sm:$0xff] }
  0x27   : > { %5834 = vmatpush1.bf16.msra.mxu1 %v6538_v32  ;;  %1036 = vmatprep.subr.bf16.mxu0 %v6094_v33  ;;  %v5075_v48 = vld [vmem:[%s6518_s24 + $0x40] ss:$2 sm:$0xff] }
  0x28   : > { %1431 = vmatprep.subr.bf16.mxu1 %v6385_v0  ;;  %v5159_v0 = vld [vmem:[%s6518_s24 + $0x32] ss:$2 sm:$0xff] }
  0x29   : > { %5127 = vmatmul.mubr.msk.bf16.vlgmr.msra.gmra.mrb[0].mxu0 %vm806_vm1, %v6543_v34 }
  0x2a   : > { %5203 = vmatmul.mubr.msk.bf16.vlgmr.msra.gmra.mrb[0].mxu1 %vm806_vm1, %v6545_v35  ;;  %880 = vmatprep.mubr.bf16.mxu0 %v6263_v2 }
  0x2b   : > { %1432 = vmatpush1.bf16.msra.mxu1 %v6398_v3  ;;  %1463 = vmatprep.mubr.bf16.mxu1 %v6263_v2  ;;  %v6636_v3 = vpack.c.bf16 %v5096_v62, %v5095_v61  ;;  %v5225_v61 = vld [vmem:[%s6518_s24 + $0x33] ss:$2 sm:$0xff] }
  0x2c   : > { %1433 = vmatprep.subr.bf16.mxu1 %v6409_v5  ;;  %1037 = vmatpush1.bf16.msra.mxu0 %v6092_v36  ;;  %v6638_v5 = vpack.c.bf16 %v5159_v0, %v5158_v63  ;;  %v6110_v62 = vld [vmem:[%s7800_s3 + $0x78] sm:$0xff]   ;;  %v6112_v0 = vld [vmem:[%s7800_s3 + $0x80] sm:$0xff]  }
  0x2d   : > { %1038 = vmatprep.subr.bf16.mxu0 %v6097_v38 }
  0x2f   : > { %1434 = vmatpush1.bf16.msra.mxu1 %v6421_v7  ;;  %v5097_v7 = vld [vmem:[%s6518_s24 + $0xa1] ss:$2 sm:$0xff] }
  0x30   : > { %1435 = vmatprep.subr.bf16.mxu1 %v6435_v9  ;;  %1039 = vmatpush1.bf16.msra.mxu0 %v6095_v40  ;;  %v5098_v9 = vld [vmem:[%s6518_s24 + $0xb1] ss:$2 sm:$0xff] }
  0x31   : > { %5128 = vmatmul.mubr.msk.bf16.gmra.mrb[4].mxu0 %vm806_vm1, %v6572_v42  ;;  %1040 = vmatprep.subr.bf16.mxu0 %v6100_v43 }
  0x32   : > { %890 = vmatprep.mubr.bf16.mxu0 %v6263_v2 }
  0x33   : > { %1436 = vmatpush1.bf16.msra.mxu1 %v6445_v11  ;;  %v5160_v11 = vld [vmem:[%s6518_s24 + $0x42] ss:$2 sm:$0xff] }
  0x34   : > { %1437 = vmatprep.subr.bf16.mxu1 %v6457_v13  ;;  %1041 = vmatpush1.bf16.msra.mxu0 %v6098_v45  ;;  %v5161_v13 = vld [vmem:[%s6518_s24 + $0x52] ss:$2 sm:$0xff] }
  0x35   : > { %1042 = vmatprep.subr.bf16.mxu0 %v6103_v46 }
  0x37   : > { %1438 = vmatpush1.bf16.msra.mxu1 %v6475_v15  ;;  %v6650_v15 = vpack.c.bf16 %v5098_v9, %v5097_v7  ;;  %v6114_v7 = vld [vmem:[%s7800_s3 + $0x88] sm:$0xff]  }
  0x38   : > { %1439 = vmatprep.subr.bf16.mxu1 %v6488_v17  ;;  %1043 = vmatpush1.bf16.msra.mxu0 %v6101_v49  ;;  %v6652_v17 = vpack.c.bf16 %v5161_v13, %v5160_v11  ;;  %v6116_v11 = vld [vmem:[%s7800_s3 + $0x90] sm:$0xff]  }
  0x39   : > { %5129 = vmatmul.mubr.msk.bf16.gmra.mrb[8].mxu0 %vm806_vm1, %v6601_v52  ;;  %1044 = vmatprep.subr.bf16.mxu0 %v6106_v50  ;;  %v5228_v13 = vld [vmem:[%s6518_s24 + $0x63] ss:$2 sm:$0xff] }
  0x3a   : > { %900 = vmatprep.mubr.bf16.mxu0 %v6263_v2 }
  0x3b   : > { %1440 = vmatpush1.bf16.msra.mxu1 %v6506_v21  ;;  %v5162_v21 = vld [vmem:[%s6518_s24 + $0x62] ss:$2 sm:$0xff] }
  0x3c   : > { %5204 = vmatprep.subr.msk.bf16.mxu1 %vm831_vm0, %v6513_v23  ;;  %1045 = vmatpush1.bf16.msra.mxu0 %v6104_v53  ;;  %v5163_v23 = vld [vmem:[%s6518_s24 + $0x72] ss:$2 sm:$0xff] }
  0x3d   : > { %5147 = vmatprep.subr.msk.bf16.mxu0 %vm831_vm0, %v5146_v58  ;;  %v6667_v26 = vpack.c.bf16 %v5163_v23, %v5162_v21  ;;  %v1693_v21 = vpack.c.bf16 %v5231_v20, %v5230_v19  ;;  %v5232_v23 = vld [vmem:[%s6518_s24 + $0xa3] ss:$2 sm:$0xff] }
  0x3f   : > { %1442 = vmatpush1.bf16.msra.mxu1 %v6535_v31  ;;  %v6681_v31 = vpack.c.bf16 %v5102_v28, %v5101_v27  ;;  %v5234_v27 = vld [vmem:[%s6518_s24 + $0xc3] ss:$2 sm:$0xff]  ;;  %v5235_v28 = vld [vmem:[%s6518_s24 + $0xd3] ss:$2 sm:$0xff] }
  0x40   : > { %1544 = vmatprep.subr.bf16.mxu1 %v6094_v33  ;;  %1047 = vmatpush1.bf16.msra.mxu0 %v6599_v51  ;;  %v6683_v33 = vpack.c.bf16 %v5165_v30, %v5164_v29  ;;  %v1695_v29 = vpack.c.bf16 %v5235_v28, %v5234_v27  ;;  %v5236_v30 = vld [vmem:[%s6518_s24 + $0xe3] ss:$2 sm:$0xff] }
  0x41   : > { %5130 = vmatmul.mubr.msk.bf16.gmra.mrb[12].mxu0 %vm806_vm1, %v6618_v59  ;;  %1286 = vmatprep.subr.bf16.mxu0 %v6390_v1  ;;  %v6137_v28 = vld [vmem:[%s7776_s6 + $0x70] ss:$8 sps:$4 sm:$0xff]  }
  0x42   : > { %5205 = vmatmul.mubr.msk.bf16.vlgmr.msra.gmra.mrb[4].mxu1 %vm806_vm1, %v6620_v60  ;;  %910 = vmatprep.mubr.bf16.mxu0 %v6263_v2 }
  0x43   : > { %1545 = vmatpush1.bf16.msra.mxu1 %v6092_v36  ;;  %1473 = vmatprep.mubr.bf16.mxu1 %v6263_v2  ;;  %v5072_v36 = vld [vmem:[%s6518_s24 + $0x10] ss:$2 sm:$0xff] }
  0x44   : > { %1546 = vmatprep.subr.bf16.mxu1 %v6097_v38  ;;  %v5167_v38 = vld [vmem:[%s6518_s24 + $0xb2] ss:$2 sm:$0xff] }
  0x47   : > { %1547 = vmatpush1.bf16.msra.mxu1 %v6095_v40  ;;  %v6695_v40 = vpack.c.bf16 %v5167_v38, %v5166_v37  ;;  %v6120_v37 = vld [vmem:[%s7800_s3 + $0x28] sm:$0xff]   ;;  %v6121_v38 = vld [vmem:[%s7800_s3 + $0xa0] sm:$0xff]  }
  0x48   : > { %1548 = vmatprep.subr.bf16.mxu1 %v6100_v43  ;;  %v5074_v43 = vld [vmem:[%s6518_s24 + $0x30] ss:$2 sm:$0xff] }
  0x49   : > { %5131 = vmatmul.mubr.msk.bf16.gmra.mrb[16].mxu0 %vm806_vm1, %v6636_v3 }
  0x4a   : > { %5206 = vmatmul.mubr.msk.bf16.gmra.mrb[8].mxu1 %vm806_vm1, %v6638_v5  ;;  %920 = vmatprep.mubr.bf16.mxu0 %v6263_v2 }
  0x4b   : > { %1483 = vmatprep.mubr.bf16.mxu1 %v6263_v2  ;;  %1549 = vmatpush1.bf16.msra.mxu1 %v6098_v45  ;;  %v5169_v45 = vld [vmem:[%s6518_s24 + $0xd2] ss:$2 sm:$0xff] }
  0x4c   : > { %1550 = vmatprep.subr.bf16.mxu1 %v6103_v46  ;;  %v681_v46 = vpack.c.bf16 %v5074_v43, %v5073_v41  ;;  %v6708_v47 = vpack.c.bf16 %v5169_v45, %v5168_v44  ;;  %v6123_v44 = vld [vmem:[%s7800_s3 + $0xa8] sm:$0xff]  }
  0x4f   : > { %1551 = vmatpush1.bf16.msra.mxu1 %v6101_v49  ;;  %v5076_v49 = vld [vmem:[%s6518_s24 + $0x50] ss:$2 sm:$0xff] }
  0x50   : > { %1552 = vmatprep.subr.bf16.mxu1 %v6106_v50  ;;  %v682_v50 = vpack.c.bf16 %v5076_v49, %v5075_v48  ;;  %v6126_v48 = vld [vmem:[%s7800_s3 + $0x40] sm:$0xff]   ;;  %v6127_v49 = vld [vmem:[%s7800_s3 + $0xb8] sm:$0xff]  }
  0x51   : > { %5132 = vmatmul.mubr.msk.bf16.gmra.mrb[20].mxu0 %vm806_vm1, %v6650_v15 }
  0x52   : > { %5207 = vmatmul.mubr.msk.bf16.gmra.mrb[12].mxu1 %vm806_vm1, %v6652_v17  ;;  %930 = vmatprep.mubr.bf16.mxu0 %v6263_v2 }
  0x53   : > { %1493 = vmatprep.mubr.bf16.mxu1 %v6263_v2  ;;  %1553 = vmatpush1.bf16.msra.mxu1 %v6104_v53  ;;  %v5078_v53 = vld [vmem:[%s6518_s24 + $0x70] ss:$2 sm:$0xff] }
  0x54   : > { %5213 = vmatprep.subr.msk.bf16.mxu1 %vm831_vm0, %v5146_v58 }
  0x57   : > { %1555 = vmatpush1.bf16.msra.mxu1 %v6599_v51  ;;  %v5077_v51 = vld [vmem:[%s6518_s24 + $0x60] ss:$2 sm:$0xff] }
  0x58   : > { %1721 = vmatprep.subr.bf16.mxu1 %v6390_v1  ;;  %v649_v1 = vld [vmem:[%s6518_s24] ss:$2 sm:$0xff]  ;;  %v683_v54 = vpack.c.bf16 %v5078_v53, %v5077_v51  ;;  %v6130_v53 = vld [vmem:[%s7800_s3 + $0x50] sm:$0xff]  }
  0x59   : > { %5133 = vmatmul.mubr.msk.bf16.gmra.mrb[24].mxu0 %vm806_vm1, %v6665_v25  ;;  %v680_v39 = vpack.c.bf16 %v5072_v36, %v649_v1  ;;  %v6118_v36 = vld [vmem:[%s7800_s3 + $0x98] sm:$0xff]   ;;  %v6129_v51 = vld [vmem:[%s7800_s3 + $0xc0] sm:$0xff]  }
  0x5a   : > { %5208 = vmatmul.mubr.msk.bf16.gmra.mrb[16].mxu1 %vm806_vm1, %v6667_v26  ;;  %940 = vmatprep.mubr.bf16.mxu0 %v6263_v2 }
  0x5b   : > { %1503 = vmatprep.mubr.bf16.mxu1 %v6263_v2 }
  0x61   : > { %5134 = vmatmul.mubr.msk.bf16.gmra.mrb[28].mxu0 %vm806_vm1, %v6681_v31 }
  0x62   : > { %5209 = vmatmul.mubr.msk.bf16.gmra.mrb[20].mxu1 %vm806_vm1, %v6683_v33  ;;  %1068 = vmatprep.mubr.bf16.mxu0 %v6263_v2 }
  0x63   : > { %1513 = vmatprep.mubr.bf16.mxu1 %v6263_v2 }
  0x69   : > { %5148 = vmatmul.mubr.msk.bf16.vlgmr.msra.gmra.mrb[0].mxu0 %vm806_vm1, %v680_v39 }
  0x6a   : > { %5210 = vmatmul.mubr.msk.bf16.gmra.mrb[24].mxu1 %vm806_vm1, %v6695_v40  ;;  %1078 = vmatprep.mubr.bf16.mxu0 %v6263_v2 }
  0x6b   : > { %1523 = vmatprep.mubr.bf16.mxu1 %v6263_v2  ;;  %1287 = vmatpush1.bf16.msra.mxu0 %v6403_v4 }
  0x6c   : > { %1288 = vmatprep.subr.bf16.mxu0 %v6416_v6 }
  0x6f   : > { %1289 = vmatpush1.bf16.msra.mxu0 %v6429_v8 }
  0x70   : > { %1290 = vmatprep.subr.bf16.mxu0 %v6440_v10 }
  0x71   : > { %5149 = vmatmul.mubr.msk.bf16.gmra.mrb[4].mxu0 %vm806_vm1, %v681_v46  ;;  %v6124_v46 = vld [vmem:[%s7800_s3 + $0x38] sm:$0xff]  }
  0x72   : > { %5211 = vmatmul.mubr.msk.bf16.gmra.mrb[28].mxu1 %vm806_vm1, %v6708_v47  ;;  %1088 = vmatprep.mubr.bf16.mxu0 %v6263_v2 }
  0x73   : > { %1533 = vmatprep.mubr.bf16.mxu1 %v6263_v2  ;;  %1291 = vmatpush1.bf16.msra.mxu0 %v6450_v12 }
  0x74   : > { %1292 = vmatprep.subr.bf16.mxu0 %v6468_v14 }
  0x77   : > { %1293 = vmatpush1.bf16.msra.mxu0 %v6480_v16 }
  0x78   : > { %1294 = vmatprep.subr.bf16.mxu0 %v6493_v18 }
  0x79   : > { %5150 = vmatmul.mubr.msk.bf16.gmra.mrb[8].mxu0 %vm806_vm1, %v682_v50  ;;  %v6128_v50 = vld [vmem:[%s7800_s3 + $0x48] sm:$0xff]  }
  0x7a   : > { %5212 = vmatmul.mubr.msk.bf16.gmra.mrb[32].mxu1 %vm806_vm1, %v6545_v35  ;;  %1098 = vmatprep.mubr.bf16.mxu0 %v6263_v2  ;;  %v5079_v35 = vld [vmem:[%s6518_s24 + $0x80] ss:$2 sm:$0xff] }
  0x7b   : > { %1576 = vmatprep.mubr.bf16.mxu1 %v6263_v2  ;;  %1295 = vmatpush1.bf16.msra.mxu0 %v6511_v22  ;;  %v684_v56 = vpack.c.bf16 %v5080_v55, %v5079_v35  ;;  %v6132_v35 = vld [vmem:[%s7800_s3 + $0x58] sm:$0xff]   ;;  %v6133_v55 = vld [vmem:[%s7800_s3 + $0xd0] sm:$0xff]  }
  0x7c   : > { %5195 = vmatprep.subr.msk.bf16.mxu0 %vm831_vm0, %v6522_v24 }
  0x7f   : > { %1297 = vmatpush1.bf16.msra.mxu0 %v6538_v32 }
  0x80   : > { %2051 = vmatprep.subr.bf16.mxu0 %v6263_v2 }
  0x81   : > { %5151 = vmatmul.mubr.msk.bf16.gmra.mrb[12].mxu0 %vm806_vm1, %v683_v54  ;;  %v6131_v54 = vld [vmem:[%s7800_s3 + $0xc8] sm:$0xff]  }
  0x82   : > { %5214 = vmatmul.mubr.msk.bf16.vlgmr.msra.gmra.mrb[4].mxu1 %vm806_vm1, %v6543_v34  ;;  %1108 = vmatprep.mubr.bf16.mxu0 %v6263_v2  ;;  %v5082_v34 = vld [vmem:[%s6518_s24 + $0xb0] ss:$2 sm:$0xff] }
  0x83   : > { %1722 = vmatpush1.bf16.msra.mxu1 %v6403_v4  ;;  %1586 = vmatprep.mubr.bf16.mxu1 %v6263_v2  ;;  %v5081_v4 = vld [vmem:[%s6518_s24 + $0xa0] ss:$2 sm:$0xff] }
  0x84   : > { %1723 = vmatprep.subr.bf16.mxu1 %v6416_v6  ;;  %v685_v6 = vpack.c.bf16 %v5082_v34, %v5081_v4  ;;  %v6135_v4 = vld [vmem:[%s7800_s3 + $0x68] sm:$0xff]   ;;  %v6136_v34 = vld [vmem:[%s7800_s3 + $0xd8] sm:$0xff]  }
  0x87   : > { %1724 = vmatpush1.bf16.msra.mxu1 %v6429_v8  ;;  %v5083_v8 = vld [vmem:[%s6518_s24 + $0xc0] ss:$2 sm:$0xff] }
  0x88   : > { %1725 = vmatprep.subr.bf16.mxu1 %v6440_v10  ;;  %v5084_v10 = vld [vmem:[%s6518_s24 + $0xd0] ss:$2 sm:$0xff] }
  0x89   : > { %5152 = vmatmul.mubr.msk.bf16.gmra.mrb[16].mxu0 %vm806_vm1, %v684_v56  ;;  %v6134_v56 = vld [vmem:[%s7800_s3 + $0x60] sm:$0xff]  }
  0x8a   : > { %5215 = vmatmul.mubr.msk.bf16.gmra.mrb[8].mxu1 %vm806_vm1, %v6572_v42  ;;  %1118 = vmatprep.mubr.bf16.mxu0 %v6263_v2  ;;  %v6117_v42 = vld [vmem:[%s7800_s3 + $0x18] sm:$0xff]  }
  0x8b   : > { %1596 = vmatprep.mubr.bf16.mxu1 %v6263_v2  ;;  %1726 = vmatpush1.bf16.msra.mxu1 %v6450_v12  ;;  %v686_v12 = vpack.c.bf16 %v5084_v10, %v5083_v8 }
  0x8c   : > { %1727 = vmatprep.subr.bf16.mxu1 %v6468_v14  ;;  %v5085_v14 = vld [vmem:[%s6518_s24 + $0xe0] ss:$2 sm:$0xff] }
  0x8f   : > { %1728 = vmatpush1.bf16.msra.mxu1 %v6480_v16  ;;  %v5086_v16 = vld [vmem:[%s6518_s24 + $0xf0] ss:$2 sm:$0xff] }
  0x90   : > { %1729 = vmatprep.subr.bf16.mxu1 %v6493_v18  ;;  %v687_v18 = vpack.c.bf16 %v5086_v16, %v5085_v14 }
  0x91   : > { %5153 = vmatmul.mubr.msk.bf16.gmra.mrb[20].mxu0 %vm806_vm1, %v685_v6  ;;  %v6139_v6 = vld [vmem:[%s7776_s6 + $0x74] ss:$8 sps:$4 sm:$0xff]  }
  0x92   : > { %5216 = vmatmul.mubr.msk.bf16.gmra.mrb[12].mxu1 %vm806_vm1, %v6601_v52  ;;  %1128 = vmatprep.mubr.bf16.mxu0 %v6263_v2  ;;  %v5222_v52 = vld [vmem:[%s6518_s24 + $0x3] ss:$2 sm:$0xff] }
  0x93   : > { %1606 = vmatprep.mubr.bf16.mxu1 %v6263_v2  ;;  %1730 = vmatpush1.bf16.msra.mxu1 %v6511_v22  ;;  %v6111_v22 = vld [vmem:[%s7800_s3] sm:$0xff]   ;;  %v1689_v58 = vpack.c.bf16 %v5223_v57, %v5222_v52 }
  0x94   : > { %5238 = vmatprep.subr.msk.bf16.mxu1 %vm831_vm0, %v6522_v24  ;;  %v6113_v24 = vld [vmem:[%s7800_s3 + $0x8] sm:$0xff]  }
  0x97   : > { %1732 = vmatpush1.bf16.msra.mxu1 %v6538_v32  ;;  %v6115_v32 = vld [vmem:[%s7800_s3 + $0x10] sm:$0xff]  }
  0x98   : > { %2261 = vmatprep.subr.bf16.mxu1 %v6263_v2 }
  0x99   : > { %5154 = vmatmul.mubr.msk.bf16.gmra.mrb[24].mxu0 %vm806_vm1, %v686_v12 }
  0x9a   : > { %5217 = vmatmul.mubr.msk.bf16.gmra.mrb[16].mxu1 %vm806_vm1, %v6618_v59  ;;  %1138 = vmatprep.mubr.bf16.mxu0 %v6263_v2  ;;  %v6109_v59 = vld [vmem:[%s7800_s3 + $0x70] sm:$0xff]  }
  0x9b   : > { %1616 = vmatprep.mubr.bf16.mxu1 %v6263_v2 }
  0xa1   : > { %5155 = vmatmul.mubr.msk.bf16.gmra.mrb[28].mxu0 %vm806_vm1, %v687_v18 }
  0xa2   : > { %5218 = vmatmul.mubr.msk.bf16.gmra.mrb[20].mxu1 %vm806_vm1, %v6636_v3  ;;  %1318 = vmatprep.mubr.bf16.mxu0 %v6263_v2  ;;  %v5226_v3 = vld [vmem:[%s6518_s24 + $0x43] ss:$2 sm:$0xff] }
  0xa3   : > { %1626 = vmatprep.mubr.bf16.mxu1 %v6263_v2 }
  0xa9   : > { %5196 = vmatmul.mubr.msk.bf16.vlgmr.msra.gmra.mrb[0].mxu0 %vm806_vm1, %v6620_v60  ;;  %v5224_v60 = vld [vmem:[%s6518_s24 + $0x23] ss:$2 sm:$0xff] }
  0xaa   : > { %5219 = vmatmul.mubr.msk.bf16.gmra.mrb[24].mxu1 %vm806_vm1, %v6650_v15  ;;  %1328 = vmatprep.mubr.bf16.mxu0 %v6263_v2  ;;  %v1690_v63 = vpack.c.bf16 %v5225_v61, %v5224_v60  ;;  %v5229_v15 = vld [vmem:[%s6518_s24 + $0x73] ss:$2 sm:$0xff] }
  0xab   : > { %1636 = vmatprep.mubr.bf16.mxu1 %v6263_v2  ;;  %2052 = vmatpush1.bf16.msra.mxu0 %v6111_v22 }
  0xac   : > { %2053 = vmatprep.subr.bf16.mxu0 %v6263_v2 }
  0xaf   : > { %2054 = vmatpush1.bf16.msra.mxu0 %v6113_v24 }
  0xb0   : > { %2055 = vmatprep.subr.bf16.mxu0 %v6263_v2 }
  0xb1   : > { %5197 = vmatmul.mubr.msk.bf16.gmra.mrb[4].mxu0 %vm806_vm1, %v6638_v5  ;;  %v5227_v5 = vld [vmem:[%s6518_s24 + $0x53] ss:$2 sm:$0xff] }
  0xb2   : > { %5220 = vmatmul.mubr.msk.bf16.gmra.mrb[28].mxu1 %vm806_vm1, %v6665_v25  ;;  %1338 = vmatprep.mubr.bf16.mxu0 %v6263_v2  ;;  %v1691_v9 = vpack.c.bf16 %v5227_v5, %v5226_v3  ;;  %v5233_v25 = vld [vmem:[%s6518_s24 + $0xb3] ss:$2 sm:$0xff] }
  0xb3   : > { %1646 = vmatprep.mubr.bf16.mxu1 %v6263_v2  ;;  %2056 = vmatpush1.bf16.msra.mxu0 %v6115_v32 }
  0xb4   : > { %2057 = vmatprep.subr.bf16.mxu0 %v6263_v2 }
  0xb7   : > { %2058 = vmatpush1.bf16.msra.mxu0 %v6117_v42 }
  0xb8   : > { %2059 = vmatprep.subr.bf16.mxu0 %v6263_v2 }
  0xb9   : > { %5198 = vmatmul.mubr.msk.bf16.gmra.mrb[8].mxu0 %vm806_vm1, %v6652_v17  ;;  %v1692_v17 = vpack.c.bf16 %v5229_v15, %v5228_v13 }
  0xba   : > { %5221 = vmatmul.mubr.msk.bf16.gmra.mrb[32].mxu1 %vm806_vm1, %v6681_v31  ;;  %1348 = vmatprep.mubr.bf16.mxu0 %v6263_v2  ;;  %v5237_v31 = vld [vmem:[%s6518_s24 + $0xf3] ss:$2 sm:$0xff] }
  0xbb   : > { %1753 = vmatprep.mubr.bf16.mxu1 %v6263_v2  ;;  %v1696_v1 = vpack.c.bf16 %v5237_v31, %v5236_v30 }
  0xc1   : > { %5199 = vmatmul.mubr.msk.bf16.gmra.mrb[12].mxu0 %vm806_vm1, %v6667_v26  ;;  %v1694_v26 = vpack.c.bf16 %v5233_v25, %v5232_v23 }
  0xc2   : > { %5239 = vmatmul.mubr.msk.bf16.vlgmr.msra.gmra.mrb[4].mxu1 %vm806_vm1, %v1689_v58  ;;  %1358 = vmatprep.mubr.bf16.mxu0 %v6263_v2 }
  0xc3   : > { %1763 = vmatprep.mubr.bf16.mxu1 %v6263_v2  ;;  %2262 = vmatpush1.bf16.msra.mxu1 %v6109_v59 }
  0xc4   : > { %2263 = vmatprep.subr.bf16.mxu1 %v6263_v2 }
  0xc7   : > { %2264 = vmatpush1.bf16.msra.mxu1 %v6110_v62 }
  0xc8   : > { %2265 = vmatprep.subr.bf16.mxu1 %v6263_v2 }
  0xc9   : > { %5200 = vmatmul.mubr.msk.bf16.gmra.mrb[16].mxu0 %vm806_vm1, %v6683_v33  ;;  %v6119_v33 = vld [vmem:[%s7800_s3 + $0x20] sm:$0xff]  }
  0xca   : > { %5240 = vmatmul.mubr.msk.bf16.gmra.mrb[8].mxu1 %vm806_vm1, %v1690_v63  ;;  %1368 = vmatprep.mubr.bf16.mxu0 %v6263_v2 }
  0xcb   : > { %1773 = vmatprep.mubr.bf16.mxu1 %v6263_v2  ;;  %2266 = vmatpush1.bf16.msra.mxu1 %v6112_v0 }
  0xcc   : > { %2267 = vmatprep.subr.bf16.mxu1 %v6263_v2  ;;  %2060 = vmatpush1.bf16.msra.mxu0 %v6119_v33 }
  0xcd   : > { %2061 = vmatprep.subr.bf16.mxu0 %v6263_v2 }
  0xcf   : > { %2268 = vmatpush1.bf16.msra.mxu1 %v6114_v7 }
  0xd0   : > { %2269 = vmatprep.subr.bf16.mxu1 %v6263_v2  ;;  %2062 = vmatpush1.bf16.msra.mxu0 %v6120_v37 }
  0xd1   : > { %5201 = vmatmul.mubr.msk.bf16.gmra.mrb[20].mxu0 %vm806_vm1, %v6695_v40  ;;  %2063 = vmatprep.subr.bf16.mxu0 %v6263_v2  ;;  %v6122_v40 = vld [vmem:[%s7800_s3 + $0x30] sm:$0xff]  }
  0xd2   : > { %5241 = vmatmul.mubr.msk.bf16.gmra.mrb[12].mxu1 %vm806_vm1, %v1691_v9  ;;  %1378 = vmatprep.mubr.bf16.mxu0 %v6263_v2 }
  0xd3   : > { %1783 = vmatprep.mubr.bf16.mxu1 %v6263_v2  ;;  %2270 = vmatpush1.bf16.msra.mxu1 %v6116_v11 }
  0xd4   : > { %2271 = vmatprep.subr.bf16.mxu1 %v6263_v2  ;;  %2064 = vmatpush1.bf16.msra.mxu0 %v6122_v40 }
  0xd5   : > { %2065 = vmatprep.subr.bf16.mxu0 %v6263_v2 }
  0xd7   : > { %2272 = vmatpush1.bf16.msra.mxu1 %v6118_v36 }
  0xd8   : > { %2273 = vmatprep.subr.bf16.mxu1 %v6263_v2  ;;  %2066 = vmatpush1.bf16.msra.mxu0 %v6124_v46 }
  0xd9   : > { %5202 = vmatmul.mubr.msk.bf16.gmra.mrb[24].mxu0 %vm806_vm1, %v6708_v47  ;;  %v6125_v47 = vld [vmem:[%s7800_s3 + $0xb0] sm:$0xff]   ;;  %2067 = vmatprep.subr.bf16.mxu0 %v6263_v2 }
  0xda   : > { %5242 = vmatmul.mubr.msk.bf16.gmra.mrb[16].mxu1 %vm806_vm1, %v1692_v17 }
  0xdb   : > { %1793 = vmatprep.mubr.bf16.mxu1 %v6263_v2  ;;  %2274 = vmatpush1.bf16.msra.mxu1 %v6121_v38 }
  0xdc   : > { %2275 = vmatprep.subr.bf16.mxu1 %v6263_v2  ;;  %2068 = vmatpush1.bf16.msra.mxu0 %v6126_v48 }
  0xdd   : > { %2069 = vmatprep.subr.bf16.mxu0 %v6263_v2 }
  0xdf   : > { %2276 = vmatpush1.bf16.msra.mxu1 %v6123_v44 }
  0xe0   : > { %2277 = vmatprep.subr.bf16.mxu1 %v6263_v2  ;;  %2070 = vmatpush1.bf16.msra.mxu0 %v6128_v50 }
  0xe1   : > { %2071 = vmatprep.subr.bf16.mxu0 %v6263_v2 }
  0xe2   : > { %5243 = vmatmul.mubr.msk.bf16.gmra.mrb[20].mxu1 %vm806_vm1, %v1693_v21 }
  0xe3   : > { %1803 = vmatprep.mubr.bf16.mxu1 %v6263_v2  ;;  %2278 = vmatpush1.bf16.msra.mxu1 %v6125_v47 }
  0xe4   : > { %2279 = vmatprep.subr.bf16.mxu1 %v6263_v2  ;;  %2072 = vmatpush1.bf16.msra.mxu0 %v6130_v53 }
  0xe5   : > { %2073 = vmatprep.subr.bf16.mxu0 %v6263_v2 }
  0xe7   : > { %2280 = vmatpush1.bf16.msra.mxu1 %v6127_v49 }
  0xe8   : > { %2281 = vmatprep.subr.bf16.mxu1 %v6263_v2  ;;  %2074 = vmatpush1.bf16.msra.mxu0 %v6132_v35 }
  0xe9   : > { %2075 = vmatprep.subr.bf16.mxu0 %v6263_v2 }
  0xea   : > { %5244 = vmatmul.mubr.msk.bf16.gmra.mrb[24].mxu1 %vm806_vm1, %v1694_v26 }
  0xeb   : > { %1813 = vmatprep.mubr.bf16.mxu1 %v6263_v2  ;;  %2282 = vmatpush1.bf16.msra.mxu1 %v6129_v51 }
  0xec   : > { %2283 = vmatprep.subr.bf16.mxu1 %v6263_v2  ;;  %2076 = vmatpush1.bf16.msra.mxu0 %v6134_v56 }
  0xed   : > { %2077 = vmatprep.subr.bf16.mxu0 %v6263_v2 }
  0xef   : > { %2284 = vmatpush1.bf16.msra.mxu1 %v6131_v54 }
  0xf0   : > { %2285 = vmatprep.subr.bf16.mxu1 %v6263_v2  ;;  %2078 = vmatpush1.bf16.msra.mxu0 %v6135_v4 }
  0xf1   : > { %2867 = vmatprep.subr.bf16.mxu0 %v6139_v6 }
  0xf2   : > { %5245 = vmatmul.mubr.msk.bf16.gmra.mrb[28].mxu1 %vm806_vm1, %v1695_v29 }
  0xf3   : > { %1823 = vmatprep.mubr.bf16.mxu1 %v6263_v2  ;;  %2286 = vmatpush1.bf16.msra.mxu1 %v6133_v55 }
  0xf4   : > { %2287 = vmatprep.subr.bf16.mxu1 %v6263_v2 }
  0xf7   : > { %2288 = vmatpush1.bf16.msra.mxu1 %v6136_v34 }
  0xf8   : > { %3301 = vmatprep.subr.bf16.mxu1 %v6139_v6 }
  0xfa   : > { %5246 = vmatmul.mubr.msk.bf16.gmra.mrb[32].mxu1 %vm806_vm1, %v1696_v1 }
  0xfd   : > { %v1390_v39 = vpop.f32.mrb[0].mxu1 }
  0xfe   : > { %v1392_v41 = vpop.f32.mrb[1].mxu1 }
  0xff   : > { %v1394_v43 = vpop.f32.mrb[2].mxu1 }
 0x100   : > { %v1396_v45 = vpop.f32.mrb[3].mxu1 }
 0x174   : > { %v1140_v8 = vpop.f32.mrb[28].mxu0 }
 0x175   : > { %v6954_v10 = vadd.f32 %v1390_v39, %v1140_v8  ;;  %v1142_v12 = vpop.f32.mrb[29].mxu0 }
 0x176   : > { %v6956_v14 = vadd.f32 %v1392_v41, %v1142_v12  ;;  %v1144_v16 = vpop.f32.mrb[30].mxu0 }
 0x177   : > { %v6958_v18 = vadd.f32 %v1394_v43, %v1144_v16  ;;  %v1146_v22 = vpop.f32.mrb[31].mxu0 }
 0x178   : > { %v6960_v24 = vadd.f32 %v1396_v45, %v1146_v22 }
 0x17c   : > { %v1320_v32 = vpop.f32.mrb[0].mxu0 }
 0x17d   : > { %v1322_v42 = vpop.f32.mrb[1].mxu0 }
 0x17e   : > { %v1324_v52 = vpop.f32.mrb[2].mxu0 }
 0x17f   : > { %v1326_v57 = vpop.f32.mrb[3].mxu0 }
 0x184   : > { %v1330_v58 = vpop.f32.mrb[4].mxu0 }
 0x185   : > { %v1332_v59 = vpop.f32.mrb[5].mxu0 }
 0x186   : > { %v1334_v60 = vpop.f32.mrb[6].mxu0 }
 0x187   : > { %v1336_v61 = vpop.f32.mrb[7].mxu0 }
 0x18c   : > { %v1340_v62 = vpop.f32.mrb[8].mxu0 }
 0x18d   : > { %v1342_v63 = vpop.f32.mrb[9].mxu0 }
 0x18e   : > { %v1344_v0 = vpop.f32.mrb[10].mxu0 }
 0x18f   : > { %v1346_v3 = vpop.f32.mrb[11].mxu0 }
 0x194   : > { %v6962_v5 = vpop.f32.mrb[12].mxu0 }
 0x195   : > { %v1755_v7 = vpop.f32.mrb[4].mxu1  ;;  %v6964_v11 = vpop.f32.mrb[13].mxu0 }
 0x196   : > { %v1866_v9 = vmax.f32 %v1320_v32, %v1755_v7  ;;  %v1757_v13 = vpop.f32.mrb[5].mxu1  ;;  %v6966_v17 = vpop.f32.mrb[14].mxu0 }
 0x197   : > { %v1867_v15 = vmax.f32 %v1322_v42, %v1757_v13  ;;  %v1759_v19 = vpop.f32.mrb[6].mxu1  ;;  %v6968_v21 = vpop.f32.mrb[15].mxu0 }
 0x198   : > { %v1868_v20 = vmax.f32 %v1324_v52, %v1759_v19  ;;  %v1761_v23 = vpop.f32.mrb[7].mxu1 }
 0x199   : > { %v1869_v25 = vmax.f32 %v1326_v57, %v1761_v23 }
 0x19a   : > { %v1898_v26 = vpack.c.bf16 %v1868_v20, %v1866_v9 }
 0x19b   : > { %v1899_v27 = vpack.c.bf16 %v1869_v25, %v1867_v15 }
 0x19c   : > { %v6973_v29 = vpop.f32.mrb[16].mxu0 }
 0x19d   : > { %v1765_v30 = vpop.f32.mrb[8].mxu1  ;;  %5261 = vmatprep.mubr.msk.bf16.mxu0 %vm2026_vm2, %v1899_v27  ;;  %5311 = vmatprep.mubr.msk.bf16.mxu1 %vm2026_vm2, %v1899_v27  ;;  %v6977_v33 = vpop.f32.mrb[17].mxu0 }
 0x19e   : > { %v1870_v31 = vmax.f32 %v1330_v58, %v1765_v30  ;;  %v1767_v1 = vpop.f32.mrb[9].mxu1  ;;  %2084 = vmatmul.mubr.bf16.vlgmr.msra.gmra.mrb[32].mxu0 %v1898_v26  ;;  %2294 = vmatmul.mubr.bf16.vlgmr.msra.gmra.mrb[36].mxu1 %v1898_v26  ;;  %v1364_v37 = vpop.f32.mrb[18].mxu0 }
 0x19f   : > { %v1871_v36 = vmax.f32 %v1332_v59, %v1767_v1  ;;  %v1769_v38 = vpop.f32.mrb[10].mxu1  ;;  %2868 = vmatpush1.bf16.msra.mxu0 %v6137_v28  ;;  %3302 = vmatpush1.bf16.msra.mxu1 %v6137_v28  ;;  %v1366_v40 = vpop.f32.mrb[19].mxu0 }
 0x1a0   : > { %v1872_v39 = vmax.f32 %v1334_v60, %v1769_v38  ;;  %v1771_v41 = vpop.f32.mrb[11].mxu1 }
 0x1a1   : > { %v1873_v43 = vmax.f32 %v1336_v61, %v1771_v41 }
 0x1a2   : > { %v1900_v44 = vpack.c.bf16 %v1872_v39, %v1870_v31 }
 0x1a3   : > { %v1901_v45 = vpack.c.bf16 %v1873_v43, %v1871_v36 }
 0x1a4   : > { %v6979_v46 = vpop.f32.mrb[20].mxu0 }
 0x1a5   : > { %v1775_v47 = vpop.f32.mrb[12].mxu1  ;;  %5262 = vmatprep.mubr.msk.bf16.mxu0 %vm2026_vm2, %v1901_v45  ;;  %5312 = vmatprep.mubr.msk.bf16.mxu1 %vm2026_vm2, %v1901_v45  ;;  %v1372_v49 = vpop.f32.mrb[21].mxu0 }
 0x1a6   : > { %v1874_v48 = vmax.f32 %v1340_v62, %v1775_v47  ;;  %v1777_v50 = vpop.f32.mrb[13].mxu1  ;;  %2092 = vmatmul.mubr.bf16.gmra.mrb[36].mxu0 %v1900_v44  ;;  %2302 = vmatmul.mubr.bf16.gmra.mrb[40].mxu1 %v1900_v44  ;;  %v1374_v53 = vpop.f32.mrb[22].mxu0 }
 0x1a7   : > { %v1875_v51 = vmax.f32 %v1342_v63, %v1777_v50  ;;  %v1779_v54 = vpop.f32.mrb[14].mxu1  ;;  %v1376_v55 = vpop.f32.mrb[23].mxu0 }
 0x1a8   : > { %v1876_v35 = vmax.f32 %v1344_v0, %v1779_v54  ;;  %v1781_v56 = vpop.f32.mrb[15].mxu1 }
 0x1a9   : > { %v1877_v4 = vmax.f32 %v1346_v3, %v1781_v56  ;;  %v6264_v56 = vmov 0.0  }
 0x1aa   : > { %v1902_v34 = vpack.c.bf16 %v1876_v35, %v1874_v48  ;;  %647 = vst.msk [vmem:[#allocation2] sm:$0x1] %vm646_vm3, %v6264_v56  ;;  %648 = vst.msk [vmem:[#allocation3] sm:$0x1] %vm646_vm3, %v6264_v56 }
 0x1ab   : > { %v1903_v6 = vpack.c.bf16 %v1877_v4, %v1875_v51  ;;  %v6146_v4 = vld [vmem:[%s7776_s6 + $0xa0] ss:$8 sps:$4 sm:$0xff]  }
 0x1ac   : > { %v1380_v8 = vpop.f32.mrb[24].mxu0 }
 0x1ad   : > { %v1785_v12 = vpop.f32.mrb[16].mxu1  ;;  %5263 = vmatprep.mubr.msk.bf16.mxu0 %vm2026_vm2, %v1903_v6  ;;  %5313 = vmatprep.mubr.msk.bf16.mxu1 %vm2026_vm2, %v1903_v6  ;;  %v1382_v22 = vpop.f32.mrb[25].mxu0  ;;  %v6149_v6 = vld [vmem:[%s7776_s6 + $0xb0] ss:$8 sps:$4 sm:$0xff]  }
 0x1ae   : > { %v1878_v16 = vmax.f32 %v6962_v5, %v1785_v12  ;;  %v1787_v32 = vpop.f32.mrb[17].mxu1  ;;  %2100 = vmatmul.mubr.bf16.gmra.mrb[40].mxu0 %v1902_v34  ;;  %2310 = vmatmul.mubr.bf16.gmra.mrb[44].mxu1 %v1902_v34  ;;  %v1384_v52 = vpop.f32.mrb[26].mxu0  ;;  %v6151_v34 = vld [vmem:[%s7776_s6 + $0xb4] ss:$8 sps:$4 sm:$0xff]   ;;  %v6152_v12 = vld [vmem:[%s7776_s6 + $0xc0] ss:$8 sps:$4 sm:$0xff]  }
 0x1af   : > { %v1879_v42 = vmax.f32 %v6964_v11, %v1787_v32  ;;  %v1789_v57 = vpop.f32.mrb[18].mxu1  ;;  %v1386_v59 = vpop.f32.mrb[27].mxu0  ;;  %v6160_v32 = vld [vmem:[%s7776_s6 + $0x4] ss:$8 sps:$4 sm:$0xff]  }
 0x1b0   : > { %v1880_v58 = vmax.f32 %v6966_v17, %v1789_v57  ;;  %v1791_v60 = vpop.f32.mrb[19].mxu1 }
 0x1b1   : > { %v1881_v61 = vmax.f32 %v6968_v21, %v1791_v60 }
 0x1b2   : > { %v1904_v62 = vpack.c.bf16 %v1880_v58, %v1878_v16  ;;  %v6157_v16 = vld [vmem:[%s7776_s6 + $0xd4] ss:$8 sps:$4 sm:$0xff]  }
 0x1b3   : > { %v1905_v63 = vpack.c.bf16 %v1881_v61, %v1879_v42  ;;  %v2459_v42 = vlaneseq }
 0x1b5   : > { %v1795_v0 = vpop.f32.mrb[20].mxu1  ;;  %5264 = vmatprep.mubr.msk.bf16.mxu0 %vm2026_vm2, %v1905_v63  ;;  %5314 = vmatprep.mubr.msk.bf16.mxu1 %vm2026_vm2, %v1905_v63 }
 0x1b6   : > { %v1882_v3 = vmax.f32 %v6973_v29, %v1795_v0  ;;  %v1797_v5 = vpop.f32.mrb[21].mxu1  ;;  %2108 = vmatmul.mubr.bf16.gmra.mrb[44].mxu0 %v1904_v62  ;;  %2318 = vmatmul.mubr.bf16.gmra.mrb[48].mxu1 %v1904_v62 }
 0x1b7   : > { %v1883_v7 = vmax.f32 %v6977_v33, %v1797_v5  ;;  %v1799_v9 = vpop.f32.mrb[22].mxu1 }
 0x1b8   : > { %v1884_v11 = vmax.f32 %v1364_v37, %v1799_v9  ;;  %v1801_v13 = vpop.f32.mrb[23].mxu1 }
 0x1b9   : > { %v1885_v15 = vmax.f32 %v1366_v40, %v1801_v13  ;;  %v7063_v13 = vld [vmem:[%s7802_s4] ss:$0 sm:$0xff]  ;;  %s6267_s4 = smov 8  }
 0x1ba   : > { %v1906_v17 = vpack.c.bf16 %v1884_v11, %v1882_v3 }
 0x1bb   : > { %v1907_v19 = vpack.c.bf16 %v1885_v15, %v1883_v7 }
 0x1bd   : > { %v1805_v20 = vpop.f32.mrb[24].mxu1  ;;  %5265 = vmatprep.mubr.msk.bf16.mxu0 %vm2026_vm2, %v1907_v19  ;;  %5315 = vmatprep.mubr.msk.bf16.mxu1 %vm2026_vm2, %v1907_v19  ;;  %v7069_v19 = vld [vmem:[%s7775_s5] ss:$0 sm:$0xff] }
 0x1be   : > { %v1886_v21 = vmax.f32 %v6979_v46, %v1805_v20  ;;  %v1807_v23 = vpop.f32.mrb[25].mxu1  ;;  %2116 = vmatmul.mubr.bf16.gmra.mrb[48].mxu0 %v1906_v17  ;;  %2326 = vmatmul.mubr.bf16.gmra.mrb[52].mxu1 %v1906_v17 }
 0x1bf   : > { %v1887_v25 = vmax.f32 %v1372_v49, %v1807_v23  ;;  %v1809_v26 = vpop.f32.mrb[26].mxu1 }
 0x1c0   : > { %v1888_v27 = vmax.f32 %v1374_v53, %v1809_v26  ;;  %v1811_v28 = vpop.f32.mrb[27].mxu1 }
 0x1c1   : > { %v1889_v29 = vmax.f32 %v1376_v55, %v1811_v28  ;;  %v6148_v55 = vld [vmem:[%s7776_s6 + $0xa4] ss:$8 sps:$4 sm:$0xff]  }
 0x1c2   : > { %v1908_v30 = vpack.c.bf16 %v1888_v27, %v1886_v21 }
 0x1c3   : > { %v1909_v31 = vpack.c.bf16 %v1889_v29, %v1887_v25 }
 0x1c5   : > { %v1815_v33 = vpop.f32.mrb[28].mxu1  ;;  %5266 = vmatprep.mubr.msk.bf16.mxu0 %vm2026_vm2, %v1909_v31  ;;  %5316 = vmatprep.mubr.msk.bf16.mxu1 %vm2026_vm2, %v1909_v31 }
 0x1c6   : > { %v1890_v1 = vmax.f32 %v1380_v8, %v1815_v33  ;;  %v1817_v36 = vpop.f32.mrb[29].mxu1  ;;  %2124 = vmatmul.mubr.bf16.gmra.mrb[52].mxu0 %v1908_v30  ;;  %2334 = vmatmul.mubr.bf16.gmra.mrb[56].mxu1 %v1908_v30  ;;  %v6154_v8 = vld [vmem:[%s7776_s6 + $0xc4] ss:$8 sps:$4 sm:$0xff]  }
 0x1c7   : > { %v1891_v37 = vmax.f32 %v1382_v22, %v1817_v36  ;;  %v1819_v38 = vpop.f32.mrb[30].mxu1  ;;  %v6155_v22 = vld [vmem:[%s7776_s6 + $0xd0] ss:$8 sps:$4 sm:$0xff]  }
 0x1c8   : > { %v1892_v39 = vmax.f32 %v1384_v52, %v1819_v38  ;;  %v1821_v40 = vpop.f32.mrb[31].mxu1  ;;  %v7049_v52 = vshrl.u32 %v2459_v42, 7 }
 0x1c9   : > { %v1893_v41 = vmax.f32 %v1386_v59, %v1821_v40  ;;  %v7054_v59 = vld [vmem:[%s7801_s26] ss:$0 sm:$0xff] }
 0x1ca   : > { %v1910_v43 = vpack.c.bf16 %v1892_v39, %v1890_v1  ;;  %v7057_v3 = vadd.s32 8, %v7049_v52  ;;  %v7076_v36 = vadd.s32 24, %v7049_v52 }
 0x1cb   : > { %v1911_v44 = vpack.c.bf16 %v1893_v41, %v1891_v37 }
 0x1cc   : > { %v2487_v20 = vand.u32 15, %v7057_v3 }
 0x1cd   : > { %v1825_v45 = vpop.f32.mrb[32].mxu1  ;;  %5267 = vmatprep.mubr.msk.bf16.mxu0 %vm2026_vm2, %v1911_v44  ;;  %5317 = vmatprep.mubr.msk.bf16.mxu1 %vm2026_vm2, %v1911_v44 }
 0x1ce   : > { %v1894_v46 = vmax.f32 %v6954_v10, %v1825_v45  ;;  %v1827_v47 = vpop.f32.mrb[33].mxu1  ;;  %2132 = vmatmul.mubr.bf16.gmra.mrb[56].mxu0 %v1910_v43  ;;  %2342 = vmatmul.mubr.bf16.gmra.mrb[60].mxu1 %v1910_v43  ;;  %v6142_v10 = vld [vmem:[%s7776_s6 + $0x84] ss:$8 sps:$4 sm:$0xff]   ;;  %vm2669_vm5 = vcmp.lt.s32.totalorder %v2487_v20, 14 }
 0x1cf   : > { %v1895_v48 = vmax.f32 %v6956_v14, %v1827_v47  ;;  %v1829_v49 = vpop.f32.mrb[34].mxu1  ;;  %v6140_v14 = vld [vmem:[%s7776_s6 + $0x80] ss:$8 sps:$4 sm:$0xff]   ;;  %2869 = vmatprep.subr.bf16.mxu0 %v6142_v10  ;;  %3303 = vmatprep.subr.bf16.mxu1 %v6142_v10 }
 0x1d0   : > { %v1896_v50 = vmax.f32 %v6958_v18, %v1829_v49  ;;  %v1831_v51 = vpop.f32.mrb[35].mxu1  ;;  %2870 = vmatpush1.bf16.msra.mxu0 %v6140_v14  ;;  %3304 = vmatpush1.bf16.msra.mxu1 %v6140_v14  ;;  %v6145_v18 = vld [vmem:[%s7776_s6 + $0x94] ss:$8 sps:$4 sm:$0xff]  }
 0x1d1   : > { %v1897_v53 = vmax.f32 %v6960_v24, %v1831_v51  ;;  %v6143_v24 = vld [vmem:[%s7776_s6 + $0x90] ss:$8 sps:$4 sm:$0xff]   ;;  %2871 = vmatprep.subr.bf16.mxu0 %v6145_v18  ;;  %3305 = vmatprep.subr.bf16.mxu1 %v6145_v18 }
 0x1d2   : > { %v1912_v54 = vpack.c.bf16 %v1896_v50, %v1894_v46  ;;  %v2501_v46 = vand.u32 15, %v7076_v36 }
 0x1d3   : > { %v1913_v35 = vpack.c.bf16 %v1897_v53, %v1895_v48 }
 0x1d4   : > { %2872 = vmatpush1.bf16.msra.mxu0 %v6143_v24  ;;  %3306 = vmatpush1.bf16.msra.mxu1 %v6143_v24  ;;  %vm2671_vm6 = vcmp.lt.s32.totalorder %v2501_v46, 14  ;;  %v7088_v24 = vadd.s32 40, %v7049_v52 }
 0x1d5   : > { %5268 = vmatprep.mubr.msk.bf16.mxu0 %vm2026_vm2, %v1913_v35  ;;  %5318 = vmatprep.mubr.msk.bf16.mxu1 %vm2026_vm2, %v1913_v35 }
 0x1d6   : > { %2140 = vmatmul.mubr.bf16.gmra.mrb[60].mxu0 %v1912_v54  ;;  %2350 = vmatmul.mubr.bf16.gmra.mrb[64].mxu1 %v1912_v54 }
 0x1d7   : > { %2899 = vmatprep.mubr.bf16.mxu0 %v6263_v2  ;;  %3333 = vmatprep.mubr.bf16.mxu1 %v6263_v2 }
 0x1d8   : > { %2873 = vmatprep.subr.bf16.mxu0 %v6148_v55  ;;  %3307 = vmatprep.subr.bf16.mxu1 %v6148_v55 }
 0x1d9   : > { %2874 = vmatpush1.bf16.msra.mxu0 %v6146_v4  ;;  %3308 = vmatpush1.bf16.msra.mxu1 %v6146_v4 }
 0x1da   : > { %2875 = vmatprep.subr.bf16.mxu0 %v6151_v34  ;;  %3309 = vmatprep.subr.bf16.mxu1 %v6151_v34 }
 0x1dd   : > { %2876 = vmatpush1.bf16.msra.mxu0 %v6149_v6  ;;  %3310 = vmatpush1.bf16.msra.mxu1 %v6149_v6 }
 0x1de   : > { %2877 = vmatprep.subr.bf16.mxu0 %v6154_v8  ;;  %3311 = vmatprep.subr.bf16.mxu1 %v6154_v8 }
 0x1e1   : > { %2878 = vmatpush1.bf16.msra.mxu0 %v6152_v12  ;;  %3312 = vmatpush1.bf16.msra.mxu1 %v6152_v12 }
 0x1e2   : > { %2879 = vmatprep.subr.bf16.mxu0 %v6157_v16  ;;  %3313 = vmatprep.subr.bf16.mxu1 %v6157_v16 }
 0x1e5   : > { %2880 = vmatpush1.bf16.msra.mxu0 %v6155_v22  ;;  %3314 = vmatpush1.bf16.msra.mxu1 %v6155_v22 }
 0x1e6   : > { %3022 = vmatprep.subr.bf16.mxu0 %v6160_v32  ;;  %3374 = vmatprep.subr.bf16.mxu1 %v6160_v32  ;;  %v2515_v32 = vand.u32 15, %v7088_v24 }
 0x1e8   : > { %vm7099_vm7 = vcmp.lt.s32.totalorder %v2515_v32, 14  ;;  %v6164_v32 = vld [vmem:[%s7776_s6 + $0x20] ss:$8 sps:$4 sm:$0xff]  }
 0x271   : > { %v2085_v57 = vpop.f32.mrb[32].mxu0  ;;  %v2295_v58 = vpop.f32.mrb[36].mxu1 }
 0x272   : > { %v2358_v60 = vmax.f32 %v2085_v57, %v2295_v58  ;;  %v2087_v61 = vpop.f32.mrb[33].mxu0  ;;  %v2297_v62 = vpop.f32.mrb[37].mxu1 }
 0x273   : > { %v2088_v63 = vpop.f32.mrb[34].mxu0  ;;  %v2298_v0 = vpop.f32.mrb[38].mxu1 }
 0x274   : > { %v2381_v5 = vadd.f32 %v7054_v59, %v2358_v60  ;;  %v2359_v7 = vmax.f32 %v2088_v63, %v2298_v0  ;;  %v2090_v9 = vpop.f32.mrb[35].mxu0  ;;  %v2300_v11 = vpop.f32.mrb[39].mxu1 }
 0x276   : > { %v2397_v15 = vmax.f32 %v2381_v5, 0.0  ;;  %v2382_v17 = vadd.f32 %v7054_v59, %v2359_v7 }
 0x278   : > { %v2420_v21 = vmul.f32 %v7063_v13, %v2397_v15  ;;  %v2398_v23 = vmax.f32 %v2382_v17, 0.0  ;;  %v7104_v15 = vadd.s32 56, %v7049_v52 }
 0x279   : > { %v2093_v25 = vpop.f32.mrb[36].mxu0  ;;  %v2303_v26 = vpop.f32.mrb[40].mxu1 }
 0x27a   : > { %v2443_v27 = vadd.f32 %v7069_v19, %v2420_v21  ;;  %v2421_v28 = vmul.f32 %v7063_v13, %v2398_v23  ;;  %v2360_v29 = vmax.f32 %v2093_v25, %v2303_v26  ;;  %v2095_v30 = vpop.f32.mrb[37].mxu0  ;;  %v2305_v31 = vpop.f32.mrb[41].mxu1 }
 0x27b   : > { %v2096_v33 = vpop.f32.mrb[38].mxu0  ;;  %v2306_v1 = vpop.f32.mrb[42].mxu1 }
 0x27c   : > { %2701 = vst.msk [vmem:[#allocation2 + $0x1] sm:$0xff] %vm2700_vm4, %v2443_v27  ;;  %v2444_v37 = vadd.f32 %v7069_v19, %v2421_v28  ;;  %v2383_v38 = vadd.f32 %v7054_v59, %v2360_v29  ;;  %v2361_v39 = vmax.f32 %v2096_v33, %v2306_v1  ;;  %v2098_v40 = vpop.f32.mrb[39].mxu0  ;;  %v2308_v41 = vpop.f32.mrb[43].mxu1  ;;  %v2529_v1 = vand.u32 15, %v7104_v15 }
 0x27e   : > { %v2685_v43 = vsel %vm2669_vm5, %v2444_v37, 0.0  ;;  %v2399_v44 = vmax.f32 %v2383_v38, 0.0  ;;  %v2384_v45 = vadd.f32 %v7054_v59, %v2361_v39  ;;  %v6158_v39 = vld [vmem:[%s7776_s6] ss:$8 sps:$4 sm:$0xff]   ;;  %vm7133_vm8 = vcmp.lt.s32.totalorder %v2529_v1, 14 }
 0x27f   : > { %2702 = vst.msk [vmem:[#allocation2 + $0x9] sm:$0xff] %vm2700_vm4, %v2685_v43  ;;  %v6163_v43 = vld [vmem:[%s7776_s6 + $0x14] ss:$8 sps:$4 sm:$0xff]  }
 0x280   : > { %v2422_v47 = vmul.f32 %v7063_v13, %v2399_v44  ;;  %v2400_v48 = vmax.f32 %v2384_v45, 0.0 }
 0x281   : > { %v2101_v49 = vpop.f32.mrb[40].mxu0  ;;  %v2311_v50 = vpop.f32.mrb[44].mxu1 }
 0x282   : > { %v2445_v51 = vadd.f32 %v7069_v19, %v2422_v47  ;;  %v2423_v53 = vmul.f32 %v7063_v13, %v2400_v48  ;;  %v2362_v54 = vmax.f32 %v2101_v49, %v2311_v50  ;;  %v2103_v35 = vpop.f32.mrb[41].mxu0  ;;  %v2313_v10 = vpop.f32.mrb[45].mxu1 }
 0x283   : > { %v2104_v14 = vpop.f32.mrb[42].mxu0  ;;  %v2314_v18 = vpop.f32.mrb[46].mxu1  ;;  %v2469_v35 = vadd.s32 72, %v7049_v52  ;;  %v6161_v10 = vld [vmem:[%s7776_s6 + $0x10] ss:$8 sps:$4 sm:$0xff]  }
 0x284   : > { %2703 = vst.msk [vmem:[#allocation2 + $0x11] sm:$0xff] %vm2700_vm4, %v2445_v51  ;;  %v2446_v55 = vadd.f32 %v7069_v19, %v2423_v53  ;;  %v2385_v4 = vadd.f32 %v7054_v59, %v2362_v54  ;;  %v2363_v34 = vmax.f32 %v2104_v14, %v2314_v18  ;;  %v2106_v6 = vpop.f32.mrb[43].mxu0  ;;  %v2316_v8 = vpop.f32.mrb[47].mxu1 }
 0x285   : > { %v6166_v6 = vld [vmem:[%s7776_s6 + $0x24] ss:$8 sps:$4 sm:$0xff]  }
 0x286   : > { %v2687_v12 = vsel %vm2671_vm6, %v2446_v55, 0.0  ;;  %v2401_v16 = vmax.f32 %v2385_v4, 0.0  ;;  %v2386_v22 = vadd.f32 %v7054_v59, %v2363_v34  ;;  %v2751_v26 = vld [vmem:[#allocation2 + $0x1] ss:$2 sm:$0xff]  ;;  %v3096_v27 = vld [vmem:[#allocation2 + $0x2] ss:$2 sm:$0xff] }
 0x287   : > { %2704 = vst.msk [vmem:[#allocation2 + $0x19] sm:$0xff] %vm2700_vm4, %v2687_v12 }
 0x288   : > { %v2424_v42 = vmul.f32 %v7063_v13, %v2401_v16  ;;  %v2402_v57 = vmax.f32 %v2386_v22, 0.0  ;;  %v2543_v22 = vand.u32 15, %v2469_v35 }
 0x289   : > { %v2109_v58 = vpop.f32.mrb[44].mxu0  ;;  %v2319_v60 = vpop.f32.mrb[48].mxu1 }
 0x28a   : > { %v2447_v61 = vadd.f32 %v7069_v19, %v2424_v42  ;;  %v2425_v62 = vmul.f32 %v7063_v13, %v2402_v57  ;;  %v2364_v63 = vmax.f32 %v2109_v58, %v2319_v60  ;;  %v2111_v0 = vpop.f32.mrb[45].mxu0  ;;  %v2321_v5 = vpop.f32.mrb[49].mxu1  ;;  %v6169_v58 = vld [vmem:[%s7776_s6 + $0x34] ss:$8 sps:$4 sm:$0xff]   ;;  %vm7160_vm9 = vcmp.lt.s32.totalorder %v2543_v22, 14 }
 0x28b   : > { %v2112_v9 = vpop.f32.mrb[46].mxu0  ;;  %v2322_v11 = vpop.f32.mrb[50].mxu1 }
 0x28c   : > { %2705 = vst.msk [vmem:[#allocation2 + $0x21] sm:$0xff] %vm2700_vm4, %v2447_v61  ;;  %v2448_v17 = vadd.f32 %v7069_v19, %v2425_v62  ;;  %v2387_v20 = vadd.f32 %v7054_v59, %v2364_v63  ;;  %v2365_v21 = vmax.f32 %v2112_v9, %v2322_v11  ;;  %v2114_v23 = vpop.f32.mrb[47].mxu0  ;;  %v2324_v25 = vpop.f32.mrb[51].mxu1 }
 0x28e   : > { %v2689_v28 = vsel %vm7099_vm7, %v2448_v17, 0.0  ;;  %v2403_v29 = vmax.f32 %v2387_v20, 0.0  ;;  %v2388_v30 = vadd.f32 %v7054_v59, %v2365_v21  ;;  %v2753_v31 = vld [vmem:[#allocation2 + $0x11] ss:$2 sm:$0xff]  ;;  %v3098_v33 = vld [vmem:[#allocation2 + $0x12] ss:$2 sm:$0xff] }
 0x28f   : > { %2706 = vst.msk [vmem:[#allocation2 + $0x29] sm:$0xff] %vm2700_vm4, %v2689_v28  ;;  %v7114_v37 = vpack.c.bf16 %v2753_v31, %v2751_v26  ;;  %v7116_v38 = vpack.c.bf16 %v3098_v33, %v3096_v27  ;;  %v2471_v20 = vadd.s32 88, %v7049_v52  ;;  %v6167_v21 = vld [vmem:[%s7776_s6 + $0x30] ss:$8 sps:$4 sm:$0xff]   ;;  %vm4872_vm7 = vcmask 1041409  }
 0x290   : > { %v2426_v40 = vmul.f32 %v7063_v13, %v2403_v29  ;;  %v2404_v41 = vmax.f32 %v2388_v30, 0.0  ;;  %v6172_v29 = vld [vmem:[%s7776_s6 + $0x44] ss:$8 sps:$4 sm:$0xff]  }
 0x291   : > { %v2117_v44 = vpop.f32.mrb[48].mxu0  ;;  %v2327_v45 = vpop.f32.mrb[52].mxu1  ;;  %5350 = vmatmul.mubr.msk.bf16.vlgmr.msra.gmra.mrb[64].mxu0 %vm2700_vm4, %v7114_v37  ;;  %5404 = vmatmul.mubr.msk.bf16.vlgmr.msra.gmra.mrb[68].mxu1 %vm2700_vm4, %v7116_v38 }
 0x292   : > { %v2449_v46 = vadd.f32 %v7069_v19, %v2426_v40  ;;  %v2427_v47 = vmul.f32 %v7063_v13, %v2404_v41  ;;  %v2366_v48 = vmax.f32 %v2117_v44, %v2327_v45  ;;  %v2119_v49 = vpop.f32.mrb[49].mxu0  ;;  %v2329_v50 = vpop.f32.mrb[53].mxu1  ;;  %2909 = vmatprep.mubr.bf16.mxu0 %v6263_v2  ;;  %3343 = vmatprep.mubr.bf16.mxu1 %v6263_v2 }
 0x293   : > { %v2120_v53 = vpop.f32.mrb[50].mxu0  ;;  %v2330_v54 = vpop.f32.mrb[54].mxu1  ;;  %3023 = vmatpush1.bf16.msra.mxu0 %v6158_v39  ;;  %3375 = vmatpush1.bf16.msra.mxu1 %v6158_v39  ;;  %v6175_v49 = vld [vmem:[%s7776_s6 + $0x54] ss:$8 sps:$4 sm:$0xff]  }
 0x294   : > { %2707 = vst.msk [vmem:[#allocation2 + $0x31] sm:$0xff] %vm2700_vm4, %v2449_v46  ;;  %v2450_v14 = vadd.f32 %v7069_v19, %v2427_v47  ;;  %v2389_v18 = vadd.f32 %v7054_v59, %v2366_v48  ;;  %v2367_v55 = vmax.f32 %v2120_v53, %v2330_v54  ;;  %v2122_v4 = vpop.f32.mrb[51].mxu0  ;;  %v2332_v34 = vpop.f32.mrb[55].mxu1  ;;  %3024 = vmatprep.subr.bf16.mxu0 %v6163_v43  ;;  %v6170_v46 = vld [vmem:[%s7776_s6 + $0x40] ss:$8 sps:$4 sm:$0xff]  }
 0x295   : > { %3376 = vmatprep.subr.bf16.mxu1 %v6163_v43  ;;  %v2557_v43 = vand.u32 15, %v2471_v20  ;;  %v2473_v34 = vadd.s32 104, %v7049_v52 }
 0x296   : > { %v2691_v8 = vsel %vm7133_vm8, %v2450_v14, 0.0  ;;  %v2405_v12 = vmax.f32 %v2389_v18, 0.0  ;;  %v2390_v16 = vadd.f32 %v7054_v59, %v2367_v55  ;;  %v2755_v30 = vld [vmem:[#allocation2 + $0x21] ss:$2 sm:$0xff]  ;;  %v3100_v31 = vld [vmem:[#allocation2 + $0x22] ss:$2 sm:$0xff] }
 0x297   : > { %2708 = vst.msk [vmem:[#allocation2 + $0x39] sm:$0xff] %vm2700_vm4, %v2691_v8  ;;  %3025 = vmatpush1.bf16.msra.mxu0 %v6161_v10  ;;  %3377 = vmatpush1.bf16.msra.mxu1 %v6161_v10  ;;  %vm7197_vm10 = vcmp.lt.s32.totalorder %v2557_v43, 14  ;;  %vm4874_vm8 = vcmask 1042434  }
 0x298   : > { %v2428_v42 = vmul.f32 %v7063_v13, %v2405_v12  ;;  %v2406_v57 = vmax.f32 %v2390_v16, 0.0  ;;  %3026 = vmatprep.subr.bf16.mxu0 %v6166_v6  ;;  %3378 = vmatprep.subr.bf16.mxu1 %v6166_v6  ;;  %v6173_v6 = vld [vmem:[%s7776_s6 + $0x50] ss:$8 sps:$4 sm:$0xff]  }
 0x299   : > { %v2125_v60 = vpop.f32.mrb[52].mxu0  ;;  %v2335_v61 = vpop.f32.mrb[56].mxu1 }
 0x29a   : > { %v2451_v62 = vadd.f32 %v7069_v19, %v2428_v42  ;;  %v2429_v63 = vmul.f32 %v7063_v13, %v2406_v57  ;;  %v2368_v0 = vmax.f32 %v2125_v60, %v2335_v61  ;;  %v2127_v5 = vpop.f32.mrb[53].mxu0  ;;  %v2337_v7 = vpop.f32.mrb[57].mxu1  ;;  %v6178_v42 = vld [vmem:[%s7776_s6 + $0x64] ss:$8 sps:$4 sm:$0xff]   ;;  %v2571_v61 = vand.u32 15, %v2473_v34 }
 0x29b   : > { %v2128_v11 = vpop.f32.mrb[54].mxu0  ;;  %v2338_v17 = vpop.f32.mrb[58].mxu1  ;;  %3027 = vmatpush1.bf16.msra.mxu0 %v6164_v32  ;;  %3379 = vmatpush1.bf16.msra.mxu1 %v6164_v32  ;;  %v6181_v5 = vld [vmem:[%s7776_s6 + $0xe4] ss:$8 sps:$4 sm:$0xff]  }
 0x29c   : > { %2709 = vst.msk [vmem:[#allocation2 + $0x41] sm:$0xff] %vm2700_vm4, %v2451_v62  ;;  %v2452_v23 = vadd.f32 %v7069_v19, %v2429_v63  ;;  %v2391_v25 = vadd.f32 %v7054_v59, %v2368_v0  ;;  %v2369_v26 = vmax.f32 %v2128_v11, %v2338_v17  ;;  %v2130_v27 = vpop.f32.mrb[55].mxu0  ;;  %v2340_v28 = vpop.f32.mrb[59].mxu1  ;;  %3028 = vmatprep.subr.bf16.mxu0 %v6169_v58  ;;  %v6176_v62 = vld [vmem:[%s7776_s6 + $0x60] ss:$8 sps:$4 sm:$0xff]   ;;  %vm7224_vm11 = vcmp.lt.s32.totalorder %v2571_v61, 14 }
 0x29d   : > { %3380 = vmatprep.subr.bf16.mxu1 %v6169_v58  ;;  %v2475_v28 = vadd.s32 120, %v7049_v52  ;;  %v6190_v61 = vld [vmem:[%s7776_s6 + $0x114] ss:$8 sps:$4 sm:$0xff]  }
 0x29e   : > { %v2693_v33 = vsel %vm7160_vm9, %v2452_v23, 0.0  ;;  %v2407_v1 = vmax.f32 %v2391_v25, 0.0  ;;  %v2392_v39 = vadd.f32 %v7054_v59, %v2369_v26  ;;  %v2757_v40 = vld [vmem:[#allocation2 + $0x31] ss:$2 sm:$0xff]  ;;  %v3102_v41 = vld [vmem:[#allocation2 + $0x32] ss:$2 sm:$0xff] }
 0x29f   : > { %2710 = vst.msk [vmem:[#allocation2 + $0x49] sm:$0xff] %vm2700_vm4, %v2693_v33  ;;  %v7178_v44 = vpack.c.bf16 %v2757_v40, %v2755_v30  ;;  %v7180_v45 = vpack.c.bf16 %v3102_v41, %v3100_v31  ;;  %3029 = vmatpush1.bf16.msra.mxu0 %v6167_v21  ;;  %3381 = vmatpush1.bf16.msra.mxu1 %v6167_v21  ;;  %vm4876_vm9 = vcmask 1043459  }
 0x2a0   : > { %v2430_v47 = vmul.f32 %v7063_v13, %v2407_v1  ;;  %v2408_v48 = vmax.f32 %v2392_v39, 0.0  ;;  %3030 = vmatprep.subr.bf16.mxu0 %v6172_v29  ;;  %3382 = vmatprep.subr.bf16.mxu1 %v6172_v29 }
 0x2a1   : > { %v2133_v50 = vpop.f32.mrb[56].mxu0  ;;  %v2343_v51 = vpop.f32.mrb[60].mxu1  ;;  %5351 = vmatmul.mubr.msk.bf16.gmra.mrb[68].mxu0 %vm2700_vm4, %v7178_v44  ;;  %5405 = vmatmul.mubr.msk.bf16.gmra.mrb[72].mxu1 %vm2700_vm4, %v7180_v45 }
 0x2a2   : > { %v2453_v53 = vadd.f32 %v7069_v19, %v2430_v47  ;;  %v2431_v54 = vmul.f32 %v7063_v13, %v2408_v48  ;;  %v2370_v35 = vmax.f32 %v2133_v50, %v2343_v51  ;;  %v2135_v10 = vpop.f32.mrb[57].mxu0  ;;  %v2345_v14 = vpop.f32.mrb[61].mxu1  ;;  %2919 = vmatprep.mubr.bf16.mxu0 %v6263_v2  ;;  %3353 = vmatprep.mubr.bf16.mxu1 %v6263_v2 }
 0x2a3   : > { %v2136_v55 = vpop.f32.mrb[58].mxu0  ;;  %v2346_v4 = vpop.f32.mrb[62].mxu1  ;;  %3031 = vmatpush1.bf16.msra.mxu0 %v6170_v46  ;;  %3383 = vmatpush1.bf16.msra.mxu1 %v6170_v46 }
 0x2a4   : > { %2711 = vst.msk [vmem:[#allocation2 + $0x51] sm:$0xff] %vm2700_vm4, %v2453_v53  ;;  %v2454_v8 = vadd.f32 %v7069_v19, %v2431_v54  ;;  %v2393_v12 = vadd.f32 %v7054_v59, %v2370_v35  ;;  %v2371_v16 = vmax.f32 %v2136_v55, %v2346_v4  ;;  %v2138_v22 = vpop.f32.mrb[59].mxu0  ;;  %v2348_v32 = vpop.f32.mrb[63].mxu1  ;;  %3032 = vmatprep.subr.bf16.mxu0 %v6175_v49 }
 0x2a5   : > { %3384 = vmatprep.subr.bf16.mxu1 %v6175_v49  ;;  %v2585_v49 = vand.u32 15, %v2475_v28  ;;  %v6184_v22 = vld [vmem:[%s7776_s6 + $0xf4] ss:$8 sps:$4 sm:$0xff]   ;;  %v6182_v32 = vld [vmem:[%s7776_s6 + $0xf0] ss:$8 sps:$4 sm:$0xff]  }
 0x2a6   : > { %v2695_v57 = vsel %vm7197_vm10, %v2454_v8, 0.0  ;;  %v2409_v58 = vmax.f32 %v2393_v12, 0.0  ;;  %v2394_v60 = vadd.f32 %v7054_v59, %v2371_v16  ;;  %v2759_v39 = vld [vmem:[#allocation2 + $0x41] ss:$2 sm:$0xff]  ;;  %v3104_v40 = vld [vmem:[#allocation2 + $0x42] ss:$2 sm:$0xff] }
 0x2a7   : > { %2712 = vst.msk [vmem:[#allocation2 + $0x59] sm:$0xff] %vm2700_vm4, %v2695_v57  ;;  %3033 = vmatpush1.bf16.msra.mxu0 %v6173_v6  ;;  %3385 = vmatpush1.bf16.msra.mxu1 %v6173_v6  ;;  %vm2683_vm12 = vcmp.lt.s32.totalorder %v2585_v49, 14  ;;  %v6179_v12 = vld [vmem:[%s7776_s6 + $0xe0] ss:$8 sps:$4 sm:$0xff]   ;;  %v2723_v57 = vld [vmem:[#allocation2 + $0x30] ss:$2 sm:$0xff] }
 0x2a8   : > { %v2432_v63 = vmul.f32 %v7063_v13, %v2409_v58  ;;  %v2410_v0 = vmax.f32 %v2394_v60, 0.0  ;;  %3034 = vmatprep.subr.bf16.mxu0 %v6178_v42  ;;  %3386 = vmatprep.subr.bf16.mxu1 %v6178_v42  ;;  %v6187_v42 = vld [vmem:[%s7776_s6 + $0x104] ss:$8 sps:$4 sm:$0xff]   ;;  %v6185_v58 = vld [vmem:[%s7776_s6 + $0x100] ss:$8 sps:$4 sm:$0xff]   ;;  %vm4878_vm10 = vcmask 1044484  }
 0x2a9   : > { %v2141_v7 = vpop.f32.mrb[60].mxu0  ;;  %v2351_v9 = vpop.f32.mrb[64].mxu1  ;;  %v6208_v49 = vld [vmem:[%s7777_s7 + $0x20] sm:$0xff]  }
 0x2aa   : > { %v2455_v11 = vadd.f32 %v7069_v19, %v2432_v63  ;;  %v2433_v17 = vmul.f32 %v7063_v13, %v2410_v0  ;;  %v2372_v20 = vmax.f32 %v2141_v7, %v2351_v9  ;;  %v2143_v21 = vpop.f32.mrb[61].mxu0  ;;  %v2353_v23 = vpop.f32.mrb[65].mxu1  ;;  %v6193_v63 = vld [vmem:[%s7776_s6 + $0x124] ss:$8 sps:$4 sm:$0xff]   ;;  %v6196_v9 = vld [vmem:[%s7776_s6 + $0x134] ss:$8 sps:$4 sm:$0xff]  }
 0x2ab   : > { %v2144_v26 = vpop.f32.mrb[62].mxu0  ;;  %v2354_v27 = vpop.f32.mrb[66].mxu1  ;;  %3035 = vmatpush1.bf16.msra.mxu0 %v6176_v62  ;;  %3387 = vmatpush1.bf16.msra.mxu1 %v6176_v62  ;;  %v6188_v62 = vld [vmem:[%s7776_s6 + $0x110] ss:$8 sps:$4 sm:$0xff]   ;;  %v6197_v23 = vld [vmem:[%s7776_s6 + $0x140] ss:$8 sps:$4 sm:$0xff]  }
 0x2ac   : > { %2713 = vst.msk [vmem:[#allocation2 + $0x61] sm:$0xff] %vm2700_vm4, %v2455_v11  ;;  %v2456_v29 = vadd.f32 %v7069_v19, %v2433_v17  ;;  %v2395_v30 = vadd.f32 %v7054_v59, %v2372_v20  ;;  %v2373_v31 = vmax.f32 %v2144_v26, %v2354_v27  ;;  %v2146_v33 = vpop.f32.mrb[63].mxu0  ;;  %v2356_v1 = vpop.f32.mrb[67].mxu1  ;;  %3212 = vmatprep.subr.bf16.mxu0 %v6181_v5  ;;  %v6194_v11 = vld [vmem:[%s7776_s6 + $0x130] ss:$8 sps:$4 sm:$0xff]  }
 0x2ad   : > { %3479 = vmatprep.subr.bf16.mxu1 %v6181_v5  ;;  %v6191_v5 = vld [vmem:[%s7776_s6 + $0x120] ss:$8 sps:$4 sm:$0xff]   ;;  %v6199_v17 = vld [vmem:[%s7776_s6 + $0x144] ss:$8 sps:$4 sm:$0xff]   ;;  %v6203_v33 = vld [vmem:[%s7777_s7 + $0x78] sm:$0xff]  }
 0x2ae   : > { %v2697_v41 = vsel %vm7224_vm11, %v2456_v29, 0.0  ;;  %v2411_v43 = vmax.f32 %v2395_v30, 0.0  ;;  %v2396_v46 = vadd.f32 %v7054_v59, %v2373_v31  ;;  %v2761_v47 = vld [vmem:[#allocation2 + $0x51] ss:$2 sm:$0xff]  ;;  %v3106_v48 = vld [vmem:[#allocation2 + $0x52] ss:$2 sm:$0xff] }
 0x2af   : > { %2714 = vst.msk [vmem:[#allocation2 + $0x69] sm:$0xff] %vm2700_vm4, %v2697_v41  ;;  %v7236_v50 = vpack.c.bf16 %v2761_v47, %v2759_v39  ;;  %v7238_v51 = vpack.c.bf16 %v3106_v48, %v3104_v40  ;;  %v2727_v0 = vld [vmem:[#allocation2 + $0x50] ss:$2 sm:$0xff]  ;;  %v3450_v26 = vld [vmem:[#allocation2 + $0x13] ss:$2 sm:$0xff]  ;;  %v6202_v31 = vld [vmem:[%s7777_s7 + $0x8] sm:$0xff]  }
 0x2b0   : > { %v2434_v53 = vmul.f32 %v7063_v13, %v2411_v43  ;;  %v2412_v54 = vmax.f32 %v2396_v46, 0.0  ;;  %v3448_v27 = vld [vmem:[#allocation2 + $0x3] ss:$2 sm:$0xff]  ;;  %v3454_v1 = vld [vmem:[#allocation2 + $0x33] ss:$2 sm:$0xff]  ;;  %vm4880_vm11 = vcmask 1045509  }
 0x2b1   : > { %5352 = vmatmul.mubr.msk.bf16.gmra.mrb[72].mxu0 %vm2700_vm4, %v7236_v50  ;;  %5406 = vmatmul.mubr.msk.bf16.gmra.mrb[76].mxu1 %vm2700_vm4, %v7238_v51  ;;  %v3463_v28 = vpack.c.bf16 %v3450_v26, %v3448_v27  ;;  %v6200_v29 = vld [vmem:[%s7777_s7] sm:$0xff]   ;;  %v6201_v30 = vld [vmem:[%s7777_s7 + $0x70] sm:$0xff]   ;;  %v6206_v43 = vld [vmem:[%s7777_s7 + $0x18] sm:$0xff]  }
 0x2b2   : > { %v2457_v59 = vadd.f32 %v7069_v19, %v2434_v53  ;;  %v2435_v35 = vmul.f32 %v7063_v13, %v2412_v54  ;;  %2929 = vmatprep.mubr.bf16.mxu0 %v6263_v2  ;;  %3363 = vmatprep.mubr.bf16.mxu1 %v6263_v2  ;;  %v2719_v13 = vld [vmem:[#allocation2 + $0x10] ss:$2 sm:$0xff]  ;;  %v6205_v41 = vld [vmem:[%s7777_s7 + $0x80] sm:$0xff]   ;;  %v6207_v46 = vld [vmem:[%s7777_s7 + $0x88] sm:$0xff]  }
 0x2b3   : > { %v6204_v40 = vld [vmem:[%s7777_s7 + $0x10] sm:$0xff]   ;;  %v6210_v53 = vld [vmem:[%s7777_s7 + $0x28] sm:$0xff]   ;;  %v6211_v54 = vld [vmem:[%s7777_s7 + $0x98] sm:$0xff]  }
 0x2b4   : > { %2715 = vst.msk [vmem:[#allocation2 + $0x71] sm:$0xff] %vm2700_vm4, %v2457_v59  ;;  %v2458_v10 = vadd.f32 %v7069_v19, %v2435_v35  ;;  %v2717_v19 = vld [vmem:[#allocation2] ss:$2 sm:$0xff]  ;;  %v3458_v47 = vld [vmem:[#allocation2 + $0x53] ss:$2 sm:$0xff] }
 0x2b5   : > { %v2732_v16 = vpack.c.bf16 %v2719_v13, %v2717_v19  ;;  %v6220_v13 = vld [vmem:[%s7777_s7 + $0x50] sm:$0xff]   ;;  %v6221_v19 = vld [vmem:[%s7777_s7 + $0xc0] sm:$0xff]  }
 0x2b6   : > { %v2699_v14 = vsel %vm2683_vm12, %v2458_v10, 0.0  ;;  %v2763_v18 = vld [vmem:[#allocation2 + $0x61] ss:$2 sm:$0xff]  ;;  %v3108_v4 = vld [vmem:[#allocation2 + $0x62] ss:$2 sm:$0xff]  ;;  %vm4882_vm12 = vcmask 1046534  }
 0x2b7   : > { %2716 = vst.msk [vmem:[#allocation2 + $0x79] sm:$0xff] %vm2700_vm4, %v2699_v14  ;;  %v2729_v21 = vld [vmem:[#allocation2 + $0x60] ss:$2 sm:$0xff]  ;;  %v6212_v10 = vld [vmem:[%s7777_s7 + $0x30] sm:$0xff]  }
 0x2b8   : > { %v6213_v14 = vld [vmem:[%s7777_s7 + $0xa0] sm:$0xff]  }
 0x2be   : > { %v2765_v55 = vld [vmem:[#allocation2 + $0x71] ss:$2 sm:$0xff]  ;;  %v3110_v34 = vld [vmem:[#allocation2 + $0x72] ss:$2 sm:$0xff] }
 0x2bf   : > { %v7252_v6 = vpack.c.bf16 %v2765_v55, %v2763_v18  ;;  %v7254_v8 = vpack.c.bf16 %v3110_v34, %v3108_v4  ;;  %v2731_v20 = vld [vmem:[#allocation2 + $0x70] ss:$2 sm:$0xff]  ;;  %v3462_v59 = vld [vmem:[#allocation2 + $0x73] ss:$2 sm:$0xff]  ;;  %v6215_v55 = vld [vmem:[%s7777_s7 + $0xa8] sm:$0xff]  }
 0x2c0   : > { %v2735_v25 = vpack.c.bf16 %v2731_v20, %v2729_v21  ;;  %v6214_v18 = vld [vmem:[%s7777_s7 + $0x38] sm:$0xff]   ;;  %v6216_v4 = vld [vmem:[%s7777_s7 + $0x40] sm:$0xff]   ;;  %v6217_v34 = vld [vmem:[%s7777_s7 + $0xb0] sm:$0xff]  }
 0x2c1   : > { %5353 = vmatmul.mubr.msk.bf16.gmra.mrb[76].mxu0 %vm2700_vm4, %v7252_v6  ;;  %5407 = vmatmul.mubr.msk.bf16.gmra.mrb[80].mxu1 %vm2700_vm4, %v7254_v8 }
 0x2c2   : > { %3054 = vmatprep.mubr.bf16.mxu0 %v6263_v2  ;;  %3406 = vmatprep.mubr.bf16.mxu1 %v6263_v2 }
 0x2c9   : > { %5368 = vmatmul.mubr.msk.bf16.vlgmr.msra.gmra.mrb[64].mxu0 %vm2700_vm4, %v2732_v16  ;;  %5408 = vmatmul.mubr.msk.bf16.vlgmr.msra.gmra.mrb[68].mxu1 %vm2700_vm4, %v7114_v37  ;;  %v2721_v37 = vld [vmem:[#allocation2 + $0x20] ss:$2 sm:$0xff] }
 0x2ca   : > { %3213 = vmatpush1.bf16.msra.mxu0 %v6179_v12  ;;  %3480 = vmatpush1.bf16.msra.mxu1 %v6179_v12  ;;  %v2733_v60 = vpack.c.bf16 %v2723_v57, %v2721_v37  ;;  %v6222_v12 = vld [vmem:[%s7777_s7 + $0x58] sm:$0xff]   ;;  %v6223_v16 = vld [vmem:[%s7777_s7 + $0xc8] sm:$0xff]  }
 0x2cb   : > { %3214 = vmatprep.subr.bf16.mxu0 %v6184_v22  ;;  %3481 = vmatprep.subr.bf16.mxu1 %v6184_v22  ;;  %v6224_v22 = vld [vmem:[%s7777_s7 + $0x60] sm:$0xff]   ;;  %v6227_v57 = vld [vmem:[%s7777_s7 + $0xd8] sm:$0xff]  }
 0x2cc   : > { %3064 = vmatprep.mubr.bf16.mxu0 %v6263_v2  ;;  %3416 = vmatprep.mubr.bf16.mxu1 %v6263_v2 }
 0x2ce   : > { %3215 = vmatpush1.bf16.msra.mxu0 %v6182_v32  ;;  %3482 = vmatpush1.bf16.msra.mxu1 %v6182_v32  ;;  %v6225_v32 = vld [vmem:[%s7777_s7 + $0xd0] sm:$0xff]  }
 0x2cf   : > { %3216 = vmatprep.subr.bf16.mxu0 %v6187_v42  ;;  %3483 = vmatprep.subr.bf16.mxu1 %v6187_v42  ;;  %v6226_v42 = vld [vmem:[%s7777_s7 + $0x68] sm:$0xff]  }
 0x2d1   : > { %5369 = vmatmul.mubr.msk.bf16.gmra.mrb[68].mxu0 %vm2700_vm4, %v2733_v60  ;;  %5409 = vmatmul.mubr.msk.bf16.gmra.mrb[72].mxu1 %vm2700_vm4, %v7178_v44  ;;  %v2725_v44 = vld [vmem:[#allocation2 + $0x40] ss:$2 sm:$0xff] }
 0x2d2   : > { %3217 = vmatpush1.bf16.msra.mxu0 %v6185_v58  ;;  %3484 = vmatpush1.bf16.msra.mxu1 %v6185_v58  ;;  %v2734_v7 = vpack.c.bf16 %v2727_v0, %v2725_v44 }
 0x2d3   : > { %3218 = vmatprep.subr.bf16.mxu0 %v6190_v61  ;;  %3485 = vmatprep.subr.bf16.mxu1 %v6190_v61 }
 0x2d4   : > { %3074 = vmatprep.mubr.bf16.mxu0 %v6263_v2  ;;  %3426 = vmatprep.mubr.bf16.mxu1 %v6263_v2 }
 0x2d6   : > { %3219 = vmatpush1.bf16.msra.mxu0 %v6188_v62  ;;  %3486 = vmatpush1.bf16.msra.mxu1 %v6188_v62 }
 0x2d7   : > { %3220 = vmatprep.subr.bf16.mxu0 %v6193_v63  ;;  %3487 = vmatprep.subr.bf16.mxu1 %v6193_v63 }
 0x2d9   : > { %5370 = vmatmul.mubr.msk.bf16.gmra.mrb[72].mxu0 %vm2700_vm4, %v2734_v7  ;;  %5410 = vmatmul.mubr.msk.bf16.gmra.mrb[76].mxu1 %vm2700_vm4, %v7236_v50  ;;  %v6209_v50 = vld [vmem:[%s7777_s7 + $0x90] sm:$0xff]  }
 0x2da   : > { %3221 = vmatpush1.bf16.msra.mxu0 %v6191_v5  ;;  %3488 = vmatpush1.bf16.msra.mxu1 %v6191_v5 }
 0x2db   : > { %3084 = vmatprep.mubr.bf16.mxu0 %v6263_v2  ;;  %3222 = vmatprep.subr.bf16.mxu0 %v6196_v9 }
 0x2dc   : > { %3436 = vmatprep.mubr.bf16.mxu1 %v6263_v2  ;;  %3489 = vmatprep.subr.bf16.mxu1 %v6196_v9 }
 0x2de   : > { %3223 = vmatpush1.bf16.msra.mxu0 %v6194_v11  ;;  %3490 = vmatpush1.bf16.msra.mxu1 %v6194_v11 }
 0x2df   : > { %3224 = vmatprep.subr.bf16.mxu0 %v6199_v17  ;;  %3491 = vmatprep.subr.bf16.mxu1 %v6199_v17 }
 0x2e1   : > { %5371 = vmatmul.mubr.msk.bf16.gmra.mrb[76].mxu0 %vm2700_vm4, %v2735_v25  ;;  %5411 = vmatmul.mubr.msk.bf16.gmra.mrb[80].mxu1 %vm2700_vm4, %v7252_v6  ;;  %v6218_v6 = vld [vmem:[%s7777_s7 + $0x48] sm:$0xff]  }
 0x2e2   : > { %3225 = vmatpush1.bf16.msra.mxu0 %v6197_v23  ;;  %3492 = vmatpush1.bf16.msra.mxu1 %v6197_v23 }
 0x2e3   : > { %3244 = vmatprep.mubr.bf16.mxu0 %v6263_v2  ;;  %3511 = vmatprep.mubr.bf16.mxu1 %v6263_v2 }
 0x2e4   : > { %3716 = vmatprep.subr.bf16.mxu0 %v6263_v2  ;;  %3894 = vmatprep.subr.bf16.mxu1 %v6263_v2 }
 0x2e9   : > { %5400 = vmatmul.mubr.msk.bf16.vlgmr.msra.gmra.mrb[64].mxu0 %vm2700_vm4, %v7116_v38  ;;  %5412 = vmatmul.mubr.msk.bf16.vlgmr.msra.gmra.mrb[68].mxu1 %vm2700_vm4, %v3463_v28  ;;  %v3452_v38 = vld [vmem:[#allocation2 + $0x23] ss:$2 sm:$0xff] }
 0x2ea   : > { %3254 = vmatprep.mubr.bf16.mxu0 %v6263_v2  ;;  %3521 = vmatprep.mubr.bf16.mxu1 %v6263_v2  ;;  %v3464_v39 = vpack.c.bf16 %v3454_v1, %v3452_v38 }
 0x2eb   : > { %3717 = vmatpush1.bf16.msra.mxu0 %v6200_v29  ;;  %3895 = vmatpush1.bf16.msra.mxu1 %v6201_v30 }
 0x2ec   : > { %3718 = vmatprep.subr.bf16.mxu0 %v6263_v2  ;;  %3896 = vmatprep.subr.bf16.mxu1 %v6263_v2 }
 0x2ef   : > { %3719 = vmatpush1.bf16.msra.mxu0 %v6202_v31  ;;  %3897 = vmatpush1.bf16.msra.mxu1 %v6203_v33 }
 0x2f0   : > { %3720 = vmatprep.subr.bf16.mxu0 %v6263_v2  ;;  %3898 = vmatprep.subr.bf16.mxu1 %v6263_v2 }
 0x2f1   : > { %5401 = vmatmul.mubr.msk.bf16.gmra.mrb[68].mxu0 %vm2700_vm4, %v7180_v45  ;;  %5413 = vmatmul.mubr.msk.bf16.gmra.mrb[72].mxu1 %vm2700_vm4, %v3464_v39  ;;  %v3456_v45 = vld [vmem:[#allocation2 + $0x43] ss:$2 sm:$0xff] }
 0x2f2   : > { %3264 = vmatprep.mubr.bf16.mxu0 %v6263_v2  ;;  %3531 = vmatprep.mubr.bf16.mxu1 %v6263_v2  ;;  %v3465_v48 = vpack.c.bf16 %v3458_v47, %v3456_v45 }
 0x2f3   : > { %3721 = vmatpush1.bf16.msra.mxu0 %v6204_v40  ;;  %3899 = vmatpush1.bf16.msra.mxu1 %v6205_v41 }
 0x2f4   : > { %3722 = vmatprep.subr.bf16.mxu0 %v6263_v2  ;;  %3900 = vmatprep.subr.bf16.mxu1 %v6263_v2 }
 0x2f7   : > { %3723 = vmatpush1.bf16.msra.mxu0 %v6206_v43  ;;  %3901 = vmatpush1.bf16.msra.mxu1 %v6207_v46 }
 0x2f8   : > { %3724 = vmatprep.subr.bf16.mxu0 %v6263_v2  ;;  %3902 = vmatprep.subr.bf16.mxu1 %v6263_v2 }
 0x2f9   : > { %5402 = vmatmul.mubr.msk.bf16.gmra.mrb[72].mxu0 %vm2700_vm4, %v7238_v51  ;;  %5414 = vmatmul.mubr.msk.bf16.gmra.mrb[76].mxu1 %vm2700_vm4, %v3465_v48  ;;  %v3460_v51 = vld [vmem:[#allocation2 + $0x63] ss:$2 sm:$0xff] }
 0x2fa   : > { %3274 = vmatprep.mubr.bf16.mxu0 %v6263_v2  ;;  %3541 = vmatprep.mubr.bf16.mxu1 %v6263_v2  ;;  %v3466_v35 = vpack.c.bf16 %v3462_v59, %v3460_v51 }
 0x2fb   : > { %3725 = vmatpush1.bf16.msra.mxu0 %v6208_v49  ;;  %3903 = vmatpush1.bf16.msra.mxu1 %v6209_v50 }
 0x2fc   : > { %3726 = vmatprep.subr.bf16.mxu0 %v6263_v2  ;;  %3904 = vmatprep.subr.bf16.mxu1 %v6263_v2 }
 0x2ff   : > { %3727 = vmatpush1.bf16.msra.mxu0 %v6210_v53  ;;  %3905 = vmatpush1.bf16.msra.mxu1 %v6211_v54 }
 0x300   : > { %3728 = vmatprep.subr.bf16.mxu0 %v6263_v2  ;;  %3906 = vmatprep.subr.bf16.mxu1 %v6263_v2 }
 0x301   : > { %5403 = vmatmul.mubr.msk.bf16.gmra.mrb[76].mxu0 %vm2700_vm4, %v7254_v8  ;;  %5415 = vmatmul.mubr.msk.bf16.gmra.mrb[80].mxu1 %vm2700_vm4, %v3466_v35  ;;  %v6219_v8 = vld [vmem:[%s7777_s7 + $0xb8] sm:$0xff]  }
 0x303   : > { %3729 = vmatpush1.bf16.msra.mxu0 %v6212_v10  ;;  %3907 = vmatpush1.bf16.msra.mxu1 %v6213_v14 }
 0x304   : > { %3730 = vmatprep.subr.bf16.mxu0 %v6263_v2  ;;  %3908 = vmatprep.subr.bf16.mxu1 %v6263_v2 }
 0x307   : > { %3731 = vmatpush1.bf16.msra.mxu0 %v6214_v18  ;;  %3909 = vmatpush1.bf16.msra.mxu1 %v6215_v55 }
 0x308   : > { %3732 = vmatprep.subr.bf16.mxu0 %v6263_v2  ;;  %3910 = vmatprep.subr.bf16.mxu1 %v6263_v2 }
 0x30b   : > { %3733 = vmatpush1.bf16.msra.mxu0 %v6216_v4  ;;  %3911 = vmatpush1.bf16.msra.mxu1 %v6217_v34 }
 0x30c   : > { %3734 = vmatprep.subr.bf16.mxu0 %v6263_v2  ;;  %3912 = vmatprep.subr.bf16.mxu1 %v6263_v2 }
 0x30f   : > { %3735 = vmatpush1.bf16.msra.mxu0 %v6218_v6  ;;  %3913 = vmatpush1.bf16.msra.mxu1 %v6219_v8 }
 0x310   : > { %3736 = vmatprep.subr.bf16.mxu0 %v6263_v2  ;;  %3914 = vmatprep.subr.bf16.mxu1 %v6263_v2 }
 0x313   : > { %3737 = vmatpush1.bf16.msra.mxu0 %v6220_v13  ;;  %3915 = vmatpush1.bf16.msra.mxu1 %v6221_v19 }
 0x314   : > { %3738 = vmatprep.subr.bf16.mxu0 %v6263_v2  ;;  %3916 = vmatprep.subr.bf16.mxu1 %v6263_v2 }
 0x317   : > { %3739 = vmatpush1.bf16.msra.mxu0 %v6222_v12  ;;  %3917 = vmatpush1.bf16.msra.mxu1 %v6223_v16 }
 0x318   : > { %3740 = vmatprep.subr.bf16.mxu0 %v6263_v2  ;;  %3918 = vmatprep.subr.bf16.mxu1 %v6263_v2 }
 0x31b   : > { %3741 = vmatpush1.bf16.msra.mxu0 %v6224_v22  ;;  %3919 = vmatpush1.bf16.msra.mxu1 %v6225_v32 }
 0x31c   : > { %3742 = vmatprep.subr.bf16.mxu0 %v6263_v2  ;;  %3920 = vmatprep.subr.bf16.mxu1 %v6263_v2 }
 0x31f   : > { %3743 = vmatpush1.bf16.msra.mxu0 %v6226_v42  ;;  %3921 = vmatpush1.bf16.msra.mxu1 %v6227_v57  ;;  %v6228_v42 = vld [vmem:[%s7781_s11 + $0x38] sm:$0xff]   ;;  %v6229_v57 = vld [vmem:[%s7781_s11 + $0x40] sm:$0xff]  }
 0x320   : > { %5630 = vmatprep.subr.bf16.mxu0 %v6228_v42 }
 0x3bc   : > { %v3246_v37 = vpop.f32.mrb[64].mxu0  ;;  %v3513_v58 = vpop.f32.mrb[68].mxu1 }
 0x3bd   : > { %v3568_v60 = vmax.f32 %v3246_v37, %v3513_v58  ;;  %v3248_v61 = vpop.f32.mrb[65].mxu0  ;;  %v3515_v62 = vpop.f32.mrb[69].mxu1  ;;  %v6230_v37 = vld [vmem:[%s7781_s11 + $0x48] sm:$0xff]   ;;  %v6231_v58 = vld [vmem:[%s7781_s11 + $0x50] sm:$0xff]  }
 0x3be   : > { %v3569_v63 = vmax.f32 %v3248_v61, %v3515_v62  ;;  %v3250_v0 = vpop.f32.mrb[66].mxu0  ;;  %v3517_v44 = vpop.f32.mrb[70].mxu1  ;;  %v6233_v61 = vld [vmem:[%s7781_s11 + $0x60] sm:$0xff]   ;;  %v6234_v62 = vld [vmem:[%s7781_s11 + $0x68] sm:$0xff]  }
 0x3bf   : > { %v3570_v5 = vmax.f32 %v3250_v0, %v3517_v44  ;;  %v3252_v2 = vpop.f32.mrb[67].mxu0  ;;  %v3519_v7 = vpop.f32.mrb[71].mxu1  ;;  %v4638_v0 = vld [vmem:[%s7785_s15] sm:$0xff]  ;;  %v4639_v44 = vld [vmem:[%s7785_s15 + $0x8] sm:$0xff] }
 0x3c0   : > { %v3571_v9 = vmax.f32 %v3252_v2, %v3519_v7  ;;  %v5771_v2 = vpack.c.bf16 %v4639_v44, %v4638_v0  ;;  %v4641_v7 = vld [vmem:[%s7785_s15 + $0x18] sm:$0xff] }
 0x3c1   : > { %v3584_v11 = vpack.c.bf16 %v3570_v5, %v3568_v60  ;;  %v6232_v60 = vld [vmem:[%s7781_s11 + $0x58] sm:$0xff]   ;;  %v4640_v5 = vld [vmem:[%s7785_s15 + $0x10] sm:$0xff] }
 0x3c2   : > { %v3585_v17 = vpack.c.bf16 %v3571_v9, %v3569_v63  ;;  %v7483_v63 = vld [vmem:[%s7781_s11] sm:$0xff]   ;;  %v5775_v9 = vpack.c.bf16 %v4641_v7, %v4640_v5  ;;  %5772 = vmatprep.subr.bf16.mxu1 %v5771_v2 }
 0x3c4   : > { %v3256_v20 = vpop.f32.mrb[68].mxu0  ;;  %v3523_v21 = vpop.f32.mrb[72].mxu1  ;;  %5430 = vmatprep.mubr.msk.bf16.mxu0 %vm2026_vm2, %v3585_v17  ;;  %5476 = vmatprep.mubr.msk.bf16.mxu1 %vm2026_vm2, %v3585_v17  ;;  %v4643_v17 = vld [vmem:[%s7785_s15 + $0x28] sm:$0xff] }
 0x3c5   : > { %v3572_v23 = vmax.f32 %v3256_v20, %v3523_v21  ;;  %v3258_v25 = vpop.f32.mrb[69].mxu0  ;;  %v3525_v26 = vpop.f32.mrb[73].mxu1  ;;  %3749 = vmatmul.mubr.bf16.vlgmr.msra.gmra.mrb[80].mxu0 %v3584_v11  ;;  %3927 = vmatmul.mubr.bf16.vlgmr.msra.gmra.mrb[84].mxu1 %v3584_v11  ;;  %v4642_v11 = vld [vmem:[%s7785_s15 + $0x20] sm:$0xff]  ;;  %v4644_v21 = vld [vmem:[%s7785_s15 + $0x30] sm:$0xff] }
 0x3c6   : > { %v3573_v27 = vmax.f32 %v3258_v25, %v3525_v26  ;;  %v3260_v28 = vpop.f32.mrb[70].mxu0  ;;  %v3527_v29 = vpop.f32.mrb[74].mxu1  ;;  %5631 = vmatpush3.bf16.msra.mxu0 %v6228_v42  ;;  %5774 = vmatpush3.bf16.msra.mxu1 %v5771_v2  ;;  %v5779_v20 = vpack.c.bf16 %v4643_v17, %v4642_v11  ;;  %v4646_v26 = vld [vmem:[%s7785_s15 + $0x40] sm:$0xff]  ;;  %v2464_v2 = vadd.s32 32, %v7049_v52 }
 0x3c7   : > { %v3574_v30 = vmax.f32 %v3260_v28, %v3527_v29  ;;  %v3262_v31 = vpop.f32.mrb[71].mxu0  ;;  %v3529_v33 = vpop.f32.mrb[75].mxu1  ;;  %5632 = vmatprep.subr.bf16.mxu0 %v6229_v57  ;;  %5776 = vmatprep.subr.bf16.mxu1 %v5775_v9 }
 0x3c8   : > { %v3575_v1 = vmax.f32 %v3262_v31, %v3529_v33  ;;  %v7519_v31 = vld [vmem:[%s7778_s8] ss:$0 sm:$0xff] }
 0x3c9   : > { %v3586_v38 = vpack.c.bf16 %v3574_v30, %v3572_v23  ;;  %v4645_v23 = vld [vmem:[%s7785_s15 + $0x38] sm:$0xff] }
 0x3ca   : > { %v3587_v39 = vpack.c.bf16 %v3575_v1, %v3573_v27  ;;  %5633 = vmatpush3.bf16.msra.mxu0 %v6229_v57  ;;  %5778 = vmatpush3.bf16.msra.mxu1 %v5775_v9  ;;  %v5783_v25 = vpack.c.bf16 %v4645_v23, %v4644_v21  ;;  %v4647_v27 = vld [vmem:[%s7785_s15 + $0x48] sm:$0xff] }
 0x3cb   : > { %5634 = vmatprep.subr.bf16.mxu0 %v6230_v37  ;;  %5780 = vmatprep.subr.bf16.mxu1 %v5779_v20  ;;  %v5787_v28 = vpack.c.bf16 %v4647_v27, %v4646_v26 }
 0x3cc   : > { %v3266_v40 = vpop.f32.mrb[72].mxu0  ;;  %v3533_v41 = vpop.f32.mrb[76].mxu1  ;;  %5431 = vmatprep.mubr.msk.bf16.mxu0 %vm2026_vm2, %v3587_v39  ;;  %5477 = vmatprep.mubr.msk.bf16.mxu1 %vm2026_vm2, %v3587_v39 }
 0x3cd   : > { %v3576_v43 = vmax.f32 %v3266_v40, %v3533_v41  ;;  %v3268_v46 = vpop.f32.mrb[73].mxu0  ;;  %v3535_v47 = vpop.f32.mrb[77].mxu1  ;;  %3757 = vmatmul.mubr.bf16.gmra.mrb[84].mxu0 %v3586_v38  ;;  %3935 = vmatmul.mubr.bf16.gmra.mrb[88].mxu1 %v3586_v38 }
 0x3ce   : > { %v3577_v45 = vmax.f32 %v3268_v46, %v3535_v47  ;;  %v3270_v48 = vpop.f32.mrb[74].mxu0  ;;  %v3537_v49 = vpop.f32.mrb[78].mxu1  ;;  %5635 = vmatpush3.bf16.msra.mxu0 %v6230_v37  ;;  %5782 = vmatpush3.bf16.msra.mxu1 %v5779_v20 }
 0x3cf   : > { %v3578_v50 = vmax.f32 %v3270_v48, %v3537_v49  ;;  %v3272_v53 = vpop.f32.mrb[75].mxu0  ;;  %v3539_v54 = vpop.f32.mrb[79].mxu1  ;;  %5636 = vmatprep.subr.bf16.mxu0 %v6231_v58  ;;  %5784 = vmatprep.subr.bf16.mxu1 %v5783_v25  ;;  %v4024_v48 = vand.u32 7, %v7049_v52 }
 0x3d0   : > { %v3579_v59 = vmax.f32 %v3272_v53, %v3539_v54  ;;  %v7532_v53 = vld [vmem:[%s7780_s10] ss:$0 sm:$0xff]  ;;  %v4031_v54 = vand.u32 7, %v7057_v3 }
 0x3d1   : > { %v3588_v51 = vpack.c.bf16 %v3578_v50, %v3576_v43  ;;  %vm7536_vm13 = vcmp.lt.s32.totalorder %v4024_v48, 7 }
 0x3d2   : > { %v3589_v35 = vpack.c.bf16 %v3579_v59, %v3577_v45  ;;  %5637 = vmatpush3.bf16.msra.mxu0 %v6231_v58  ;;  %5786 = vmatpush3.bf16.msra.mxu1 %v5783_v25  ;;  %v7525_v45 = vld [vmem:[%s7779_s9] ss:$0 sm:$0xff]  ;;  %vm4117_vm14 = vcmp.lt.s32.totalorder %v4031_v54, 7 }
 0x3d3   : > { %5638 = vmatprep.subr.bf16.mxu0 %v6232_v60  ;;  %5788 = vmatprep.subr.bf16.mxu1 %v5787_v28 }
 0x3d4   : > { %v3276_v10 = vpop.f32.mrb[76].mxu0  ;;  %v3543_v14 = vpop.f32.mrb[80].mxu1  ;;  %5432 = vmatprep.mubr.msk.bf16.mxu0 %vm2026_vm2, %v3589_v35  ;;  %5478 = vmatprep.mubr.msk.bf16.mxu1 %vm2026_vm2, %v3589_v35 }
 0x3d5   : > { %v3580_v18 = vmax.f32 %v3276_v10, %v3543_v14  ;;  %v3278_v55 = vpop.f32.mrb[77].mxu0  ;;  %v3545_v4 = vpop.f32.mrb[81].mxu1  ;;  %3765 = vmatmul.mubr.bf16.gmra.mrb[88].mxu0 %v3588_v51  ;;  %3943 = vmatmul.mubr.bf16.gmra.mrb[92].mxu1 %v3588_v51  ;;  %v2462_v14 = vadd.s32 16, %v7049_v52 }
 0x3d6   : > { %v3581_v34 = vmax.f32 %v3278_v55, %v3545_v4  ;;  %v3280_v6 = vpop.f32.mrb[78].mxu0  ;;  %v3547_v8 = vpop.f32.mrb[82].mxu1  ;;  %5639 = vmatpush3.bf16.msra.mxu0 %v6232_v60  ;;  %5790 = vmatpush3.bf16.msra.mxu1 %v5787_v28 }
 0x3d7   : > { %v3582_v13 = vmax.f32 %v3280_v6, %v3547_v8  ;;  %v3282_v19 = vpop.f32.mrb[79].mxu0  ;;  %v3549_v12 = vpop.f32.mrb[83].mxu1  ;;  %5640 = vmatprep.subr.bf16.mxu0 %v6233_v61  ;;  %v4038_v57 = vand.u32 7, %v2462_v14 }
 0x3d8   : > { %v3583_v16 = vmax.f32 %v3282_v19, %v3549_v12 }
 0x3d9   : > { %v3590_v22 = vpack.c.bf16 %v3582_v13, %v3580_v18  ;;  %vm7552_vm15 = vcmp.lt.s32.totalorder %v4038_v57, 7 }
 0x3da   : > { %v3591_v32 = vpack.c.bf16 %v3583_v16, %v3581_v34  ;;  %5641 = vmatpush3.bf16.msra.mxu0 %v6233_v61  ;;  %v4045_v61 = vand.u32 7, %v7076_v36 }
 0x3db   : > { %5642 = vmatprep.subr.bf16.mxu0 %v6234_v62 }
 0x3dc   : > { %5433 = vmatprep.mubr.msk.bf16.mxu0 %vm2026_vm2, %v3591_v32  ;;  %5479 = vmatprep.mubr.msk.bf16.mxu1 %vm2026_vm2, %v3591_v32  ;;  %vm7559_vm0 = vcmp.lt.s32.totalorder %v4045_v61, 7 }
 0x3dd   : > { %3773 = vmatmul.mubr.bf16.gmra.mrb[92].mxu0 %v3590_v22  ;;  %3951 = vmatmul.mubr.bf16.gmra.mrb[96].mxu1 %v3590_v22 }
 0x3de   : > { %5643 = vmatpush3.bf16.msra.mxu0 %v6234_v62 }
 0x3df   : > { %5652 = vmatprep.subr.bf16.mxu0 %v7483_v63 }
 0x498   : > { %v3750_v29 = vpop.f32.mrb[80].mxu0  ;;  %v3928_v30 = vpop.f32.mrb[84].mxu1 }
 0x499   : > { %v3959_v33 = vmax.f32 %v3750_v29, %v3928_v30  ;;  %v3752_v1 = vpop.f32.mrb[81].mxu0  ;;  %v3930_v38 = vpop.f32.mrb[85].mxu1 }
 0x49a   : > { %v3753_v39 = vpop.f32.mrb[82].mxu0  ;;  %v3931_v40 = vpop.f32.mrb[86].mxu1  ;;  %v4052_v1 = vand.u32 7, %v2464_v2 }
 0x49b   : > { %v3974_v41 = vadd.f32 %v7519_v31, %v3959_v33  ;;  %v3960_v43 = vmax.f32 %v3753_v39, %v3931_v40  ;;  %v3755_v46 = vpop.f32.mrb[83].mxu0  ;;  %v3933_v47 = vpop.f32.mrb[87].mxu1 }
 0x49c   : > { %v4059_v46 = vand.u32 7, %v7088_v24  ;;  %vm7574_vm1 = vcmp.lt.s32.totalorder %v4052_v1, 7 }
 0x49d   : > { %v3982_v49 = vmax.f32 %v3974_v41, 0.0  ;;  %v3975_v50 = vadd.f32 %v7519_v31, %v3960_v43 }
 0x49e   : > { %vm7582_vm2 = vcmp.lt.s32.totalorder %v4059_v46, 7 }
 0x49f   : > { %v3997_v59 = vmul.f32 %v7525_v45, %v3982_v49  ;;  %v3983_v51 = vmax.f32 %v3975_v50, 0.0 }
 0x4a0   : > { %v3758_v10 = vpop.f32.mrb[84].mxu0  ;;  %v3936_v18 = vpop.f32.mrb[88].mxu1 }
 0x4a1   : > { %v4012_v55 = vadd.f32 %v7532_v53, %v3997_v59  ;;  %v3998_v4 = vmul.f32 %v7525_v45, %v3983_v51  ;;  %v3961_v34 = vmax.f32 %v3758_v10, %v3936_v18  ;;  %v3760_v6 = vpop.f32.mrb[85].mxu0  ;;  %v3938_v8 = vpop.f32.mrb[89].mxu1  ;;  %v2466_v59 = vadd.s32 48, %v7049_v52 }
 0x4a2   : > { %v3761_v3 = vpop.f32.mrb[86].mxu0  ;;  %v3939_v13 = vpop.f32.mrb[90].mxu1 }
 0x4a3   : > { %v4124_v19 = vsel %vm7536_vm13, %v4012_v55, 0.0  ;;  %v4013_v12 = vadd.f32 %v7532_v53, %v3998_v4  ;;  %v3976_v16 = vadd.f32 %v7519_v31, %v3961_v34  ;;  %v3962_v22 = vmax.f32 %v3761_v3, %v3939_v13  ;;  %v3763_v32 = vpop.f32.mrb[87].mxu0  ;;  %v3941_v42 = vpop.f32.mrb[91].mxu1 }
 0x4a4   : > { %4132 = vst.msk [vmem:[#allocation3 + $0x1] sm:$0xff] %vm2700_vm4, %v4124_v19  ;;  %vm4884_vm13 = vcmask 1047559  }
 0x4a5   : > { %v4125_v37 = vsel %vm4117_vm14, %v4013_v12, 0.0  ;;  %v3984_v58 = vmax.f32 %v3976_v16, 0.0  ;;  %v3977_v60 = vadd.f32 %v7519_v31, %v3962_v22  ;;  %v4066_v12 = vand.u32 7, %v2466_v59  ;;  %v6247_v59 = vld [vmem:[%s7781_s11 + $0x98] sm:$0xff]  }
 0x4a6   : > { %4133 = vst.msk [vmem:[#allocation3 + $0x9] sm:$0xff] %vm2700_vm4, %v4125_v37  ;;  %v4073_v37 = vand.u32 7, %v7104_v15  ;;  %v6237_v15 = vld [vmem:[%s7781_s11 + $0x10] sm:$0xff]  }
 0x4a7   : > { %v3999_v62 = vmul.f32 %v7525_v45, %v3984_v58  ;;  %v3985_v0 = vmax.f32 %v3977_v60, 0.0  ;;  %v6236_v60 = vld [vmem:[%s7781_s11 + $0x8] sm:$0xff]   ;;  %vm4122_vm3 = vcmp.lt.s32.totalorder %v4066_v12, 7 }
 0x4a8   : > { %v3766_v5 = vpop.f32.mrb[88].mxu0  ;;  %v3944_v7 = vpop.f32.mrb[92].mxu1  ;;  %vm4123_vm5 = vcmp.lt.s32.totalorder %v4073_v37, 7 }
 0x4a9   : > { %v4014_v9 = vadd.f32 %v7532_v53, %v3999_v62  ;;  %v4000_v11 = vmul.f32 %v7525_v45, %v3985_v0  ;;  %v3963_v17 = vmax.f32 %v3766_v5, %v3944_v7  ;;  %v3768_v20 = vpop.f32.mrb[89].mxu0  ;;  %v3946_v21 = vpop.f32.mrb[93].mxu1 }
 0x4aa   : > { %v3769_v23 = vpop.f32.mrb[90].mxu0  ;;  %v3947_v25 = vpop.f32.mrb[94].mxu1 }
 0x4ab   : > { %v4126_v26 = vsel %vm7552_vm15, %v4014_v9, 0.0  ;;  %v4015_v27 = vadd.f32 %v7532_v53, %v4000_v11  ;;  %v3978_v28 = vadd.f32 %v7519_v31, %v3963_v17  ;;  %v3964_v29 = vmax.f32 %v3769_v23, %v3947_v25  ;;  %v3771_v30 = vpop.f32.mrb[91].mxu0  ;;  %v3949_v33 = vpop.f32.mrb[95].mxu1  ;;  %v4166_v41 = vld [vmem:[#allocation3 + $0x1] sm:$0xff] }
 0x4ac   : > { %4134 = vst.msk [vmem:[#allocation3 + $0x11] sm:$0xff] %vm2700_vm4, %v4126_v26  ;;  %v4140_v36 = vld [vmem:[#allocation3] sm:$0xff]  ;;  %v6241_v26 = vld [vmem:[%s7781_s11 + $0x30] sm:$0xff]   ;;  %vm4993_vm15 = vcmask 64512  }
 0x4ad   : > { %v4127_v38 = vsel %vm7559_vm0, %v4015_v27, 0.0  ;;  %v3986_v39 = vmax.f32 %v3978_v28, 0.0  ;;  %v3979_v40 = vadd.f32 %v7519_v31, %v3964_v29  ;;  %v4167_v43 = vld [vmem:[#allocation3 + $0x9] sm:$0xff]  ;;  %v6240_v23 = vld [vmem:[%s7781_s11 + $0x28] sm:$0xff]   ;;  %vm4995_vm0 = vcmask 130048  }
 0x4ae   : > { %4135 = vst.msk [vmem:[#allocation3 + $0x19] sm:$0xff] %vm2700_vm4, %v4127_v38  ;;  %v4174_v47 = vpack.c.bf16 %v4167_v43, %v4166_v41  ;;  %v4141_v11 = vld [vmem:[#allocation3 + $0x8] sm:$0xff]  ;;  %v6243_v38 = vld [vmem:[%s7781_s11 + $0x78] sm:$0xff]  }
 0x4af   : > { %v4001_v48 = vmul.f32 %v7525_v45, %v3986_v39  ;;  %v3987_v49 = vmax.f32 %v3979_v40, 0.0  ;;  %v4148_v25 = vpack.c.bf16 %v4141_v11, %v4140_v36  ;;  %v6242_v27 = vld [vmem:[%s7781_s11 + $0x70] sm:$0xff]   ;;  %v6244_v40 = vld [vmem:[%s7781_s11 + $0x80] sm:$0xff]  }
 0x4b0   : > { %v3774_v54 = vpop.f32.mrb[92].mxu0  ;;  %v3952_v51 = vpop.f32.mrb[96].mxu1  ;;  %5644 = vmatprep.mubr.msk.bf16.mxu0 %vm2700_vm4, %v4174_v47 }
 0x4b1   : > { %v4016_v35 = vadd.f32 %v7532_v53, %v4001_v48  ;;  %v4002_v10 = vmul.f32 %v7525_v45, %v3987_v49  ;;  %v3965_v14 = vmax.f32 %v3774_v54, %v3952_v51  ;;  %v3776_v24 = vpop.f32.mrb[93].mxu0  ;;  %v3954_v18 = vpop.f32.mrb[97].mxu1  ;;  %v4431_v48 = vld [vmem:[#allocation3 + $0x2] sm:$0xff]  ;;  %v6248_v51 = vld [vmem:[%s7781_s11 + $0xa0] sm:$0xff]  }
 0x4b2   : > { %v3777_v4 = vpop.f32.mrb[94].mxu0  ;;  %v3955_v34 = vpop.f32.mrb[98].mxu1  ;;  %v6245_v49 = vld [vmem:[%s7781_s11 + $0x88] sm:$0xff]   ;;  %v6246_v54 = vld [vmem:[%s7781_s11 + $0x90] sm:$0xff]  }
 0x4b3   : > { %v4128_v6 = vsel %vm7574_vm1, %v4016_v35, 0.0  ;;  %v4017_v52 = vadd.f32 %v7532_v53, %v4002_v10  ;;  %v3980_v8 = vadd.f32 %v7519_v31, %v3965_v14  ;;  %v3966_v3 = vmax.f32 %v3777_v4, %v3955_v34  ;;  %v3779_v13 = vpop.f32.mrb[95].mxu0  ;;  %v3957_v19 = vpop.f32.mrb[99].mxu1  ;;  %v4168_v42 = vld [vmem:[#allocation3 + $0x11] sm:$0xff] }
 0x4b4   : > { %4136 = vst.msk [vmem:[#allocation3 + $0x21] sm:$0xff] %vm2700_vm4, %v4128_v6  ;;  %v4142_v30 = vld [vmem:[#allocation3 + $0x10] sm:$0xff]  ;;  %v4650_v13 = vld [vmem:[%s7785_s15 + $0x60] sm:$0xff]  ;;  %v4651_v19 = vld [vmem:[%s7785_s15 + $0x68] sm:$0xff]  ;;  %vm4997_vm1 = vcmask 195584  }
 0x4b5   : > { %v4129_v16 = vsel %vm7582_vm2, %v4017_v52, 0.0  ;;  %v3988_v22 = vmax.f32 %v3980_v8, 0.0  ;;  %v3981_v32 = vadd.f32 %v7519_v31, %v3966_v3  ;;  %v4169_v57 = vld [vmem:[#allocation3 + $0x19] sm:$0xff]  ;;  %v4432_v43 = vld [vmem:[#allocation3 + $0xa] sm:$0xff]  ;;  %v5795_v12 = vpack.c.bf16 %v4651_v19, %v4650_v13 }
 0x4b6   : > { %4137 = vst.msk [vmem:[#allocation3 + $0x29] sm:$0xff] %vm2700_vm4, %v4129_v16  ;;  %v4175_v58 = vpack.c.bf16 %v4169_v57, %v4168_v42  ;;  %v4143_v28 = vld [vmem:[#allocation3 + $0x18] sm:$0xff]  ;;  %v4439_v50 = vpack.c.bf16 %v4432_v43, %v4431_v48  ;;  %v4648_v52 = vld [vmem:[%s7785_s15 + $0x50] sm:$0xff]  ;;  %v4649_v8 = vld [vmem:[%s7785_s15 + $0x58] sm:$0xff]  ;;  %v6265_v16 = vmov 0.0|0.0  }
 0x4b7   : > { %v4003_v61 = vmul.f32 %v7525_v45, %v3988_v22  ;;  %v3989_v62 = vmax.f32 %v3981_v32, 0.0  ;;  %v4149_v33 = vpack.c.bf16 %v4143_v28, %v4142_v30  ;;  %v4433_v14 = vld [vmem:[#allocation3 + $0x12] sm:$0xff]  ;;  %v5791_v3 = vpack.c.bf16 %v4649_v8, %v4648_v52  ;;  %v4850_v52 = vld [vmem:[%s7787_s17 + $0x48] sm:$0xff] }
 0x4b8   : > { %5645 = vmatmul.mubr.msk.bf16.vlgmr.msra.gmra.mrb[96].mxu0 %vm2700_vm4, %v4175_v58  ;;  %v5544_v22 = vld [vmem:[%s7782_s12] ss:$0 sm:$0xff]  ;;  %v4852_v13 = vld [vmem:[%s7787_s17 + $0x58] sm:$0xff] }
 0x4b9   : > { %v4018_v0 = vadd.f32 %v7532_v53, %v4003_v61  ;;  %v4004_v31 = vmul.f32 %v7525_v45, %v3989_v62  ;;  %5653 = vmatpush3.bf16.msra.mxu0 %v7483_v63  ;;  %v6238_v63 = vld [vmem:[%s7781_s11 + $0x18] sm:$0xff]   ;;  %5792 = vmatprep.subr.bf16.mxu1 %v5791_v3  ;;  %v5545_v61 = vld [vmem:[%s7783_s13] ss:$0 sm:$0xff] }
 0x4ba   : > { %5654 = vmatprep.subr.bf16.mxu0 %v6236_v60  ;;  %5794 = vmatpush3.bf16.msra.mxu1 %v5791_v3  ;;  %v4851_v3 = vld [vmem:[%s7787_s17 + $0x50] sm:$0xff] }
 0x4bb   : > { %v4130_v44 = vsel %vm4122_vm3, %v4018_v0, 0.0  ;;  %v4019_v5 = vadd.f32 %v7532_v53, %v4004_v31  ;;  %v4170_v7 = vld [vmem:[#allocation3 + $0x21] sm:$0xff]  ;;  %v6239_v53 = vld [vmem:[%s7781_s11 + $0x20] sm:$0xff]   ;;  %5796 = vmatprep.subr.bf16.mxu1 %v5795_v12  ;;  %v5815_v19 = vpack.c.bf16 %v4852_v13, %v4851_v3 }
 0x4bc   : > { %4138 = vst.msk [vmem:[#allocation3 + $0x31] sm:$0xff] %vm2700_vm4, %v4130_v44  ;;  %v4144_v1 = vld [vmem:[#allocation3 + $0x20] sm:$0xff]  ;;  %v5546_v44 = vld [vmem:[%s7784_s14] ss:$0 sm:$0xff] }
 0x4bd   : > { %v4131_v2 = vsel %vm4123_vm5, %v4019_v5, 0.0  ;;  %5655 = vmatpush3.bf16.msra.mxu0 %v6236_v60  ;;  %v4171_v9 = vld [vmem:[#allocation3 + $0x29] sm:$0xff]  ;;  %v4434_v35 = vld [vmem:[#allocation3 + $0x1a] sm:$0xff] }
 0x4be   : > { %4139 = vst.msk [vmem:[#allocation3 + $0x39] sm:$0xff] %vm2700_vm4, %v4131_v2  ;;  %5656 = vmatprep.subr.bf16.mxu0 %v6237_v15  ;;  %v4176_v45 = vpack.c.bf16 %v4171_v9, %v4170_v7  ;;  %v4145_v29 = vld [vmem:[#allocation3 + $0x28] sm:$0xff]  ;;  %v4440_v24 = vpack.c.bf16 %v4434_v35, %v4433_v14  ;;  %5798 = vmatpush3.bf16.msra.mxu1 %v5795_v12  ;;  %v4841_v9 = vld [vmem:[%s7787_s17] sm:$0xff]  ;;  %v4844_v35 = vld [vmem:[%s7787_s17 + $0x18] sm:$0xff] }
 0x4bf   : > { %v4150_v39 = vpack.c.bf16 %v4145_v29, %v4144_v1  ;;  %v4435_v18 = vld [vmem:[#allocation3 + $0x22] sm:$0xff]  ;;  %5799 = vmatprep.subr.bf16.mxu1 %v6265_v16  ;;  %v4845_v14 = vld [vmem:[%s7787_s17 + $0x20] sm:$0xff] }
 0x4c0   : > { %5648 = vmatprep.mubr.msk.bf16.mxu0 %vm2700_vm4, %v4176_v45  ;;  %v4842_v45 = vld [vmem:[%s7787_s17 + $0x8] sm:$0xff]  ;;  %v4853_v12 = vld [vmem:[%s7787_s17 + $0x60] sm:$0xff] }
 0x4c1   : > { %5657 = vmatpush3.bf16.msra.mxu0 %v6237_v15  ;;  %v5800_v36 = vpack.c.bf16 %v4842_v45, %v4841_v9 }
 0x4c2   : > { %5658 = vmatprep.subr.bf16.mxu0 %v6238_v63 }
 0x4c3   : > { %v4172_v17 = vld [vmem:[#allocation3 + $0x31] sm:$0xff] }
 0x4c4   : > { %v4146_v46 = vld [vmem:[#allocation3 + $0x30] sm:$0xff] }
 0x4c5   : > { %5659 = vmatpush3.bf16.msra.mxu0 %v6238_v63  ;;  %v4173_v20 = vld [vmem:[#allocation3 + $0x39] sm:$0xff]  ;;  %v4436_v10 = vld [vmem:[#allocation3 + $0x2a] sm:$0xff] }
 0x4c6   : > { %5660 = vmatprep.subr.bf16.mxu0 %v6239_v53  ;;  %v4177_v21 = vpack.c.bf16 %v4173_v20, %v4172_v17  ;;  %v4147_v41 = vld [vmem:[#allocation3 + $0x38] sm:$0xff]  ;;  %v4441_v55 = vpack.c.bf16 %v4436_v10, %v4435_v18 }
 0x4c7   : > { %v4151_v47 = vpack.c.bf16 %v4147_v41, %v4146_v46  ;;  %v4437_v4 = vld [vmem:[#allocation3 + $0x32] sm:$0xff]  ;;  %v4438_v34 = vld [vmem:[#allocation3 + $0x3a] sm:$0xff] }
 0x4c8   : > { %5649 = vmatmul.mubr.msk.bf16.gmra.mrb[100].mxu0 %vm2700_vm4, %v4177_v21  ;;  %v4442_v6 = vpack.c.bf16 %v4438_v34, %v4437_v4  ;;  %v4848_v4 = vld [vmem:[%s7787_s17 + $0x38] sm:$0xff] }
 0x4c9   : > { %5661 = vmatpush3.bf16.msra.mxu0 %v6239_v53  ;;  %5666 = vmatprep.mubr.msk.bf16.mxu0 %vm2700_vm4, %v4148_v25 }
 0x4ca   : > { %5662 = vmatprep.subr.bf16.mxu0 %v6240_v23 }
 0x4cd   : > { %5663 = vmatpush3.bf16.msra.mxu0 %v6240_v23 }
 0x4ce   : > { %5664 = vmatprep.subr.bf16.mxu0 %v6241_v26 }
 0x4d1   : > { %5665 = vmatpush3.bf16.msra.mxu0 %v6241_v26 }
 0x4d2   : > { %5674 = vmatprep.subr.bf16.mxu0 %v6242_v27 }
 0x4d4   : > { %5667 = vmatmul.mubr.msk.bf16.vlgmr.msra.gmra.mrb[96].mxu0 %vm2700_vm4, %v4149_v33 }
 0x4d5   : > { %5670 = vmatprep.mubr.msk.bf16.mxu0 %vm2700_vm4, %v4150_v39  ;;  %5675 = vmatpush3.bf16.msra.mxu0 %v6242_v27 }
 0x4d6   : > { %5676 = vmatprep.subr.bf16.mxu0 %v6243_v38 }
 0x4d9   : > { %5677 = vmatpush3.bf16.msra.mxu0 %v6243_v38 }
 0x4da   : > { %5678 = vmatprep.subr.bf16.mxu0 %v6244_v40 }
 0x4dc   : > { %5671 = vmatmul.mubr.msk.bf16.gmra.mrb[100].mxu0 %vm2700_vm4, %v4151_v47 }
 0x4dd   : > { %5679 = vmatpush3.bf16.msra.mxu0 %v6244_v40  ;;  %5688 = vmatprep.mubr.msk.bf16.mxu0 %vm2700_vm4, %v4439_v50 }
 0x4de   : > { %5680 = vmatprep.subr.bf16.mxu0 %v6245_v49 }
 0x4e1   : > { %5681 = vmatpush3.bf16.msra.mxu0 %v6245_v49 }
 0x4e2   : > { %5682 = vmatprep.subr.bf16.mxu0 %v6246_v54 }
 0x4e5   : > { %5683 = vmatpush3.bf16.msra.mxu0 %v6246_v54 }
 0x4e6   : > { %5684 = vmatprep.subr.bf16.mxu0 %v6247_v59 }
 0x4e9   : > { %5685 = vmatpush3.bf16.msra.mxu0 %v6247_v59 }
 0x4ea   : > { %5686 = vmatprep.subr.bf16.mxu0 %v6248_v51 }
 0x4ed   : > { %5687 = vmatpush3.bf16.msra.mxu0 %v6248_v51  ;;  %v4843_v51 = vld [vmem:[%s7787_s17 + $0x10] sm:$0xff] }
 0x4ee   : > { %v5803_v10 = vpack.c.bf16 %v4844_v35, %v4843_v51 }
 0x4f0   : > { %5689 = vmatmul.mubr.msk.bf16.vlgmr.msra.gmra.mrb[96].mxu0 %vm2700_vm4, %v4440_v24  ;;  %v4846_v24 = vld [vmem:[%s7787_s17 + $0x28] sm:$0xff] }
 0x4f1   : > { %5692 = vmatprep.mubr.msk.bf16.mxu0 %vm2700_vm4, %v4441_v55  ;;  %v5806_v18 = vpack.c.bf16 %v4846_v24, %v4845_v14  ;;  %v4847_v55 = vld [vmem:[%s7787_s17 + $0x30] sm:$0xff] }
 0x4f2   : > { %v5809_v34 = vpack.c.bf16 %v4848_v4, %v4847_v55 }
 0x4f8   : > { %5693 = vmatmul.mubr.msk.bf16.gmra.mrb[100].mxu0 %vm2700_vm4, %v4442_v6  ;;  %v4849_v6 = vld [vmem:[%s7787_s17 + $0x40] sm:$0xff] }
 0x4f9   : > { %v5812_v8 = vpack.c.bf16 %v4850_v52, %v4849_v6 }
 0x5c3   : > { %v5690_v32 = vpop.f32.mrb[96].mxu0 }
 0x5c4   : > { %v4594_v42 = vadd.f32 %v5690_v32, %v5544_v22  ;;  %v4546_v57 = vpop.f32.mrb[97].mxu0 }
 0x5c5   : > { %v4592_v37 = vadd.f32 %v5544_v22, %v4546_v57  ;;  %v5691_v58 = vpop.f32.mrb[98].mxu0  ;;  %v4856_v57 = vld [vmem:[%s7787_s17 + $0x78] sm:$0xff] }
 0x5c6   : > { %v4602_v60 = vmax.f32 %v4594_v42, 0.0  ;;  %v4595_v62 = vadd.f32 %v5691_v58, %v5544_v22  ;;  %v4549_v0 = vpop.f32.mrb[99].mxu0  ;;  %v4855_v42 = vld [vmem:[%s7787_s17 + $0x70] sm:$0xff]  ;;  %v4781_v58 = vld [vmem:[%s7786_s16] sm:$0xff] }
 0x5c7   : > { %v4600_v31 = vmax.f32 %v4592_v37, 0.0  ;;  %v4593_v15 = vadd.f32 %v5544_v22, %v4549_v0  ;;  %v5821_v37 = vpack.c.bf16 %v4856_v57, %v4855_v42  ;;  %vm4782_vm6 = vcmp.gt.f32.partialorder %v4781_v58, 0.5 }
 0x5c8   : > { %v4603_v2 = vmax.f32 %v4595_v62, 0.0  ;;  %v4617_v63 = vmul.f32 %v5545_v61, %v4602_v60 }
 0x5c9   : > { %v4615_v5 = vmul.f32 %v5545_v61, %v4600_v31  ;;  %v4601_v7 = vmax.f32 %v4593_v15, 0.0 }
 0x5ca   : > { %v4618_v23 = vmul.f32 %v5545_v61, %v4603_v2  ;;  %v4632_v28 = vadd.f32 %v5546_v44, %v4617_v63 }
 0x5cb   : > { %v4630_v53 = vadd.f32 %v5546_v44, %v4615_v5  ;;  %v4616_v11 = vmul.f32 %v5545_v61, %v4601_v7  ;;  %v5694_v17 = vpop.f32.mrb[100].mxu0 }
 0x5cc   : > { %v4598_v20 = vadd.f32 %v5694_v17, %v5544_v22  ;;  %v4562_v21 = vpop.f32.mrb[101].mxu0  ;;  %v4633_v39 = vadd.f32 %v5546_v44, %v4618_v23 }
 0x5cd   : > { %v4631_v25 = vadd.f32 %v5546_v44, %v4616_v11  ;;  %v4596_v26 = vadd.f32 %v5544_v22, %v4562_v21  ;;  %v5695_v27 = vpop.f32.mrb[102].mxu0  ;;  %5724 = vmatprep.mubr.msk.f32.mxu1 %vm2700_vm4, %v4630_v53 }
 0x5ce   : > { %v4606_v29 = vmax.f32 %v4598_v20, 0.0  ;;  %v4599_v30 = vadd.f32 %v5695_v27, %v5544_v22  ;;  %v4565_v33 = vpop.f32.mrb[103].mxu0 }
 0x5cf   : > { %v4604_v1 = vmax.f32 %v4596_v26, 0.0  ;;  %v4597_v38 = vadd.f32 %v5544_v22, %v4565_v33  ;;  %5725 = vmatmul.mubr.msk.f32.vlgmr.msra.gmra.mrb[100].mxu1 %vm2700_vm4, %v4631_v25  ;;  %v4854_v22 = vld [vmem:[%s7787_s17 + $0x68] sm:$0xff] }
 0x5d0   : > { %5727 = vmatprep.mubr.msk.f32.mxu1 %vm2700_vm4, %v4632_v28  ;;  %5801 = vmatpush3.bf16.msra.mxu1 %v5800_v36  ;;  %v4607_v41 = vmax.f32 %v4599_v30, 0.0  ;;  %v4621_v46 = vmul.f32 %v5545_v61, %v4606_v29  ;;  %v5818_v32 = vpack.c.bf16 %v4854_v22, %v4853_v12 }
 0x5d1   : > { %v4619_v40 = vmul.f32 %v5545_v61, %v4604_v1  ;;  %v4605_v43 = vmax.f32 %v4597_v38, 0.0  ;;  %5802 = vmatprep.subr.bf16.mxu1 %v6265_v16 }
 0x5d2   : > { %v4622_v49 = vmul.f32 %v5545_v61, %v4607_v41  ;;  %v4636_v54 = vadd.f32 %v5546_v44, %v4621_v46 }
 0x5d3   : > { %v4634_v47 = vadd.f32 %v5546_v44, %v4619_v40  ;;  %v4620_v48 = vmul.f32 %v5545_v61, %v4605_v43  ;;  %5728 = vmatmul.mubr.msk.f32.gmra.mrb[102].mxu1 %vm2700_vm4, %v4633_v39 }
 0x5d4   : > { %v4637_v59 = vadd.f32 %v5546_v44, %v4622_v49  ;;  %5804 = vmatpush3.bf16.msra.mxu1 %v5803_v10 }
 0x5d5   : > { %v4635_v50 = vadd.f32 %v5546_v44, %v4620_v48  ;;  %5730 = vmatprep.mubr.msk.f32.mxu1 %vm2700_vm4, %v4634_v47  ;;  %5805 = vmatprep.subr.bf16.mxu1 %v6265_v16 }
 0x5d7   : > { %5731 = vmatmul.mubr.msk.f32.gmra.mrb[104].mxu1 %vm2700_vm4, %v4635_v50 }
 0x5d8   : > { %5733 = vmatprep.mubr.msk.f32.mxu1 %vm2700_vm4, %v4636_v54  ;;  %5807 = vmatpush3.bf16.msra.mxu1 %v5806_v18 }
 0x5d9   : > { %5808 = vmatprep.subr.bf16.mxu1 %v6265_v16 }
 0x5db   : > { %5734 = vmatmul.mubr.msk.f32.gmra.mrb[106].mxu1 %vm2700_vm4, %v4637_v59  ;;  %vm6266_vm4 = vmmov 0  }
 0x5dc   : > { %5810 = vmatpush3.bf16.msra.mxu1 %v5809_v34  ;;  %5768 = vmatprep.mubr.msk.f32.mxu1 %vm6266_vm4, %v6264_v56 }
 0x5dd   : > { %5811 = vmatprep.subr.bf16.mxu1 %v6265_v16 }
 0x5e0   : > { %5813 = vmatpush3.bf16.msra.mxu1 %v5812_v8 }
 0x5e1   : > { %5814 = vmatprep.subr.bf16.mxu1 %v6265_v16 }
 0x5e4   : > { %5816 = vmatpush3.bf16.msra.mxu1 %v5815_v19 }
 0x5e5   : > { %5817 = vmatprep.subr.bf16.mxu1 %v6265_v16 }
 0x5e8   : > { %5819 = vmatpush3.bf16.msra.mxu1 %v5818_v32 }
 0x5e9   : > { %5820 = vmatprep.subr.bf16.mxu1 %v6265_v16  ;;  %v4974_v16 = vld [vmem:[%s640_s28] sm:$0xff] }
 0x5ea   : > { %4976 = vrot.lane.b32.xlu0 %v4974_v16, %s6267_s4 }
 0x5ec   : > { %5822 = vmatpush3.bf16.msra.mxu1 %v5821_v37 }
 0x6a2   : > { %v5726_v60 = vpop.f32.mrb[100].mxu1 }
 0x6a3   : > { %v4786_v61 = vsel %vm4782_vm6, %v5726_v60, 0.0  ;;  %v4742_v62 = vpop.f32.mrb[101].mxu1 }
 0x6a4   : > { %v4799_v56 = vrot.slane %v4786_v61, 4  ;;  %v4785_v0 = vsel %vm4782_vm6, %v4742_v62, 0.0 }
 0x6a5   : > { %v4793_v31 = vrot.slane %v4785_v0, 4 }
 0x6a6   : > { %v4800_v15 = vadd.f32 %v4799_v56, %v4786_v61  ;;  %v5729_v44 = vpop.f32.mrb[102].mxu1 }
 0x6a7   : > { %v4794_v5 = vadd.f32 %v4793_v31, %v4785_v0  ;;  %v4788_v2 = vsel %vm4782_vm6, %v5729_v44, 0.0  ;;  %v4752_v7 = vpop.f32.mrb[103].mxu1  ;;  %v5555_v44 = vld [vmem:[%s7788_s18] ss:$0 sm:$0xff] }
 0x6a8   : > { %v4801_v9 = vrot.slane %v4800_v15, 2  ;;  %v4811_v45 = vrot.slane %v4788_v2, 4  ;;  %v4787_v63 = vsel %vm4782_vm6, %v4752_v7, 0.0 }
 0x6a9   : > { %v4795_v53 = vrot.slane %v4794_v5, 2  ;;  %v4805_v11 = vrot.slane %v4787_v63, 4 }
 0x6aa   : > { %v4802_v17 = vadd.f32 %v4801_v9, %v4800_v15  ;;  %v4812_v20 = vadd.f32 %v4811_v45, %v4788_v2  ;;  %v5732_v21 = vpop.f32.mrb[104].mxu1 }
 0x6ab   : > { %v4796_v36 = vadd.f32 %v4795_v53, %v4794_v5  ;;  %v4806_v23 = vadd.f32 %v4805_v11, %v4787_v63  ;;  %v4790_v25 = vsel %vm4782_vm6, %v5732_v21, 0.0  ;;  %v4762_v26 = vpop.f32.mrb[105].mxu1 }
 0x6ac   : > { %v4803_v27 = vrot.slane %v4802_v17, 1  ;;  %v4813_v28 = vrot.slane %v4812_v20, 2  ;;  %v4823_v29 = vrot.slane %v4790_v25, 4  ;;  %v4789_v30 = vsel %vm4782_vm6, %v4762_v26, 0.0 }
 0x6ad   : > { %v4797_v33 = vrot.slane %v4796_v36, 1  ;;  %v4807_v1 = vrot.slane %v4806_v23, 2  ;;  %v4817_v38 = vrot.slane %v4789_v30, 4 }
 0x6ae   : > { %v4804_v39 = vadd.f32 %v4803_v27, %v4802_v17  ;;  %v4814_v40 = vadd.f32 %v4813_v28, %v4812_v20  ;;  %v4824_v41 = vadd.f32 %v4823_v29, %v4790_v25  ;;  %v5735_v43 = vpop.f32.mrb[106].mxu1 }
 0x6af   : > { %v4798_v46 = vadd.f32 %v4797_v33, %v4796_v36  ;;  %v4808_v47 = vadd.f32 %v4807_v1, %v4806_v23  ;;  %v4818_v48 = vadd.f32 %v4817_v38, %v4789_v30  ;;  %v4792_v49 = vsel %vm4782_vm6, %v5735_v43, 0.0  ;;  %v4772_v50 = vpop.f32.mrb[107].mxu1  ;;  %v4977_v30 = vpop.permute.xlu0 %4976 }
 0x6b0   : > { %v4815_v54 = vrot.slane %v4814_v40, 1  ;;  %v4825_v59 = vrot.slane %v4824_v41, 2  ;;  %v4835_v51 = vrot.slane %v4792_v49, 4  ;;  %v4791_v35 = vsel %vm4782_vm6, %v4772_v50, 0.0 }
 0x6b1   : > { %v4873_v10 = vsel %vm4872_vm7, %v4804_v39, %v4798_v46  ;;  %v4809_v14 = vrot.slane %v4808_v47, 1  ;;  %v4819_v24 = vrot.slane %v4818_v48, 2  ;;  %v4829_v18 = vrot.slane %v4791_v35, 4 }
 0x6b2   : > { %v4826_v55 = vadd.f32 %v4825_v59, %v4824_v41  ;;  %v4836_v4 = vadd.f32 %v4835_v51, %v4792_v49  ;;  %v4816_v8 = vadd.f32 %v4815_v54, %v4814_v40 }
 0x6b3   : > { %v4810_v34 = vadd.f32 %v4809_v14, %v4808_v47  ;;  %v4820_v6 = vadd.f32 %v4819_v24, %v4818_v48  ;;  %v4830_v52 = vadd.f32 %v4829_v18, %v4791_v35 }
 0x6b4   : > { %v4827_v3 = vrot.slane %v4826_v55, 1  ;;  %v4837_v13 = vrot.slane %v4836_v4, 2 }
 0x6b5   : > { %v4875_v19 = vsel %vm4874_vm8, %v4810_v34, %v4873_v10  ;;  %v4821_v12 = vrot.slane %v4820_v6, 1  ;;  %v4831_v22 = vrot.slane %v4830_v52, 2 }
 0x6b6   : > { %v4877_v32 = vsel %vm4876_vm9, %v4816_v8, %v4875_v19  ;;  %v4838_v42 = vadd.f32 %v4837_v13, %v4836_v4  ;;  %v4828_v16 = vadd.f32 %v4827_v3, %v4826_v55 }
 0x6b7   : > { %v4822_v57 = vadd.f32 %v4821_v12, %v4820_v6  ;;  %v4832_v37 = vadd.f32 %v4831_v22, %v4830_v52 }
 0x6b8   : > { %v4839_v58 = vrot.slane %v4838_v42, 1 }
 0x6b9   : > { %v4879_v60 = vsel %vm4878_vm10, %v4822_v57, %v4877_v32  ;;  %v4833_v61 = vrot.slane %v4832_v37, 1 }
 0x6ba   : > { %v4881_v62 = vsel %vm4880_vm11, %v4828_v16, %v4879_v60  ;;  %v4840_v0 = vadd.f32 %v4839_v58, %v4838_v42 }
 0x6bb   : > { %v4834_v56 = vadd.f32 %v4833_v61, %v4832_v37 }
 0x6bd   : > { %v4883_v31 = vsel %vm4882_vm12, %v4834_v56, %v4881_v62 }
 0x6be   : > { %v4885_v15 = vsel %vm4884_vm13, %v4840_v0, %v4883_v31 }
 0x6bf   : > { %5769 = vmatmul.mubr.f32.vlgmr.msra.gmra.mrb[108].mxu1 %v4885_v15 }
 0x792   : > { %v4953_v5 = vpop.f32.mrb[108].mxu1 }
 0x793   : > { %v4954_v2 = vadd.f32 %v5555_v44, %v4953_v5  ;;  %v5770_v7 = vpop.f32.mrb[109].mxu1 }
 0x795   : > { %v4958_v9 = vand.u32 2147483647, %v4954_v2  ;;  %4986 = vrot.lane.b32.xlu1 %v4954_v2, %s6267_s4  ;;  %v4957_v26 = vmax.f32 %v4954_v2, 0.0 }
 0x797   : > { %v4959_v45 = vsub.f32 0.0, %v4958_v9 }
 0x799   : > { %v4960_v63 = vmul.f32 1.442695, %v4959_v45 }
 0x79b   : > { %6249 = vpow2.f32 %v4960_v63 }
 0x7a5   : > { %v6250_v53 = vpop.eup %6249 }
 0x7a6   : > { %v4962_v11 = vadd.f32 1.0, %v6250_v53  ;;  %v4965_v17 = vmul.f32 -0.5, %v6250_v53  ;;  %v4968_v21 = vand.u32 2147483647, %v6250_v53 }
 0x7a8   : > { %6251 = vlog2.f32 %v4962_v11  ;;  %v4966_v20 = vadd.f32 1.0, %v4965_v17  ;;  %vm4969_vm14 = vcmp.lt.f32.partialorder %v4968_v21, 0.0004427343 }
 0x7aa   : > { %v4967_v25 = vmul.f32 %v6250_v53, %v4966_v20 }
 0x7b2   : > { %v6252_v36 = vpop.eup %6251 }
 0x7b3   : > { %v4964_v23 = vmul.f32 0.6931472, %v6252_v36 }
 0x7b5   : > { %v4970_v27 = vsel %vm4969_vm14, %v4967_v25, %v4964_v23 }
 0x7b6   : > { %v4971_v28 = vadd.f32 %v4970_v27, %v4957_v26 }
 0x7b8   : > { %4990 = vrot.lane.b32.xlu1 %v4971_v28, %s6267_s4  ;;  %v4972_v29 = vmul.f32 1.442695, %v4971_v28 }
 0x7ba   : > { %6253 = vpow2.f32 %v4972_v29 }
 0x7c4   : > { %v6254_v33 = vpop.eup %6253 }
 0x7c5   : > { %v4979_v1 = vmul.f32 %v6254_v33, %v4977_v30 }
 0x7c7   : > { %4981 = vrot.lane.b32.xlu0 %v4979_v1, %s6268_s23 }
 0x807   : > { %v4987_v38 = vpop.permute.xlu1 %4986 }
 0x82a   : > { %v4991_v41 = vpop.permute.xlu1 %4990 }
 0x839   : > { %v4982_v39 = vpop.permute.xlu0 %4981 }
 0x83a   : > { %v4984_v40 = vadd.f32 %v4982_v39, %v4954_v2 }
 0x83c   : > { %v4994_v43 = vsel %vm4993_vm15, %v4984_v40, %v4987_v38 }
 0x83d   : > { %v4996_v46 = vsel %vm4995_vm0, %v4994_v43, %v4991_v41 }
 0x83e   : > { %4998 = vst.msk [vmem:[%s644_s27] sm:$0xff] %vm4997_vm1, %v4996_v46 }
 0x83f PF: > { %s30_s1 = sadd.s32 1, %s6261_s1  }
 0x840   : > { %p27_p4 = scmp.ge.s32.totalorder %s30_s1, 4  }
 0x842   :  { %29 = sbr.rel (!%p27_p4) target bundleno = 6 (0x6), region = 235 }

</bundles_post_ra>
